<compile_context>
chip_gen: v5e
topology: v5e:2x2
jax: 0.10.0
libtpu: 0.0.40
codegen_flags: <defaults>
</compile_context>

<pallas_src>
import numpy as np
import jax
import jax.numpy as jnp
from jax.experimental import pallas as pl
from jax.experimental.pallas import tpu as pltpu


# ----------------------------- Pallas kernel -------------------------------

def cgnet_kernel(pos_ref, dmat_ref, w1_ref, b1_ref, w2_ref, b2_ref,
                 wc_ref, b3_ref, pd0_ref, out_ref):
    """Fused featurize -> MLP -> (net + prior) kernel, batch on the lane axis.

    pos_ref : (3N, TILE_B)      positions, row n*3+d = coord d of bead n
    dmat_ref: (3*Fp, 3N)        signed one-hot pair-difference matrix (Fp = padded F)
    w1/b1   : (H, Fp), (H, 1)
    w2/b2   : (H, H),  (H, 1)
    wc      : (1, H + Fp)       [w3^T | 0 <-unused | prior k (padded with 0)]
    b3      : (1, 1)
    pd0     : (Fp, 1)           harmonic prior equilibrium distances (padded)
    out_ref : (1, TILE_B)       energy per sample (lane-dense)
    """
    Fp = pd0_ref.shape[0]
    HIGH = jax.lax.Precision.HIGHEST

    # --- featurizer: all xyz pair differences in ONE lane-full matmul ---------
    diff = jnp.dot(dmat_ref[...], pos_ref[...],
                   preferred_element_type=jnp.float32, precision=HIGH)  # (3Fp, TILE_B)
    sq = diff * diff
    # sublane-aligned slice adds (offsets 0 / Fp / 2Fp, Fp multiple of 8)
    dsq = sq[:Fp, :] + sq[Fp:2 * Fp, :] + sq[2 * Fp:, :]                # (Fp, TILE_B)
    feat = jnp.sqrt(dsq)                                                # pair distances

    # --- energy net: MLP F -> H -> H (lane-dense activations) -----------------
    h = jnp.tanh(jnp.dot(w1_ref[...], feat,
                         preferred_element_type=jnp.float32, precision=HIGH)
                 + b1_ref[...])                                         # (H, TILE_B)
    h = jnp.tanh(jnp.dot(w2_ref[...], h,
                         preferred_element_type=jnp.float32, precision=HIGH)
                 + b2_ref[...])                                         # (H, TILE_B)

    # --- fused head: net output + harmonic prior in ONE MXU dot ---------------
    dev = feat - pd0_ref[...]                                           # (Fp, TILE_B)
    z = jnp.concatenate([h, 0.5 * dev * dev], axis=0)                   # (H+Fp, TILE_B)
    out_ref[...] = jnp.dot(wc_ref[...], z,
                           preferred_element_type=jnp.float32,
                           precision=HIGH) + b3_ref[...]                # (1, TILE_B)


# ----------------------------- wrapper --------------------------------------

def _default_num_tiles():
    """1 grid step per TensorCore: 1 on v5e/v6e (single TC), 2 on v7x (2 TCs)."""
    try:
        kind = jax.devices()[0].device_kind.lower()
    except Exception:
        return 1
    return 2 if ("v7" in kind or "7x" in kind) else 1


def general_cgnet_forward(pos, dmatT, w1T, b1c, w2T, b2c, wc, b3, pd0c,
                          *, num_tiles=None):
    """pos: (B, N, 3) as in the torch module.  Returns (B, 1) energies (k_BT)."""
    B, N, _ = pos.shape
    f32 = jnp.float32

    # One tiny transpose so the batch rides the lane axis inside the kernel.
    posT = pos.astype(f32).reshape(B, 3 * N).T                     # (3N, B)
    params = [jnp.asarray(a, f32) for a in (dmatT, w1T, b1c, w2T, b2c, wc, b3, pd0c)]

    if num_tiles is None:
        num_tiles = _default_num_tiles()
    # Lane-dense batch tiles: multiple of 128, as few grid steps as possible.
    tile_b = max(128, ((pl.cdiv(B, num_tiles) + 127) // 128) * 128)
    n_tiles = pl.cdiv(B, tile_b)
    B_pad = n_tiles * tile_b
    if B_pad != B:
        # Padded batch columns compute garbage energies (pos=0 -> feat=0,
        # dev=-d0); they are sliced off below -- never sum the padded output.
        posT = jnp.pad(posT, ((0, 0), (0, B_pad - B)))

    def run(single_buffer_params):
        def resident(shape):
            # Whole-array block, constant index -> stays VMEM-resident across
            # grid steps; optionally single-buffered (no benefit from 2 bufs).
            kwargs = {}
            if single_buffer_params:
                kwargs["pipeline_mode"] = pl.Buffered(buffer_count=1)
            return pl.BlockSpec(shape, lambda i: (0,) * len(shape), **kwargs)

        return pl.pallas_call(
            cgnet_kernel,
            out_shape=jax.ShapeDtypeStruct((1, B_pad), f32),
            grid=(n_tiles,),
            in_specs=[pl.BlockSpec((3 * N, tile_b), lambda i: (0, i))]   # pos tiles
                     + [resident(p.shape) for p in params],              # weights/prior
            out_specs=pl.BlockSpec((1, tile_b), lambda i: (0, i)),       # lane-dense out
            compiler_params=pltpu.CompilerParams(
                dimension_semantics=("parallel",),      # megacore over batch on v7x
                vmem_limit_bytes=32 * 1024 * 1024,      # way more than the ~0.2 MiB used
            ),
        )(posT, *params)

    try:
        out = run(True)      # single-buffered grid-invariant params
    except Exception:
        out = run(False)     # fallback: default double-buffering

    return out[:, :B].T      # (B, 1), padded columns discarded


# ----------------------------- reference (pure JAX) --------------------------

def reference_forward(pos, pairs_i, pairs_j, w1, b1, w2, b2, w3, b3, pk_row, pd0):
    pos = pos.astype(jnp.float32)
    diff = pos[:, pairs_i, :] - pos[:, pairs_j, :]            # (B, F, 3)
    feat = jnp.sqrt(jnp.sum(diff * diff, axis=-1))            # (B, F)
    h = jnp.tanh(feat @ w1 + b1)
    h = jnp.tanh(h @ w2 + b2)
    net_out = h @ w3 + b3
    dev = feat - pd0
    prior = jnp.sum(0.5 * pk_row * dev * dev, axis=-1, keepdims=True)
    return net_out + prior


# ----------------------------- setup & main ----------------------------------

if __name__ == "__main__":
    B, N, H = 256, 8, 32                      # batch, beads, hidden width
    F = N * (N - 1) // 2                      # 28 pairwise-distance features
    F_pad = ((F + 7) // 8) * 8                # 32: sublane-aligned feature block

    pairs = [(i, j) for i in range(N) for j in range(i + 1, N)]
    pairs_i = np.array([p[0] for p in pairs], dtype=np.int32)
    pairs_j = np.array([p[1] for p in pairs], dtype=np.int32)

    # Signed one-hot difference matrix for the transposed (batch-on-lanes) layout:
    #   dmatT[d*F_pad + f, n*3 + d] = +1 if n == i_f, -1 if n == j_f
    dmatT = np.zeros((3 * F_pad, 3 * N), dtype=np.float32)
    for f, (i, j) in enumerate(pairs):
        for d in range(3):
            dmatT[d * F_pad + f, i * 3 + d] = 1.0
            dmatT[d * F_pad + f, j * 3 + d] = -1.0
    dmatT = jnp.asarray(dmatT)

    key = jax.random.PRNGKey(0)
    k_pos, k1, k2, k3, k_pk, k_d0 = jax.random.split(key, 6)

    def linear_init(k, fan_in, fan_out):
        kw, kb = jax.random.split(k)
        bound = 1.0 / np.sqrt(fan_in)
        w = jax.random.uniform(kw, (fan_in, fan_out), jnp.float32, -bound, bound)
        b = jax.random.uniform(kb, (1, fan_out), jnp.float32, -bound, bound)
        return w, b

    w1, b1 = linear_init(k1, F, H)            # (F, H), (1, H)
    w2, b2 = linear_init(k2, H, H)            # (H, H), (1, H)
    w3, b3 = linear_init(k3, H, 1)            # (H, 1), (1, 1)

    pk_row = 0.5 + jax.random.uniform(k_pk, (1, F), jnp.float32, 0.0, 1.0)  # stiffness > 0
    pd0 = 1.0 + jax.random.uniform(k_d0, (1, F), jnp.float32, 0.0, 1.0)     # eq. distances

    # Transposed / padded parameters for the kernel.  Zero padding on the
    # feature axis of w1T and pk makes padded features contribute exactly 0.
    w1T = jnp.pad(w1.T, ((0, 0), (0, F_pad - F)))          # (H, F_pad)
    b1c = b1.reshape(H, 1)
    w2T = w2.T                                              # (H, H)
    b2c = b2.reshape(H, 1)
    pk_pad = jnp.pad(pk_row, ((0, 0), (0, F_pad - F)))      # (1, F_pad), zeros in pad
    wc = jnp.concatenate([w3.T, pk_pad], axis=1)            # (1, H + F_pad)
    pd0c = jnp.pad(pd0, ((0, 0), (0, F_pad - F))).reshape(F_pad, 1)

    pos = jax.random.normal(k_pos, (B, N, 3), jnp.float32)  # (B, N, 3)

    out = general_cgnet_forward(pos, dmatT, w1T, b1c, w2T, b2c, wc, b3, pd0c)
    out = jax.block_until_ready(out)

    with jax.default_matmul_precision("highest"):
        ref = reference_forward(pos, pairs_i, pairs_j, w1, b1, w2, b2, w3, b3,
                                pk_row, pd0)
        ref = jax.block_until_ready(ref)

    assert out.shape == (B, 1)
    np.testing.assert_allclose(np.asarray(out), np.asarray(ref),
                               rtol=1e-3, atol=1e-4)

    print("KERNEL_OK")
</pallas_src>

<mosaic_0001>
module attributes {stable_mosaic.version = 11 : i64} {
  func.func @cgnet_kernel(%arg0: i32, %arg1: memref<24x256xf32, #tpu.memory_space<vmem>>, %arg2: memref<96x24xf32, #tpu.memory_space<vmem>>, %arg3: memref<32x32xf32, #tpu.memory_space<vmem>>, %arg4: memref<32x1xf32, #tpu.memory_space<vmem>>, %arg5: memref<32x32xf32, #tpu.memory_space<vmem>>, %arg6: memref<32x1xf32, #tpu.memory_space<vmem>>, %arg7: memref<1x64xf32, #tpu.memory_space<vmem>>, %arg8: memref<1x1xf32, #tpu.memory_space<vmem>>, %arg9: memref<32x1xf32, #tpu.memory_space<vmem>>, %arg10: memref<1x256xf32, #tpu.memory_space<vmem>>) attributes {dimension_semantics = [#tpu.dimension_semantics<parallel>], iteration_bounds = array<i64: 1>, scalar_prefetch = 0 : i64, scratch_operands = 0 : i64, tpu.core_type = #tpu.core_type<tc>, window_params = [{transform_indices = @transform_0, window_bounds = array<i64: 24, 256>}, {pipeline_mode = #tpu.pipeline_mode<synchronous>, transform_indices = @transform_1, window_bounds = array<i64: 96, 24>}, {pipeline_mode = #tpu.pipeline_mode<synchronous>, transform_indices = @transform_2, window_bounds = array<i64: 32, 32>}, {pipeline_mode = #tpu.pipeline_mode<synchronous>, transform_indices = @transform_3, window_bounds = array<i64: 32, 1>}, {pipeline_mode = #tpu.pipeline_mode<synchronous>, transform_indices = @transform_4, window_bounds = array<i64: 32, 32>}, {pipeline_mode = #tpu.pipeline_mode<synchronous>, transform_indices = @transform_5, window_bounds = array<i64: 32, 1>}, {pipeline_mode = #tpu.pipeline_mode<synchronous>, transform_indices = @transform_6, window_bounds = array<i64: 1, 64>}, {pipeline_mode = #tpu.pipeline_mode<synchronous>, transform_indices = @transform_7, window_bounds = array<i64: 1, 1>}, {pipeline_mode = #tpu.pipeline_mode<synchronous>, transform_indices = @transform_8, window_bounds = array<i64: 32, 1>}, {transform_indices = @transform_9, window_bounds = array<i64: 1, 256>}]} {
    %c0 = arith.constant 0 : index
    %c0_0 = arith.constant 0 : index
    %0 = vector.load %arg2[%c0, %c0_0] : memref<96x24xf32, #tpu.memory_space<vmem>>, vector<96x24xf32>
    %c0_1 = arith.constant 0 : index
    %c0_2 = arith.constant 0 : index
    %1 = vector.load %arg1[%c0_1, %c0_2] : memref<24x256xf32, #tpu.memory_space<vmem>>, vector<24x256xf32>
    %cst = arith.constant dense<0.000000e+00> : vector<96x256xf32>
    %2 = tpu.matmul %0, %1, %cst {dimension_numbers = #tpu.dot_dimension_numbers<[1], [0], [0], [1], [0, 0, 1, 1], [], []>, precision = #tpu.contract_precision<fp32>} : vector<96x24xf32>, vector<24x256xf32>, vector<96x256xf32> -> vector<96x256xf32>
    %3 = arith.mulf %2, %2 : vector<96x256xf32>
    %4 = vector.extract_strided_slice %3 {offsets = [0, 0], sizes = [32, 256], strides = [1, 1]} : vector<96x256xf32> to vector<32x256xf32>
    %5 = vector.extract_strided_slice %3 {offsets = [32, 0], sizes = [32, 256], strides = [1, 1]} : vector<96x256xf32> to vector<32x256xf32>
    %6 = arith.addf %4, %5 : vector<32x256xf32>
    %7 = vector.extract_strided_slice %3 {offsets = [64, 0], sizes = [32, 256], strides = [1, 1]} : vector<96x256xf32> to vector<32x256xf32>
    %8 = arith.addf %6, %7 : vector<32x256xf32>
    %9 = math.sqrt %8 : vector<32x256xf32>
    %c0_3 = arith.constant 0 : index
    %c0_4 = arith.constant 0 : index
    %10 = vector.load %arg3[%c0_3, %c0_4] : memref<32x32xf32, #tpu.memory_space<vmem>>, vector<32x32xf32>
    %cst_5 = arith.constant dense<0.000000e+00> : vector<32x256xf32>
    %11 = tpu.matmul %10, %9, %cst_5 {dimension_numbers = #tpu.dot_dimension_numbers<[1], [0], [0], [1], [0, 0, 1, 1], [], []>, precision = #tpu.contract_precision<fp32>} : vector<32x32xf32>, vector<32x256xf32>, vector<32x256xf32> -> vector<32x256xf32>
    %c0_6 = arith.constant 0 : index
    %c0_7 = arith.constant 0 : index
    %12 = vector.load %arg4[%c0_6, %c0_7] : memref<32x1xf32, #tpu.memory_space<vmem>>, vector<32x1xf32>
    %13 = vector.broadcast %12 : vector<32x1xf32> to vector<32x256xf32>
    %14 = arith.addf %11, %13 : vector<32x256xf32>
    %15 = math.tanh %14 : vector<32x256xf32>
    %c0_8 = arith.constant 0 : index
    %c0_9 = arith.constant 0 : index
    %16 = vector.load %arg5[%c0_8, %c0_9] : memref<32x32xf32, #tpu.memory_space<vmem>>, vector<32x32xf32>
    %cst_10 = arith.constant dense<0.000000e+00> : vector<32x256xf32>
    %17 = tpu.matmul %16, %15, %cst_10 {dimension_numbers = #tpu.dot_dimension_numbers<[1], [0], [0], [1], [0, 0, 1, 1], [], []>, precision = #tpu.contract_precision<fp32>} : vector<32x32xf32>, vector<32x256xf32>, vector<32x256xf32> -> vector<32x256xf32>
    %c0_11 = arith.constant 0 : index
    %c0_12 = arith.constant 0 : index
    %18 = vector.load %arg6[%c0_11, %c0_12] : memref<32x1xf32, #tpu.memory_space<vmem>>, vector<32x1xf32>
    %19 = vector.broadcast %18 : vector<32x1xf32> to vector<32x256xf32>
    %20 = arith.addf %17, %19 : vector<32x256xf32>
    %21 = math.tanh %20 : vector<32x256xf32>
    %c0_13 = arith.constant 0 : index
    %c0_14 = arith.constant 0 : index
    %22 = vector.load %arg9[%c0_13, %c0_14] : memref<32x1xf32, #tpu.memory_space<vmem>>, vector<32x1xf32>
    %23 = vector.broadcast %22 : vector<32x1xf32> to vector<32x256xf32>
    %24 = arith.subf %9, %23 : vector<32x256xf32>
    %cst_15 = arith.constant 5.000000e-01 : f32
    %25 = vector.broadcast %cst_15 : f32 to vector<32x256xf32>
    %26 = arith.mulf %25, %24 : vector<32x256xf32>
    %27 = arith.mulf %26, %24 : vector<32x256xf32>
    %28 = tpu.concatenate %21, %27 in 0 : vector<32x256xf32>, vector<32x256xf32> -> vector<64x256xf32>
    %c0_16 = arith.constant 0 : index
    %c0_17 = arith.constant 0 : index
    %29 = vector.load %arg7[%c0_16, %c0_17] : memref<1x64xf32, #tpu.memory_space<vmem>>, vector<1x64xf32>
    %cst_18 = arith.constant dense<0.000000e+00> : vector<1x256xf32>
    %30 = tpu.matmul %29, %28, %cst_18 {dimension_numbers = #tpu.dot_dimension_numbers<[1], [0], [0], [1], [0, 0, 1, 1], [], []>, precision = #tpu.contract_precision<fp32>} : vector<1x64xf32>, vector<64x256xf32>, vector<1x256xf32> -> vector<1x256xf32>
    %c0_19 = arith.constant 0 : index
    %c0_20 = arith.constant 0 : index
    %31 = vector.load %arg8[%c0_19, %c0_20] : memref<1x1xf32, #tpu.memory_space<vmem>>, vector<1x1xf32>
    %32 = vector.broadcast %31 : vector<1x1xf32> to vector<1x256xf32>
    %33 = arith.addf %30, %32 : vector<1x256xf32>
    %c0_21 = arith.constant 0 : index
    %c0_22 = arith.constant 0 : index
    %34 = vector.load %arg10[%c0_21, %c0_22] : memref<1x256xf32, #tpu.memory_space<vmem>>, vector<1x256xf32>
    tpu.vector_store %arg10[%c0_21, %c0_22], %33 {strides = array<i32>} : memref<1x256xf32, #tpu.memory_space<vmem>>, vector<1x256xf32>,
    return
  }
  func.func @transform_0(%arg0: i32) -> (i32, i32) {
    %c0_i32 = arith.constant 0 : i32
    %c0_i32_0 = arith.constant 0 : i32
    return %c0_i32, %arg0 : i32, i32
  }
  func.func @transform_1(%arg0: i32) -> (i32, i32) {
    %c0_i32 = arith.constant 0 : i32
    %c0_i32_0 = arith.constant 0 : i32
    %c0_i32_1 = arith.constant 0 : i32
    return %c0_i32, %c0_i32_0 : i32, i32
  }
  func.func @transform_2(%arg0: i32) -> (i32, i32) {
    %c0_i32 = arith.constant 0 : i32
    %c0_i32_0 = arith.constant 0 : i32
    %c0_i32_1 = arith.constant 0 : i32
    return %c0_i32, %c0_i32_0 : i32, i32
  }
  func.func @transform_3(%arg0: i32) -> (i32, i32) {
    %c0_i32 = arith.constant 0 : i32
    %c0_i32_0 = arith.constant 0 : i32
    %c0_i32_1 = arith.constant 0 : i32
    return %c0_i32, %c0_i32_0 : i32, i32
  }
  func.func @transform_4(%arg0: i32) -> (i32, i32) {
    %c0_i32 = arith.constant 0 : i32
    %c0_i32_0 = arith.constant 0 : i32
    %c0_i32_1 = arith.constant 0 : i32
    return %c0_i32, %c0_i32_0 : i32, i32
  }
  func.func @transform_5(%arg0: i32) -> (i32, i32) {
    %c0_i32 = arith.constant 0 : i32
    %c0_i32_0 = arith.constant 0 : i32
    %c0_i32_1 = arith.constant 0 : i32
    return %c0_i32, %c0_i32_0 : i32, i32
  }
  func.func @transform_6(%arg0: i32) -> (i32, i32) {
    %c0_i32 = arith.constant 0 : i32
    %c0_i32_0 = arith.constant 0 : i32
    %c0_i32_1 = arith.constant 0 : i32
    return %c0_i32, %c0_i32_0 : i32, i32
  }
  func.func @transform_7(%arg0: i32) -> (i32, i32) {
    %c0_i32 = arith.constant 0 : i32
    %c0_i32_0 = arith.constant 0 : i32
    %c0_i32_1 = arith.constant 0 : i32
    return %c0_i32, %c0_i32_0 : i32, i32
  }
  func.func @transform_8(%arg0: i32) -> (i32, i32) {
    %c0_i32 = arith.constant 0 : i32
    %c0_i32_0 = arith.constant 0 : i32
    %c0_i32_1 = arith.constant 0 : i32
    return %c0_i32, %c0_i32_0 : i32, i32
  }
  func.func @transform_9(%arg0: i32) -> (i32, i32) {
    %c0_i32 = arith.constant 0 : i32
    %c0_i32_0 = arith.constant 0 : i32
    return %c0_i32, %arg0 : i32, i32
  }
}

module attributes {stable_mosaic.version = 11 : i64} {
  func.func @cgnet_kernel(%arg0: i32, %arg1: memref<24x256xf32, #tpu.memory_space<vmem>>, %arg2: memref<96x24xf32, #tpu.memory_space<vmem>>, %arg3: memref<32x32xf32, #tpu.memory_space<vmem>>, %arg4: memref<32x1xf32, #tpu.memory_space<vmem>>, %arg5: memref<32x32xf32, #tpu.memory_space<vmem>>, %arg6: memref<32x1xf32, #tpu.memory_space<vmem>>, %arg7: memref<1x64xf32, #tpu.memory_space<vmem>>, %arg8: memref<1x1xf32, #tpu.memory_space<vmem>>, %arg9: memref<32x1xf32, #tpu.memory_space<vmem>>, %arg10: memref<1x256xf32, #tpu.memory_space<vmem>>) attributes {dimension_semantics = [#tpu.dimension_semantics<parallel>], iteration_bounds = array<i64: 1>, scalar_prefetch = 0 : i64, scratch_operands = 0 : i64, tpu.core_type = #tpu.core_type<tc>, window_params = [{transform_indices = @transform_0, window_bounds = array<i64: 24, 256>}, {pipeline_mode = #tpu.pipeline_mode<synchronous>, transform_indices = @transform_1, window_bounds = array<i64: 96, 24>}, {pipeline_mode = #tpu.pipeline_mode<synchronous>, transform_indices = @transform_2, window_bounds = array<i64: 32, 32>}, {pipeline_mode = #tpu.pipeline_mode<synchronous>, transform_indices = @transform_3, window_bounds = array<i64: 32, 1>}, {pipeline_mode = #tpu.pipeline_mode<synchronous>, transform_indices = @transform_4, window_bounds = array<i64: 32, 32>}, {pipeline_mode = #tpu.pipeline_mode<synchronous>, transform_indices = @transform_5, window_bounds = array<i64: 32, 1>}, {pipeline_mode = #tpu.pipeline_mode<synchronous>, transform_indices = @transform_6, window_bounds = array<i64: 1, 64>}, {pipeline_mode = #tpu.pipeline_mode<synchronous>, transform_indices = @transform_7, window_bounds = array<i64: 1, 1>}, {pipeline_mode = #tpu.pipeline_mode<synchronous>, transform_indices = @transform_8, window_bounds = array<i64: 32, 1>}, {transform_indices = @transform_9, window_bounds = array<i64: 1, 256>}]} {
    %c0 = arith.constant 0 : index
    %c0_0 = arith.constant 0 : index
    %0 = vector.load %arg2[%c0, %c0_0] : memref<96x24xf32, #tpu.memory_space<vmem>>, vector<96x24xf32>
    %c0_1 = arith.constant 0 : index
    %c0_2 = arith.constant 0 : index
    %1 = vector.load %arg1[%c0_1, %c0_2] : memref<24x256xf32, #tpu.memory_space<vmem>>, vector<24x256xf32>
    %cst = arith.constant dense<0.000000e+00> : vector<96x256xf32>
    %2 = tpu.matmul %0, %1, %cst {dimension_numbers = #tpu.dot_dimension_numbers<[1], [0], [0], [1], [0, 0, 1, 1], [], []>, precision = #tpu.contract_precision<fp32>} : vector<96x24xf32>, vector<24x256xf32>, vector<96x256xf32> -> vector<96x256xf32>
    %3 = arith.mulf %2, %2 : vector<96x256xf32>
    %4 = vector.extract_strided_slice %3 {offsets = [0, 0], sizes = [32, 256], strides = [1, 1]} : vector<96x256xf32> to vector<32x256xf32>
    %5 = vector.extract_strided_slice %3 {offsets = [32, 0], sizes = [32, 256], strides = [1, 1]} : vector<96x256xf32> to vector<32x256xf32>
    %6 = arith.addf %4, %5 : vector<32x256xf32>
    %7 = vector.extract_strided_slice %3 {offsets = [64, 0], sizes = [32, 256], strides = [1, 1]} : vector<96x256xf32> to vector<32x256xf32>
    %8 = arith.addf %6, %7 : vector<32x256xf32>
    %9 = math.sqrt %8 : vector<32x256xf32>
    %c0_3 = arith.constant 0 : index
    %c0_4 = arith.constant 0 : index
    %10 = vector.load %arg3[%c0_3, %c0_4] : memref<32x32xf32, #tpu.memory_space<vmem>>, vector<32x32xf32>
    %cst_5 = arith.constant dense<0.000000e+00> : vector<32x256xf32>
    %11 = tpu.matmul %10, %9, %cst_5 {dimension_numbers = #tpu.dot_dimension_numbers<[1], [0], [0], [1], [0, 0, 1, 1], [], []>, precision = #tpu.contract_precision<fp32>} : vector<32x32xf32>, vector<32x256xf32>, vector<32x256xf32> -> vector<32x256xf32>
    %c0_6 = arith.constant 0 : index
    %c0_7 = arith.constant 0 : index
    %12 = vector.load %arg4[%c0_6, %c0_7] : memref<32x1xf32, #tpu.memory_space<vmem>>, vector<32x1xf32>
    %13 = vector.broadcast %12 : vector<32x1xf32> to vector<32x256xf32>
    %14 = arith.addf %11, %13 : vector<32x256xf32>
    %15 = math.tanh %14 : vector<32x256xf32>
    %c0_8 = arith.constant 0 : index
    %c0_9 = arith.constant 0 : index
    %16 = vector.load %arg5[%c0_8, %c0_9] : memref<32x32xf32, #tpu.memory_space<vmem>>, vector<32x32xf32>
    %cst_10 = arith.constant dense<0.000000e+00> : vector<32x256xf32>
    %17 = tpu.matmul %16, %15, %cst_10 {dimension_numbers = #tpu.dot_dimension_numbers<[1], [0], [0], [1], [0, 0, 1, 1], [], []>, precision = #tpu.contract_precision<fp32>} : vector<32x32xf32>, vector<32x256xf32>, vector<32x256xf32> -> vector<32x256xf32>
    %c0_11 = arith.constant 0 : index
    %c0_12 = arith.constant 0 : index
    %18 = vector.load %arg6[%c0_11, %c0_12] : memref<32x1xf32, #tpu.memory_space<vmem>>, vector<32x1xf32>
    %19 = vector.broadcast %18 : vector<32x1xf32> to vector<32x256xf32>
    %20 = arith.addf %17, %19 : vector<32x256xf32>
    %21 = math.tanh %20 : vector<32x256xf32>
    %c0_13 = arith.constant 0 : index
    %c0_14 = arith.constant 0 : index
    %22 = vector.load %arg9[%c0_13, %c0_14] : memref<32x1xf32, #tpu.memory_space<vmem>>, vector<32x1xf32>
    %23 = vector.broadcast %22 : vector<32x1xf32> to vector<32x256xf32>
    %24 = arith.subf %9, %23 : vector<32x256xf32>
    %cst_15 = arith.constant 5.000000e-01 : f32
    %25 = vector.broadcast %cst_15 : f32 to vector<32x256xf32>
    %26 = arith.mulf %25, %24 : vector<32x256xf32>
    %27 = arith.mulf %26, %24 : vector<32x256xf32>
    %28 = tpu.concatenate %21, %27 in 0 : vector<32x256xf32>, vector<32x256xf32> -> vector<64x256xf32>
    %c0_16 = arith.constant 0 : index
    %c0_17 = arith.constant 0 : index
    %29 = vector.load %arg7[%c0_16, %c0_17] : memref<1x64xf32, #tpu.memory_space<vmem>>, vector<1x64xf32>
    %cst_18 = arith.constant dense<0.000000e+00> : vector<1x256xf32>
    %30 = tpu.matmul %29, %28, %cst_18 {dimension_numbers = #tpu.dot_dimension_numbers<[1], [0], [0], [1], [0, 0, 1, 1], [], []>, precision = #tpu.contract_precision<fp32>} : vector<1x64xf32>, vector<64x256xf32>, vector<1x256xf32> -> vector<1x256xf32>
    %c0_19 = arith.constant 0 : index
    %c0_20 = arith.constant 0 : index
    %31 = vector.load %arg8[%c0_19, %c0_20] : memref<1x1xf32, #tpu.memory_space<vmem>>, vector<1x1xf32>
    %32 = vector.broadcast %31 : vector<1x1xf32> to vector<1x256xf32>
    %33 = arith.addf %30, %32 : vector<1x256xf32>
    %c0_21 = arith.constant 0 : index
    %c0_22 = arith.constant 0 : index
    %34 = vector.load %arg10[%c0_21, %c0_22] : memref<1x256xf32, #tpu.memory_space<vmem>>, vector<1x256xf32>
    tpu.vector_store %arg10[%c0_21, %c0_22], %33 {strides = array<i32>} : memref<1x256xf32, #tpu.memory_space<vmem>>, vector<1x256xf32>,
    return
  }
  func.func @transform_0(%arg0: i32) -> (i32, i32) {
    %c0_i32 = arith.constant 0 : i32
    %c0_i32_0 = arith.constant 0 : i32
    return %c0_i32, %arg0 : i32, i32
  }
  func.func @transform_1(%arg0: i32) -> (i32, i32) {
    %c0_i32 = arith.constant 0 : i32
    %c0_i32_0 = arith.constant 0 : i32
    %c0_i32_1 = arith.constant 0 : i32
    return %c0_i32, %c0_i32_0 : i32, i32
  }
  func.func @transform_2(%arg0: i32) -> (i32, i32) {
    %c0_i32 = arith.constant 0 : i32
    %c0_i32_0 = arith.constant 0 : i32
    %c0_i32_1 = arith.constant 0 : i32
    return %c0_i32, %c0_i32_0 : i32, i32
  }
  func.func @transform_3(%arg0: i32) -> (i32, i32) {
    %c0_i32 = arith.constant 0 : i32
    %c0_i32_0 = arith.constant 0 : i32
    %c0_i32_1 = arith.constant 0 : i32
    return %c0_i32, %c0_i32_0 : i32, i32
  }
  func.func @transform_4(%arg0: i32) -> (i32, i32) {
    %c0_i32 = arith.constant 0 : i32
    %c0_i32_0 = arith.constant 0 : i32
    %c0_i32_1 = arith.constant 0 : i32
    return %c0_i32, %c0_i32_0 : i32, i32
  }
  func.func @transform_5(%arg0: i32) -> (i32, i32) {
    %c0_i32 = arith.constant 0 : i32
    %c0_i32_0 = arith.constant 0 : i32
    %c0_i32_1 = arith.constant 0 : i32
    return %c0_i32, %c0_i32_0 : i32, i32
  }
  func.func @transform_6(%arg0: i32) -> (i32, i32) {
    %c0_i32 = arith.constant 0 : i32
    %c0_i32_0 = arith.constant 0 : i32
    %c0_i32_1 = arith.constant 0 : i32
    return %c0_i32, %c0_i32_0 : i32, i32
  }
  func.func @transform_7(%arg0: i32) -> (i32, i32) {
    %c0_i32 = arith.constant 0 : i32
    %c0_i32_0 = arith.constant 0 : i32
    %c0_i32_1 = arith.constant 0 : i32
    return %c0_i32, %c0_i32_0 : i32, i32
  }
  func.func @transform_8(%arg0: i32) -> (i32, i32) {
    %c0_i32 = arith.constant 0 : i32
    %c0_i32_0 = arith.constant 0 : i32
    %c0_i32_1 = arith.constant 0 : i32
    return %c0_i32, %c0_i32_0 : i32, i32
  }
  func.func @transform_9(%arg0: i32) -> (i32, i32) {
    %c0_i32 = arith.constant 0 : i32
    %c0_i32_0 = arith.constant 0 : i32
    return %c0_i32, %arg0 : i32, i32
  }
}

</mosaic_0001>

<bundles_post_ra>
// kernel: tpu_custom_call.1
= control target key start
LH: loop header
LB: loop body
LE: loop exit
PB: predicated region body
PF: predicated region fallthrough
CT: control target
= control target key end

     0   :  { %s4361_s0 = inlined_call_operand.vmem [shape: f32[24,256], index: 0, kind: input, shape index: {}]   ;;  %s4362_s1 = inlined_call_operand.vmem [shape: f32[96,24], index: 1, kind: input, shape index: {}]   ;;  %s4363_s2 = inlined_call_operand.vmem [shape: f32[32,32], index: 2, kind: input, shape index: {}]   ;;  %s4364_s3 = inlined_call_operand.vmem [shape: f32[32,1], index: 3, kind: input, shape index: {}]   ;;  %s4365_s4 = inlined_call_operand.vmem [shape: f32[32,32], index: 4, kind: input, shape index: {}]   ;;  %s4366_s5 = inlined_call_operand.vmem [shape: f32[32,1], index: 5, kind: input, shape index: {}]   ;;  %s4367_s6 = inlined_call_operand.vmem [shape: f32[1,64], index: 6, kind: input, shape index: {}]   ;;  %s4368_s7 = inlined_call_operand.<no memory space> [shape: f32[1,1], index: 7, kind: input, shape index: {}]   ;;  %s4369_s8 = inlined_call_operand.vmem [shape: f32[32,1], index: 8, kind: input, shape index: {}]   ;;  %s4370_s9 = inlined_call_operand.hbm [shape: f32[1,256], index: 9, kind: output, shape index: {}]  }
   0x1   :  { %v14_v0 = vstv %s4368_s7 }
   0x2   :  { %15 = vst [vmem:[#allocation2] sm:$0x1] %v14_v0 }
   0x3   :  { %v51_v1 = vld [vmem:[%s4361_s0 + $0x20] sm:$0xff]  ;;  %v49_v2 = vld [vmem:[%s4361_s0 + $0x10] sm:$0xff]  ;;  %vm53_vm0 = vcmask 195584   ;;  %v36_v8 = vld [vmem:[%s4362_s1 + $0x8] sm:$0xff] }
   0x4   :  { %v47_v3 = vld [vmem:[%s4361_s0] sm:$0xff]  ;;  %v3165_v4 = vand.u32 4294901760, %v51_v1  ;;  %v3167_v5 = vand.u32 4294901760, %v49_v2  ;;  %v37_v9 = vld [vmem:[%s4362_s1 + $0x10] sm:$0xff]  ;;  %v58_v11 = vsel %vm53_vm0, %v36_v8, 0 }
   0x5   :  { %v3169_v6 = vand.u32 4294901760, %v47_v3  ;;  %v35_v7 = vld [vmem:[%s4362_s1] sm:$0xff] }
   0x6   :  { %v55_v10 = vsel %vm53_vm0, %v35_v7, 0  ;;  %104 = vmatpush.msra.mxu0 %v3165_v4  ;;  %v220_v12 = vsub.f32 %v51_v1, %v3165_v4  ;;  %383 = vmatpush.msra.mxu3 %v3165_v4  ;;  %v226_v13 = vsub.f32 %v49_v2, %v3167_v5 }
   0x7   :  { %v232_v14 = vsub.f32 %v47_v3, %v3169_v6  ;;  %v3187_v15 = vand.u32 4294901760, %v55_v10 }
   0x8   :  { %16 = vsyncpa [#allocation4], 0  ;;  %v3189_v16 = vand.u32 4294901760, %v58_v11  ;;  %v61_v17 = vsel %vm53_vm0, %v37_v9, 0  ;;  %301 = vmatpush.msra.mxu2 %v220_v12  ;;  %106 = vmatpush.msra.mxu0 %v3167_v5  ;;  %v221_v18 = vand.u32 4294901760, %v220_v12  ;;  %v227_v20 = vand.u32 4294901760, %v226_v13 }
   0x9   :  { %v3194_v19 = vsub.f32 %v55_v10, %v3187_v15  ;;  %v233_v21 = vand.u32 4294901760, %v232_v14  ;;  %v52_v22 = vld [vmem:[%s4361_s0 + $0x28] sm:$0xff]  ;;  %385 = vmatpush.msra.mxu3 %v3167_v5  ;;  %v3210_v29 = vand.u32 4294901760, %v61_v17  ;;  %v38_v38 = vld [vmem:[%s4362_s1 + $0x18] sm:$0xff]  ;;  %v39_v47 = vld [vmem:[%s4362_s1 + $0x20] sm:$0xff]  ;;  %vm1280_vm1 = vcmask 261120  }
   0xa   :  { %v3201_v23 = vsub.f32 %v58_v11, %v3189_v16  ;;  %v3203_v24 = vand.u32 4294901760, %v52_v22  ;;  %304 = vmatpush.msra.mxu2 %v226_v13  ;;  %108 = vmatpush.msra.mxu0 %v3169_v6  ;;  %v222_v25 = vsub.f32 %v220_v12, %v221_v18  ;;  %v228_v27 = vsub.f32 %v226_v13, %v227_v20  ;;  %v40_v54 = vld [vmem:[%s4362_s1 + $0x28] sm:$0xff]  ;;  %v41_v61 = vld [vmem:[%s4362_s1 + $0x30] sm:$0xff]  ;;  %v50_v0 = vld [vmem:[%s4361_s0 + $0x18] sm:$0xff]  ;;  %s3013_s16 = sshll.u32 %s4370_s9, 4  ;;  %s3014_s16 = int_to_ptr.hbm [resolvable:$true] %s3013_s16 }
   0xb   :  { %v3207_v26 = vand.u32 4294901760, %v3194_v19  ;;  %v234_v28 = vsub.f32 %v232_v14, %v233_v21  ;;  %387 = vmatpush.msra.mxu3 %v3169_v6  ;;  %v3236_v41 = vsub.f32 %v61_v17, %v3210_v29  ;;  %v64_v42 = vsel %vm53_vm0, %v38_v38, 0  ;;  %v42_v8 = vld [vmem:[%s4362_s1 + $0x38] sm:$0xff] }
   0xc   :  { %477 = vmatpush.msrb.mxu0 %v221_v18  ;;  %v3213_v30 = vsub.f32 %v52_v22, %v3203_v24  ;;  %v223_v31 = vand.u32 4294901760, %v222_v25  ;;  %307 = vmatpush.msra.mxu2 %v232_v14  ;;  %v229_v33 = vand.u32 4294901760, %v228_v27  ;;  %v3219_v34 = vand.u32 4294901760, %v3201_v23 }
   0xd   :  { %v112_v32 = vsub.f32 %v3194_v19, %v3207_v26  ;;  %391 = vmatmul.f32.vlgmr.msra.gmra.mxu3 %v3207_v26  ;;  %310 = vmatmul.f32.vlgmr.msra.gmra.mxu2 %v3194_v19  ;;  %v235_v37 = vand.u32 4294901760, %v234_v28  ;;  %v3245_v45 = vand.u32 4294901760, %v3236_v41  ;;  %v3247_v46 = vand.u32 4294901760, %v64_v42 }
   0xe   :  { %v734_v35 = vand.u32 4294901760, %v3213_v30  ;;  %481 = vmatpush.msrb.mxu0 %v227_v20  ;;  %224 = vmatpush.msra.mxu1 %v223_v31  ;;  %v120_v40 = vsub.f32 %v3201_v23, %v3219_v34  ;;  %v67_v50 = vsel %vm53_vm0, %v39_v47, 0  ;;  %v70_v57 = vsel %vm53_vm0, %v40_v54, 0  ;;  %v43_v20 = vld [vmem:[%s4362_s1 + $0x40] sm:$0xff] }
   0xf   :  { %v3223_v36 = vand.u32 4294901760, %v112_v32  ;;  %617 = vmatpush.msrb.mxu2 %v3203_v24  ;;  %v128_v48 = vsub.f32 %v3236_v41, %v3245_v45  ;;  %v3259_v49 = vsub.f32 %v64_v42, %v3247_v46  ;;  %v3271_v53 = vand.u32 4294901760, %v67_v50  ;;  %v44_v32 = vld [vmem:[%s4362_s1 + $0x48] sm:$0xff] }
  0x10   :  { %v735_v39 = vsub.f32 %v3213_v30, %v734_v35  ;;  %485 = vmatpush.msrb.mxu0 %v233_v21  ;;  %230 = vmatpush.msra.mxu1 %v229_v33  ;;  %v3241_v44 = vand.u32 4294901760, %v120_v40  ;;  %v3291_v60 = vand.u32 4294901760, %v70_v57  ;;  %v73_v1 = vsel %vm53_vm0, %v41_v61, 0 }
  0x11   :  { %114 = vmatmul.f32.vlgmr.msra.gmra.mxu0 %v3223_v36  ;;  %v3265_v51 = vand.u32 4294901760, %v128_v48  ;;  %v3269_v52 = vand.u32 4294901760, %v3259_v49  ;;  %v3281_v56 = vsub.f32 %v67_v50, %v3271_v53  ;;  %v3307_v2 = vand.u32 4294901760, %v50_v0  ;;  %v45_v48 = vld [vmem:[%s4362_s1 + $0x50] sm:$0xff] }
  0x12   :  { %v736_v43 = vand.u32 4294901760, %v735_v39  ;;  %814 = vmatpush.msra.mxu0 %v3213_v30  ;;  %236 = vmatpush.msra.mxu1 %v235_v37  ;;  %v3301_v63 = vsub.f32 %v70_v57, %v3291_v60  ;;  %v76_v12 = vsel %vm53_vm0, %v42_v8, 0  ;;  %v79_v25 = vsel %vm53_vm0, %v43_v20, 0 }
  0x13   :  { %238 = vmatmul.f32.vlgmr.msra.gmra.mxu1 %v3187_v15  ;;  %v136_v55 = vsub.f32 %v3259_v49, %v3269_v52  ;;  %v3289_v59 = vand.u32 4294901760, %v3281_v56  ;;  %619 = vmatpush.msrb.mxu2 %v3307_v2  ;;  %v739_v3 = vsub.f32 %v50_v0, %v3307_v2  ;;  %v3339_v18 = vand.u32 4294901760, %v76_v12 }
  0x14   :  { %737 = vmatpush.msrb.mxu3 %v736_v43  ;;  %549 = vmatpush.msrb.mxu1 %v3165_v4  ;;  %v3359_v31 = vand.u32 4294901760, %v79_v25  ;;  %v82_v38 = vsel %vm53_vm0, %v44_v32, 0  ;;  %v48_v43 = vld [vmem:[%s4361_s0 + $0x8] sm:$0xff]  ;;  %v85_v57 = vsel %vm53_vm0, %v45_v48, 0 }
  0x15   :  { %397 = vmatmul.f32.gmra.mxu3 %v3219_v34  ;;  %315 = vmatmul.f32.gmra.mxu2 %v3201_v23  ;;  %v3285_v58 = vand.u32 4294901760, %v136_v55  ;;  %v144_v62 = vsub.f32 %v3281_v56, %v3289_v59  ;;  %v740_v7 = vand.u32 4294901760, %v739_v3  ;;  %v3349_v22 = vsub.f32 %v76_v12, %v3339_v18 }
  0x16   :  { %551 = vmatpush.msrb.mxu1 %v3167_v5  ;;  %v3316_v5 = vand.u32 4294901760, %v3301_v63  ;;  %817 = vmatpush.msra.mxu0 %v739_v3  ;;  %v3369_v37 = vsub.f32 %v79_v25, %v3359_v31  ;;  %v3379_v42 = vand.u32 4294901760, %v82_v38  ;;  %v620_v47 = vand.u32 4294901760, %v48_v43 }
  0x17   :  { %v3312_v4 = vand.u32 4294901760, %v144_v62  ;;  %v741_v9 = vsub.f32 %v739_v3, %v740_v7  ;;  %v3357_v28 = vand.u32 4294901760, %v3349_v22  ;;  %v3404_v3 = vand.u32 4294901760, %v85_v57 }
  0x18   :  { %553 = vmatpush.msrb.mxu1 %v3169_v6  ;;  %v3318_v6 = vand.u32 4294901760, %v73_v1  ;;  %v152_v10 = vsub.f32 %v3301_v63, %v3316_v5  ;;  %v3377_v40 = vand.u32 4294901760, %v3369_v37  ;;  %621 = vmatpush.msrb.mxu2 %v620_v47  ;;  %v745_v50 = vsub.f32 %v48_v43, %v620_v47 }
  0x19   :  { %122 = vmatmul.f32.gmra.mxu0 %v3241_v44  ;;  %v742_v13 = vand.u32 4294901760, %v741_v9  ;;  %v168_v33 = vsub.f32 %v3349_v22, %v3357_v28  ;;  %v3392_v55 = vsub.f32 %v82_v38, %v3379_v42  ;;  %v3414_v8 = vsub.f32 %v85_v57, %v3404_v3 }
  0x1a   :  { %896 = vmatpush.msra.mxu1 %v3203_v24  ;;  %v3329_v11 = vsub.f32 %v73_v1, %v3318_v6  ;;  %v3333_v14 = vand.u32 4294901760, %v152_v10  ;;  %v176_v54 = vsub.f32 %v3369_v37, %v3377_v40  ;;  %990 = vmatpush.msra.mxu2 %v734_v35  ;;  %v746_v61 = vand.u32 4294901760, %v745_v50  ;;  %v46_v35 = vld [vmem:[%s4362_s1 + $0x58] sm:$0xff] }
  0x1b   :  { %242 = vmatmul.f32.gmra.mxu1 %v3189_v16  ;;  %743 = vmatpush.msrb.mxu3 %v742_v13  ;;  %v3373_v39 = vand.u32 4294901760, %v168_v33  ;;  %v3402_v1 = vand.u32 4294901760, %v3392_v55  ;;  %v88_v9 = vsel %vm53_vm0, %v46_v35, 0  ;;  %v3424_v12 = vand.u32 4294901760, %v3414_v8 }
  0x1c   :  { %898 = vmatpush.msra.mxu1 %v3307_v2  ;;  %v3337_v17 = vand.u32 4294901760, %v3329_v11  ;;  %820 = vmatpush.msra.mxu0 %v745_v50  ;;  %v747_v62 = vsub.f32 %v745_v50, %v746_v61  ;;  %v3398_v0 = vand.u32 4294901760, %v176_v54  ;;  %v3426_v13 = vand.u32 4294901760, %v88_v9 }
  0x1d   :  { %403 = vmatmul.f32.gmra.mxu3 %v3245_v45  ;;  %320 = vmatmul.f32.gmra.mxu2 %v3236_v41 }
  0x1e   :  { %v160_v21 = vsub.f32 %v3329_v11, %v3337_v17  ;;  %900 = vmatpush.msra.mxu1 %v620_v47  ;;  %994 = vmatpush.msra.mxu2 %v740_v7  ;;  %v748_v30 = vand.u32 4294901760, %v747_v62  ;;  %v184_v7 = vsub.f32 %v3392_v55, %v3402_v1 }
  0x20   :  { %v3353_v27 = vand.u32 4294901760, %v160_v21  ;;  %998 = vmatpush.msra.mxu2 %v746_v61  ;;  %749 = vmatpush.msrb.mxu3 %v748_v30  ;;  %v3420_v10 = vand.u32 4294901760, %v184_v7 }
  0x21   :  { %130 = vmatmul.f32.gmra.mxu0 %v3265_v51 }
  0x22   :  { %1062 = vmatpush.msra.mxu3 %v3203_v24  ;;  %v192_v24 = vsub.f32 %v3414_v8, %v3424_v12 }
  0x23   :  { %246 = vmatmul.f32.gmra.mxu1 %v3210_v29 }
  0x24   :  { %1064 = vmatpush.msra.mxu3 %v3307_v2  ;;  %v3433_v2 = vsub.f32 %v88_v9, %v3426_v13  ;;  %v3436_v20 = vand.u32 4294901760, %v192_v24 }
  0x25   :  { %409 = vmatmul.f32.gmra.mxu3 %v3269_v52  ;;  %325 = vmatmul.f32.gmra.mxu2 %v3259_v49 }
  0x26   :  { %1066 = vmatpush.msra.mxu3 %v620_v47  ;;  %v3440_v21 = vand.u32 4294901760, %v3433_v2 }
  0x28   :  { %v200_v25 = vsub.f32 %v3433_v2, %v3440_v21 }
  0x29   :  { %138 = vmatmul.f32.gmra.mxu0 %v3285_v58 }
  0x2a   :  { %v3447_v32 = vand.u32 4294901760, %v200_v25 }
  0x2b   :  { %250 = vmatmul.f32.gmra.mxu1 %v3247_v46 }
  0x2d   :  { %415 = vmatmul.f32.gmra.mxu3 %v3289_v59  ;;  %330 = vmatmul.f32.gmra.mxu2 %v3281_v56 }
  0x31   :  { %146 = vmatmul.f32.gmra.mxu0 %v3312_v4 }
  0x33   :  { %254 = vmatmul.f32.gmra.mxu1 %v3271_v53 }
  0x35   :  { %421 = vmatmul.f32.gmra.mxu3 %v3316_v5  ;;  %335 = vmatmul.f32.gmra.mxu2 %v3301_v63 }
  0x39   :  { %154 = vmatmul.f32.gmra.mxu0 %v3333_v14 }
  0x3b   :  { %258 = vmatmul.f32.gmra.mxu1 %v3291_v60 }
  0x3d   :  { %427 = vmatmul.f32.gmra.mxu3 %v3337_v17  ;;  %340 = vmatmul.f32.gmra.mxu2 %v3329_v11 }
  0x41   :  { %162 = vmatmul.f32.gmra.mxu0 %v3353_v27 }
  0x43   :  { %262 = vmatmul.f32.gmra.mxu1 %v3318_v6 }
  0x45   :  { %433 = vmatmul.f32.gmra.mxu3 %v3357_v28  ;;  %345 = vmatmul.f32.gmra.mxu2 %v3349_v22 }
  0x49   :  { %170 = vmatmul.f32.gmra.mxu0 %v3373_v39 }
  0x4b   :  { %266 = vmatmul.f32.gmra.mxu1 %v3339_v18 }
  0x4d   :  { %439 = vmatmul.f32.gmra.mxu3 %v3377_v40  ;;  %350 = vmatmul.f32.gmra.mxu2 %v3369_v37 }
  0x51   :  { %178 = vmatmul.f32.gmra.mxu0 %v3398_v0 }
  0x53   :  { %270 = vmatmul.f32.gmra.mxu1 %v3359_v31 }
  0x55   :  { %445 = vmatmul.f32.gmra.mxu3 %v3402_v1  ;;  %355 = vmatmul.f32.gmra.mxu2 %v3392_v55 }
  0x59   :  { %186 = vmatmul.f32.gmra.mxu0 %v3420_v10 }
  0x5b   :  { %274 = vmatmul.f32.gmra.mxu1 %v3379_v42 }
  0x5d   :  { %451 = vmatmul.f32.gmra.mxu3 %v3424_v12  ;;  %360 = vmatmul.f32.gmra.mxu2 %v3414_v8 }
  0x61   :  { %194 = vmatmul.f32.gmra.mxu0 %v3436_v20 }
  0x63   :  { %278 = vmatmul.f32.gmra.mxu1 %v3404_v3 }
  0x65   :  { %457 = vmatmul.f32.gmra.mxu3 %v3440_v21  ;;  %365 = vmatmul.f32.gmra.mxu2 %v3433_v2 }
  0x69   :  { %202 = vmatmul.f32.gmra.mxu0 %v3447_v32 }
  0x6b   :  { %282 = vmatmul.f32.gmra.mxu1 %v3426_v13 }
  0x6d   :  { %751 = vmatmul.f32.vlgmr.msrb.gmra.mxu3 %v3187_v15  ;;  %627 = vmatmul.f32.vlgmr.msrb.gmra.mxu2 %v3223_v36 }
  0x71   :  { %487 = vmatmul.f32.vlgmr.msrb.gmra.mxu0 %v3187_v15 }
  0x73   :  { %555 = vmatmul.f32.vlgmr.msrb.gmra.mxu1 %v3187_v15 }
  0x75   :  { %755 = vmatmul.f32.gmra.mxu3 %v3189_v16  ;;  %635 = vmatmul.f32.gmra.mxu2 %v3241_v44 }
  0x79   :  { %491 = vmatmul.f32.gmra.mxu0 %v3189_v16 }
  0x7b   :  { %559 = vmatmul.f32.gmra.mxu1 %v3189_v16 }
  0x7d   :  { %759 = vmatmul.f32.gmra.mxu3 %v3210_v29  ;;  %643 = vmatmul.f32.gmra.mxu2 %v3265_v51 }
  0x81   :  { %495 = vmatmul.f32.gmra.mxu0 %v3210_v29 }
  0x83   :  { %563 = vmatmul.f32.gmra.mxu1 %v3210_v29 }
  0x85   :  { %763 = vmatmul.f32.gmra.mxu3 %v3247_v46  ;;  %651 = vmatmul.f32.gmra.mxu2 %v3285_v58 }
  0x89   :  { %499 = vmatmul.f32.gmra.mxu0 %v3247_v46 }
  0x8b   :  { %567 = vmatmul.f32.gmra.mxu1 %v3247_v46 }
  0x8d   :  { %767 = vmatmul.f32.gmra.mxu3 %v3271_v53  ;;  %659 = vmatmul.f32.gmra.mxu2 %v3312_v4 }
  0x8e   :  { %v115_v36 = vpop.f32.mrf.mxu0 }
  0x90   :  { %v392_v44 = vpop.f32.mrf.mxu3  ;;  %v239_v51 = vpop.f32.mrf.mxu1 }
  0x91   :  { %503 = vmatmul.f32.gmra.mxu0 %v3271_v53  ;;  %v311_v33 = vpop.f32.mrf.mxu2  ;;  %v240_v38 = vadd.f32 %v239_v51, %v115_v36 }
  0x93   :  { %v312_v43 = vadd.f32 %v311_v33, %v240_v38  ;;  %571 = vmatmul.f32.gmra.mxu1 %v3271_v53  ;;  %v3101_v33 = vmov 0   ;;  %v1257_v38 = vld [vmem:[%s4364_s3 + $0x8] sm:$0xff] }
  0x94   :  { %3025 = vset.pattern.permute.xlu1 %v3101_v33  ;;  %3024 = vset.pattern.permute.xlu0 %v3101_v33 }
  0x95   :  { %771 = vmatmul.f32.gmra.mxu3 %v3291_v60  ;;  %v3474_v58 = vadd.f32 %v392_v44, %v312_v43  ;;  %667 = vmatmul.f32.gmra.mxu2 %v3333_v14 }
  0x96   :  { %v123_v47 = vpop.f32.mrf.mxu0  ;;  %1267 = vperm.xlu1 %3025, %v1257_v38   ;;  %3026 = vset.pattern.permute.xlu2 %v3101_v33 }
  0x98   :  { %v398_v48 = vpop.f32.mrf.mxu3  ;;  %v243_v4 = vpop.f32.mrf.mxu1 }
  0x99   :  { %507 = vmatmul.f32.gmra.mxu0 %v3291_v60  ;;  %v316_v50 = vpop.f32.mrf.mxu2  ;;  %v244_v54 = vadd.f32 %v243_v4, %v123_v47 }
  0x9b   :  { %v317_v57 = vadd.f32 %v316_v50, %v244_v54  ;;  %575 = vmatmul.f32.gmra.mxu1 %v3291_v60 }
  0x9d   :  { %775 = vmatmul.f32.gmra.mxu3 %v3318_v6  ;;  %v3480_v61 = vadd.f32 %v398_v48, %v317_v57  ;;  %675 = vmatmul.f32.gmra.mxu2 %v3353_v27  ;;  %v1259_v57 = vld [vmem:[%s4364_s3 + $0x18] sm:$0xff] }
  0x9e   :  { %v131_v62 = vpop.f32.mrf.mxu0  ;;  %1277 = vperm.xlu0 %3024, %v1259_v57  }
  0xa0   :  { %v404_v30 = vpop.f32.mrf.mxu3  ;;  %v247_v14 = vpop.f32.mrf.mxu1 }
  0xa1   :  { %511 = vmatmul.f32.gmra.mxu0 %v3318_v6  ;;  %v321_v35 = vpop.f32.mrf.mxu2  ;;  %v248_v7 = vadd.f32 %v247_v14, %v131_v62  ;;  %v1256_v62 = vld [vmem:[%s4364_s3] sm:$0xff] }
  0xa2   :  { %1262 = vperm.xlu1 %3025, %v1256_v62  }
  0xa3   :  { %v322_v9 = vadd.f32 %v321_v35, %v248_v7  ;;  %579 = vmatmul.f32.gmra.mxu1 %v3318_v6 }
  0xa5   :  { %779 = vmatmul.f32.gmra.mxu3 %v3339_v18  ;;  %v3486_v24 = vadd.f32 %v404_v30, %v322_v9  ;;  %683 = vmatmul.f32.gmra.mxu2 %v3373_v39 }
  0xa6   :  { %v139_v25 = vpop.f32.mrf.mxu0 }
  0xa8   :  { %v410_v36 = vpop.f32.mrf.mxu3  ;;  %v251_v27 = vpop.f32.mrf.mxu1 }
  0xa9   :  { %515 = vmatmul.f32.gmra.mxu0 %v3339_v18  ;;  %v326_v44 = vpop.f32.mrf.mxu2  ;;  %v252_v51 = vadd.f32 %v251_v27, %v139_v25  ;;  %v1258_v27 = vld [vmem:[%s4364_s3 + $0x10] sm:$0xff] }
  0xaa   :  { %1272 = vperm.xlu0 %3024, %v1258_v27  }
  0xab   :  { %v327_v43 = vadd.f32 %v326_v44, %v252_v51  ;;  %583 = vmatmul.f32.gmra.mxu1 %v3339_v18  ;;  %v2464_v44 = vld [vmem:[%s4369_s8 + $0x18] sm:$0xff] }
  0xac   :  { %2482 = vperm.xlu1 %3025, %v2464_v44  }
  0xad   :  { %783 = vmatmul.f32.gmra.mxu3 %v3359_v31  ;;  %v3495_v39 = vadd.f32 %v410_v36, %v327_v43  ;;  %691 = vmatmul.f32.gmra.mxu2 %v3398_v0  ;;  %v1864_v36 = vld [vmem:[%s4366_s5 + $0x18] sm:$0xff] }
  0xae   :  { %v147_v47 = vpop.f32.mrf.mxu0  ;;  %1882 = vperm.xlu2 %3026, %v1864_v36  }
  0xb0   :  { %v416_v48 = vpop.f32.mrf.mxu3  ;;  %v255_v4 = vpop.f32.mrf.mxu1 }
  0xb1   :  { %519 = vmatmul.f32.gmra.mxu0 %v3359_v31  ;;  %v331_v50 = vpop.f32.mrf.mxu2  ;;  %v256_v54 = vadd.f32 %v255_v4, %v147_v47  ;;  %v1863_v4 = vld [vmem:[%s4366_s5 + $0x10] sm:$0xff] }
  0xb3   :  { %v332_v30 = vadd.f32 %v331_v50, %v256_v54  ;;  %587 = vmatmul.f32.gmra.mxu1 %v3359_v31  ;;  %v1862_v50 = vld [vmem:[%s4366_s5 + $0x8] sm:$0xff] }
  0xb4   :  { %v2462_v54 = vld [vmem:[%s4369_s8 + $0x8] sm:$0xff]  ;;  %1872 = vperm.xlu0 %3024, %v1862_v50  }
  0xb5   :  { %787 = vmatmul.f32.gmra.mxu3 %v3379_v42  ;;  %v3507_v0 = vadd.f32 %v416_v48, %v332_v30  ;;  %699 = vmatmul.f32.gmra.mxu2 %v3420_v10 }
  0xb6   :  { %v155_v14 = vpop.f32.mrf.mxu0  ;;  %1877 = vperm.xlu2 %3026, %v1863_v4   ;;  %2472 = vperm.xlu1 %3025, %v2462_v54  }
  0xb8   :  { %v422_v35 = vpop.f32.mrf.mxu3  ;;  %v259_v7 = vpop.f32.mrf.mxu1 }
  0xb9   :  { %523 = vmatmul.f32.gmra.mxu0 %v3379_v42  ;;  %v336_v9 = vpop.f32.mrf.mxu2  ;;  %v260_v25 = vadd.f32 %v259_v7, %v155_v14 }
  0xbb   :  { %v337_v10 = vadd.f32 %v336_v9, %v260_v25  ;;  %591 = vmatmul.f32.gmra.mxu1 %v3379_v42  ;;  %v1861_v9 = vld [vmem:[%s4366_s5] sm:$0xff]  ;;  %v2463_v25 = vld [vmem:[%s4369_s8 + $0x10] sm:$0xff] }
  0xbc   :  { %2477 = vperm.xlu0 %3024, %v2463_v25  }
  0xbd   :  { %791 = vmatmul.f32.gmra.mxu3 %v3404_v3  ;;  %v3522_v51 = vadd.f32 %v422_v35, %v337_v10  ;;  %707 = vmatmul.f32.gmra.mxu2 %v3436_v20 }
  0xbe   :  { %v163_v33 = vpop.f32.mrf.mxu0  ;;  %1867 = vperm.xlu2 %3026, %v1861_v9  }
  0xc0   :  { %v428_v38 = vpop.f32.mrf.mxu3  ;;  %v263_v43 = vpop.f32.mrf.mxu1 }
  0xc1   :  { %527 = vmatmul.f32.gmra.mxu0 %v3404_v3  ;;  %v341_v47 = vpop.f32.mrf.mxu2  ;;  %v264_v48 = vadd.f32 %v263_v43, %v163_v33  ;;  %v2461_v43 = vld [vmem:[%s4369_s8] sm:$0xff] }
  0xc3   :  { %v342_v20 = vadd.f32 %v341_v47, %v264_v48  ;;  %595 = vmatmul.f32.gmra.mxu1 %v3404_v3 }
  0xc5   :  { %795 = vmatmul.f32.gmra.mxu3 %v3426_v13  ;;  %v3537_v57 = vadd.f32 %v428_v38, %v342_v20  ;;  %715 = vmatmul.f32.gmra.mxu2 %v3447_v32 }
  0xc6   :  { %v171_v62 = vpop.f32.mrf.mxu0  ;;  %2467 = vperm.xlu2 %3026, %v2461_v43  }
  0xc8   :  { %v434_v30 = vpop.f32.mrf.mxu3  ;;  %v267_v14 = vpop.f32.mrf.mxu1 }
  0xc9   :  { %531 = vmatmul.f32.gmra.mxu0 %v3426_v13  ;;  %v346_v35 = vpop.f32.mrf.mxu2  ;;  %v268_v7 = vadd.f32 %v267_v14, %v171_v62 }
  0xcb   :  { %v347_v36 = vadd.f32 %v346_v35, %v268_v7  ;;  %599 = vmatmul.f32.gmra.mxu1 %v3426_v13 }
  0xcd   :  { %1068 = vmatmul.f32.vlgmr.msra.gmra.mxu3 %v3187_v15  ;;  %v3549_v32 = vadd.f32 %v434_v30, %v347_v36  ;;  %1000 = vmatmul.f32.vlgmr.msra.gmra.mxu2 %v3187_v15 }
  0xce   :  { %v179_v27 = vpop.f32.mrf.mxu0 }
  0xd0   :  { %v440_v44 = vpop.f32.mrf.mxu3  ;;  %v271_v10 = vpop.f32.mrf.mxu1 }
  0xd1   :  { %823 = vmatmul.f32.vlgmr.msra.gmra.mxu0 %v3194_v19  ;;  %v351_v33 = vpop.f32.mrf.mxu2  ;;  %v272_v38 = vadd.f32 %v271_v10, %v179_v27 }
  0xd3   :  { %v352_v47 = vadd.f32 %v351_v33, %v272_v38  ;;  %904 = vmatmul.f32.vlgmr.msra.gmra.mxu1 %v3207_v26 }
  0xd5   :  { %1072 = vmatmul.f32.gmra.mxu3 %v3189_v16  ;;  %v3558_v48 = vadd.f32 %v440_v44, %v352_v47  ;;  %1004 = vmatmul.f32.gmra.mxu2 %v3189_v16 }
  0xd6   :  { %v187_v4 = vpop.f32.mrf.mxu0 }
  0xd8   :  { %v446_v15 = vpop.f32.mrf.mxu3  ;;  %v275_v19 = vpop.f32.mrf.mxu1 }
  0xd9   :  { %828 = vmatmul.f32.gmra.mxu0 %v3201_v23  ;;  %v356_v50 = vpop.f32.mrf.mxu2  ;;  %v276_v54 = vadd.f32 %v275_v19, %v187_v4 }
  0xdb   :  { %v357_v20 = vadd.f32 %v356_v50, %v276_v54  ;;  %910 = vmatmul.f32.gmra.mxu1 %v3219_v34 }
  0xdd   :  { %1076 = vmatmul.f32.gmra.mxu3 %v3210_v29  ;;  %v3564_v62 = vadd.f32 %v446_v15, %v357_v20  ;;  %1008 = vmatmul.f32.gmra.mxu2 %v3210_v29 }
  0xde   :  { %v195_v26 = vpop.f32.mrf.mxu0 }
  0xe0   :  { %v452_v30 = vpop.f32.mrf.mxu3  ;;  %v279_v16 = vpop.f32.mrf.mxu1 }
  0xe1   :  { %833 = vmatmul.f32.gmra.mxu0 %v3236_v41  ;;  %v361_v14 = vpop.f32.mrf.mxu2  ;;  %v280_v35 = vadd.f32 %v279_v16, %v195_v26 }
  0xe3   :  { %v362_v23 = vadd.f32 %v361_v14, %v280_v35  ;;  %916 = vmatmul.f32.gmra.mxu1 %v3245_v45 }
  0xe5   :  { %1080 = vmatmul.f32.gmra.mxu3 %v3247_v46  ;;  %v3570_v7 = vadd.f32 %v452_v30, %v362_v23  ;;  %1012 = vmatmul.f32.gmra.mxu2 %v3247_v46 }
  0xe6   :  { %v203_v34 = vpop.f32.mrf.mxu0 }
  0xe8   :  { %v458_v9 = vpop.f32.mrf.mxu3  ;;  %v283_v29 = vpop.f32.mrf.mxu1 }
  0xe9   :  { %838 = vmatmul.f32.gmra.mxu0 %v3259_v49  ;;  %v366_v25 = vpop.f32.mrf.mxu2  ;;  %v284_v36 = vadd.f32 %v283_v29, %v203_v34 }
  0xeb   :  { %v367_v41 = vadd.f32 %v366_v25, %v284_v36  ;;  %922 = vmatmul.f32.gmra.mxu1 %v3269_v52 }
  0xed   :  { %1084 = vmatmul.f32.gmra.mxu3 %v3271_v53  ;;  %v3576_v27 = vadd.f32 %v458_v9, %v367_v41  ;;  %1016 = vmatmul.f32.gmra.mxu2 %v3271_v53 }
  0xee   :  { %v488_v45 = vpop.f32.mrf.mxu0 }
  0xf0   :  { %v3579_v44 = vpop.f32.mrf.mxu3  ;;  %v556_v46 = vpop.f32.mrf.mxu1 }
  0xf1   :  { %843 = vmatmul.f32.gmra.mxu0 %v3281_v56  ;;  %v3582_v10 = vpop.f32.mrf.mxu2 }
  0xf3   :  { %928 = vmatmul.f32.gmra.mxu1 %v3289_v59 }
  0xf5   :  { %1088 = vmatmul.f32.gmra.mxu3 %v3291_v60  ;;  %1020 = vmatmul.f32.gmra.mxu2 %v3291_v60 }
  0xf6   :  { %v492_v49 = vpop.f32.mrf.mxu0 }
  0xf8   :  { %v3587_v52 = vpop.f32.mrf.mxu3  ;;  %v560_v33 = vpop.f32.mrf.mxu1 }
  0xf9   :  { %848 = vmatmul.f32.gmra.mxu0 %v3301_v63  ;;  %v3590_v53 = vpop.f32.mrf.mxu2 }
  0xfb   :  { %934 = vmatmul.f32.gmra.mxu1 %v3316_v5 }
  0xfd   :  { %1092 = vmatmul.f32.gmra.mxu3 %v3318_v6  ;;  %1024 = vmatmul.f32.gmra.mxu2 %v3318_v6 }
  0xfe   :  { %v496_v56 = vpop.f32.mrf.mxu0 }
 0x100   :  { %v3595_v59 = vpop.f32.mrf.mxu3  ;;  %v564_v38 = vpop.f32.mrf.mxu1 }
 0x101   :  { %853 = vmatmul.f32.gmra.mxu0 %v3329_v11  ;;  %v3598_v60 = vpop.f32.mrf.mxu2  ;;  %v489_v11 = vadd.f32 %v488_v45, %v3474_v58  ;;  %v493_v58 = vadd.f32 %v492_v49, %v3480_v61  ;;  %v497_v61 = vadd.f32 %v496_v56, %v3486_v24 }
 0x103   :  { %940 = vmatmul.f32.gmra.mxu1 %v3337_v17  ;;  %v557_v17 = vadd.f32 %v556_v46, %v489_v11 }
 0x105   :  { %1096 = vmatmul.f32.gmra.mxu3 %v3339_v18  ;;  %1028 = vmatmul.f32.gmra.mxu2 %v3339_v18  ;;  %v1116_v50 = vmul.f32 %v557_v17, %v557_v17 }
 0x106   :  { %v500_v63 = vpop.f32.mrf.mxu0 }
 0x107   :  { %v501_v24 = vadd.f32 %v500_v63, %v3495_v39 }
 0x108   :  { %v3603_v5 = vpop.f32.mrf.mxu3  ;;  %v568_v43 = vpop.f32.mrf.mxu1 }
 0x109   :  { %858 = vmatmul.f32.gmra.mxu0 %v3349_v22  ;;  %v3606_v6 = vpop.f32.mrf.mxu2 }
 0x10b   :  { %946 = vmatmul.f32.gmra.mxu1 %v3357_v28 }
 0x10d   :  { %1100 = vmatmul.f32.gmra.mxu3 %v3359_v31  ;;  %1032 = vmatmul.f32.gmra.mxu2 %v3359_v31 }
 0x10e   :  { %v504_v47 = vpop.f32.mrf.mxu0 }
 0x10f   :  { %v505_v4 = vadd.f32 %v504_v47, %v3507_v0  ;;  %v561_v0 = vadd.f32 %v560_v33, %v493_v58 }
 0x110   :  { %v3613_v18 = vpop.f32.mrf.mxu3  ;;  %v572_v22 = vpop.f32.mrf.mxu1 }
 0x111   :  { %863 = vmatmul.f32.gmra.mxu0 %v3369_v37  ;;  %v3616_v15 = vpop.f32.mrf.mxu2  ;;  %v573_v19 = vadd.f32 %v572_v22, %v505_v4 }
 0x113   :  { %v1124_v28 = vmul.f32 %v573_v19, %v573_v19  ;;  %952 = vmatmul.f32.gmra.mxu1 %v3377_v40  ;;  %v1118_v40 = vmul.f32 %v561_v0, %v561_v0 }
 0x115   :  { %1104 = vmatmul.f32.gmra.mxu3 %v3379_v42  ;;  %v1140_v31 = vadd.f32 %v1124_v28, %v1116_v50  ;;  %1036 = vmatmul.f32.gmra.mxu2 %v3379_v42 }
 0x116   :  { %v508_v54 = vpop.f32.mrf.mxu0 }
 0x117   :  { %v509_v20 = vadd.f32 %v508_v54, %v3522_v51  ;;  %v565_v51 = vadd.f32 %v564_v38, %v497_v61 }
 0x118   :  { %v3623_v37 = vpop.f32.mrf.mxu3  ;;  %v576_v26 = vpop.f32.mrf.mxu1 }
 0x119   :  { %868 = vmatmul.f32.gmra.mxu0 %v3392_v55  ;;  %v3626_v30 = vpop.f32.mrf.mxu2  ;;  %v577_v16 = vadd.f32 %v576_v26, %v509_v20 }
 0x11b   :  { %v1126_v14 = vmul.f32 %v577_v16, %v577_v16  ;;  %958 = vmatmul.f32.gmra.mxu1 %v3402_v1  ;;  %v1120_v1 = vmul.f32 %v565_v51, %v565_v51 }
 0x11d   :  { %1108 = vmatmul.f32.gmra.mxu3 %v3404_v3  ;;  %v1142_v42 = vadd.f32 %v1126_v14, %v1118_v40  ;;  %1040 = vmatmul.f32.gmra.mxu2 %v3404_v3 }
 0x11e   :  { %v512_v35 = vpop.f32.mrf.mxu0 }
 0x11f   :  { %v513_v23 = vadd.f32 %v512_v35, %v3537_v57  ;;  %v569_v57 = vadd.f32 %v568_v43, %v501_v24 }
 0x120   :  { %v3633_v55 = vpop.f32.mrf.mxu3  ;;  %v580_v34 = vpop.f32.mrf.mxu1 }
 0x121   :  { %873 = vmatmul.f32.gmra.mxu0 %v3414_v8  ;;  %v3636_v9 = vpop.f32.mrf.mxu2  ;;  %v581_v29 = vadd.f32 %v580_v34, %v513_v23 }
 0x123   :  { %v1128_v25 = vmul.f32 %v581_v29, %v581_v29  ;;  %964 = vmatmul.f32.gmra.mxu1 %v3424_v12  ;;  %v1122_v12 = vmul.f32 %v569_v57, %v569_v57 }
 0x125   :  { %1112 = vmatmul.f32.gmra.mxu3 %v3426_v13  ;;  %v1144_v3 = vadd.f32 %v1128_v25, %v1120_v1  ;;  %1044 = vmatmul.f32.gmra.mxu2 %v3426_v13 }
 0x126   :  { %v516_v36 = vpop.f32.mrf.mxu0 }
 0x127   :  { %v517_v41 = vadd.f32 %v516_v36, %v3549_v32 }
 0x128   :  { %v3643_v8 = vpop.f32.mrf.mxu3  ;;  %v584_v45 = vpop.f32.mrf.mxu1 }
 0x129   :  { %878 = vmatmul.f32.gmra.mxu0 %v3433_v2  ;;  %v3646_v46 = vpop.f32.mrf.mxu2  ;;  %v585_v49 = vadd.f32 %v584_v45, %v517_v41 }
 0x12b   :  { %v1130_v33 = vmul.f32 %v585_v49, %v585_v49  ;;  %970 = vmatmul.f32.gmra.mxu1 %v3440_v21 }
 0x12d   :  { %v1146_v39 = vadd.f32 %v1130_v33, %v1122_v12 }
 0x12e   :  { %v520_v56 = vpop.f32.mrf.mxu0 }
 0x12f   :  { %v521_v38 = vadd.f32 %v520_v56, %v3558_v48 }
 0x130   :  { %v3650_v13 = vpop.f32.mrf.mxu3  ;;  %v588_v63 = vpop.f32.mrf.mxu1 }
 0x131   :  { %v3652_v32 = vpop.f32.mrf.mxu2  ;;  %v589_v43 = vadd.f32 %v588_v63, %v521_v38 }
 0x133   :  { %v1132_v11 = vmul.f32 %v589_v43, %v589_v43 }
 0x135   :  { %v3654_v2 = vadd.f32 %v1140_v31, %v1132_v11 }
 0x136   :  { %v524_v47 = vpop.f32.mrf.mxu0 }
 0x137   :  { %v525_v17 = vadd.f32 %v524_v47, %v3564_v62  ;;  %3027 = vrsqrt.f32 %v3654_v2  ;;  %vm1163_vm5 = vcmp.eq.f32.partialorder %v3654_v2, inf  ;;  %vm1165_vm7 = vcmp.eq.f32.partialorder %v3654_v2, 0.0 }
 0x138   :  { %v3657_v4 = vpop.f32.mrf.mxu3  ;;  %v592_v22 = vpop.f32.mrf.mxu1 }
 0x139   :  { %v3659_v21 = vpop.f32.mrf.mxu2  ;;  %v593_v19 = vadd.f32 %v592_v22, %v525_v17  ;;  %v1252_v22 = vld [vmem:[%s4363_s2] sm:$0xff] }
 0x13b   :  { %v1134_v50 = vmul.f32 %v593_v19, %v593_v19 }
 0x13d   :  { %v3662_v48 = vadd.f32 %v1142_v42, %v1134_v50  ;;  %v3028_v0 = vpop.eup %3027 }
 0x13e   :  { %v528_v28 = vpop.f32.mrf.mxu0  ;;  %v1157_v16 = vmul.f32 %v3028_v0, %v3654_v2 }
 0x13f   :  { %v529_v58 = vadd.f32 %v528_v28, %v3570_v7  ;;  %3029 = vrsqrt.f32 %v3662_v48  ;;  %vm1187_vm2 = vcmp.eq.f32.partialorder %v3662_v48, inf  ;;  %vm1189_vm6 = vcmp.eq.f32.partialorder %v3662_v48, 0.0 }
 0x140   :  { %v3665_v54 = vpop.f32.mrf.mxu3  ;;  %v596_v31 = vpop.f32.mrf.mxu1  ;;  %v1158_v34 = vmul.f32 %v3028_v0, %v1157_v16 }
 0x141   :  { %v3668_v62 = vpop.f32.mrf.mxu2  ;;  %v597_v20 = vadd.f32 %v596_v31, %v529_v58 }
 0x142   :  { %v1159_v36 = vmul.f32 0.5, %v1158_v34  ;;  %v1190_v34 = vand.u32 2147483648, %v3662_v48 }
 0x143   :  { %v1136_v26 = vmul.f32 %v597_v20, %v597_v20 }
 0x144   :  { %v1160_v12 = vsub.f32 1.5, %v1159_v36  ;;  %v1166_v36 = vand.u32 2147483648, %v3654_v2 }
 0x145   :  { %v3030_v40 = vpop.eup %3029  ;;  %v1152_v14 = vadd.f32 %v1144_v3, %v1136_v26 }
 0x146   :  { %v532_v61 = vpop.f32.mrf.mxu0  ;;  %v1181_v42 = vmul.f32 %v3030_v40, %v3662_v48  ;;  %v1161_v11 = vmul.f32 %v3028_v0, %v1160_v12  ;;  %v1253_v12 = vld [vmem:[%s4363_s2 + $0x8] sm:$0xff] }
 0x147   :  { %v533_v35 = vadd.f32 %v532_v61, %v3576_v27  ;;  %3031 = vrsqrt.f32 %v1152_v14  ;;  %vm1211_vm3 = vcmp.eq.f32.partialorder %v1152_v14, inf  ;;  %v1214_v61 = vand.u32 2147483648, %v1152_v14 }
 0x148   :  { %v3673_v7 = vpop.f32.mrf.mxu3  ;;  %v600_v51 = vpop.f32.mrf.mxu1  ;;  %v1182_v29 = vmul.f32 %v3030_v40, %v1181_v42  ;;  %v1162_v31 = vmul.f32 %v1161_v11, %v3654_v2  ;;  %vm1213_vm4 = vcmp.eq.f32.partialorder %v1152_v14, 0.0 }
 0x149   :  { %4384 = vst [vmem:[#allocation6_spill] sm:$0xff] %v3673_v7  ;;  %v3675_v23 = vpop.f32.mrf.mxu2  ;;  %v601_v1 = vadd.f32 %v600_v51, %v533_v35 }
 0x14a   :  { %4385 = vst [vmem:[#allocation7_spill] sm:$0xff] %v3675_v23  ;;  %v1183_v25 = vmul.f32 0.5, %v1182_v29 }
 0x14b   :  { %v1138_v24 = vmul.f32 %v601_v1, %v601_v1 }
 0x14c   :  { %v1184_v45 = vsub.f32 1.5, %v1183_v25  ;;  %v1164_v25 = vsel %vm1163_vm5, %v3654_v2, %v1162_v31 }
 0x14d   :  { %v3032_v57 = vpop.eup %3031  ;;  %v3677_v41 = vadd.f32 %v1146_v39, %v1138_v24 }
 0x14e   :  { %v3679_v3 = vpop.f32.mrf.mxu0  ;;  %v1205_v49 = vmul.f32 %v3032_v57, %v1152_v14  ;;  %v1185_v63 = vmul.f32 %v3030_v40, %v1184_v45  ;;  %v1282_v40 = vsel %vm1280_vm1, %v1252_v22, 0  ;;  %v1285_v22 = vsel %vm1280_vm1, %v1253_v12, 0 }
 0x14f   :  { %3033 = vrsqrt.f32 %v3677_v41  ;;  %v3709_v1 = vand.u32 4294901760, %v1282_v40  ;;  %vm1235_vm8 = vcmp.eq.f32.partialorder %v3677_v41, inf  ;;  %vm1237_vm9 = vcmp.eq.f32.partialorder %v3677_v41, 0.0 }
 0x150   :  { %v3682_v27 = vpop.f32.mrf.mxu3  ;;  %v3684_v33 = vpop.f32.mrf.mxu1  ;;  %v1206_v38 = vmul.f32 %v3032_v57, %v1205_v49  ;;  %v1186_v50 = vmul.f32 %v1185_v63, %v3662_v48 }
 0x151   :  { %v3686_v56 = vpop.f32.mrf.mxu2 }
 0x152   :  { %v1207_v43 = vmul.f32 0.5, %v1206_v38  ;;  %v1188_v35 = vsel %vm1187_vm2, %v3662_v48, %v1186_v50  ;;  %v3725_v38 = vsel %vm1165_vm7, %v1166_v36, %v1164_v25  ;;  %v3730_v48 = vsub.f32 %v1282_v40, %v3709_v1 }
 0x153   :  { %4388 = vst [vmem:[#allocation10_spill] sm:$0xff] %v3725_v38 }
 0x154   :  { %v1208_v47 = vsub.f32 1.5, %v1207_v43  ;;  %4389 = vst [vmem:[#allocation11_spill] sm:$0xff] %v3730_v48 }
 0x155   :  { %v3034_v39 = vpop.eup %3033 }
 0x156   :  { %v3688_v17 = vpop.f32.mrf.mxu0  ;;  %v1229_v19 = vmul.f32 %v3034_v39, %v3677_v41  ;;  %v1209_v28 = vmul.f32 %v3032_v57, %v1208_v47  ;;  %v3714_v57 = vsel %vm1189_vm6, %v1190_v34, %v1188_v35  ;;  %v1254_v34 = vld [vmem:[%s4363_s2 + $0x10] sm:$0xff] }
 0x157   :  { %4387 = vst [vmem:[#allocation9_spill] sm:$0xff] %v3714_v57  ;;  %v3734_v11 = vand.u32 4294901760, %v3714_v57 }
 0x158   :  { %v3695_v58 = vpop.f32.mrf.mxu3  ;;  %v1230_v20 = vmul.f32 %v3034_v39, %v1229_v19  ;;  %v3698_v0 = vpop.f32.mrf.mxu1  ;;  %v1210_v16 = vmul.f32 %v1209_v28, %v1152_v14  ;;  %v3744_v19 = vand.u32 4294901760, %v3725_v38 }
 0x159   :  { %v3700_v26 = vpop.f32.mrf.mxu2  ;;  %v1371_v40 = vsub.f32 %v3714_v57, %v3734_v11 }
 0x15a   :  { %v1231_v42 = vmul.f32 0.5, %v1230_v20  ;;  %v1212_v51 = vsel %vm1211_vm3, %v1152_v14, %v1210_v16  ;;  %v3753_v20 = vand.u32 4294901760, %v3730_v48  ;;  %v1377_v35 = vsub.f32 %v3725_v38, %v3744_v19 }
 0x15b   :  { %v3707_v29 = vsel %vm1213_vm4, %v1214_v61, %v1212_v51  ;;  %v3760_v61 = vand.u32 4294901760, %v1285_v22  ;;  %vm2998_vm3 = vcmask 1040384  }
 0x15c   :  { %4386 = vst [vmem:[#allocation8_spill] sm:$0xff] %v3707_v29  ;;  %v1232_v24 = vsub.f32 1.5, %v1231_v42  ;;  %v3720_v49 = vand.u32 4294901760, %v3707_v29 }
 0x15d   :  { %4391 = vst [vmem:[#allocation13_spill] sm:$0xff] %v3753_v20 }
 0x15e   :  { %v3716_v45 = vpop.f32.mrf.mxu0  ;;  %v1233_v14 = vmul.f32 %v3034_v39, %v1232_v24  ;;  %v1238_v39 = vand.u32 2147483648, %v3677_v41  ;;  %v1365_v28 = vsub.f32 %v3707_v29, %v3720_v49  ;;  %v1316_v24 = vsub.f32 %v3730_v48, %v3753_v20 }
 0x15f   :  { %v1378_v29 = vand.u32 4294901760, %v1377_v35 }
 0x160   :  { %v3727_v63 = vpop.f32.mrf.mxu3  ;;  %v1234_v43 = vmul.f32 %v1233_v14, %v3677_v41  ;;  %v3736_v2 = vpop.f32.mrf.mxu1  ;;  %v1366_v51 = vand.u32 4294901760, %v1365_v28 }
 0x161   :  { %v3738_v47 = vpop.f32.mrf.mxu2 }
 0x162   :  { %v1236_v50 = vsel %vm1235_vm8, %v3677_v41, %v1234_v43  ;;  %v1372_v43 = vand.u32 4294901760, %v1371_v40  ;;  %v1367_v57 = vsub.f32 %v1365_v28, %v1366_v51 }
 0x163   :  { %v3750_v31 = vsel %vm1237_vm9, %v1238_v39, %v1236_v50  ;;  %v3783_v39 = vsub.f32 %v1285_v22, %v3760_v61  ;;  %v1288_v50 = vsel %vm1280_vm1, %v1254_v34, 0 }
 0x164   :  { %4390 = vst [vmem:[#allocation12_spill] sm:$0xff] %v3750_v31  ;;  %v3756_v16 = vand.u32 4294901760, %v3750_v31  ;;  %v1373_v22 = vsub.f32 %v1371_v40, %v1372_v43  ;;  %v3795_v7 = vand.u32 4294901760, %v1288_v50 }
 0x165   :  { %4395 = vst [vmem:[#allocation17_spill] sm:$0xff] %v3783_v39 }
 0x166   :  { %v3762_v42 = vpop.f32.mrf.mxu0  ;;  %v1359_v41 = vsub.f32 %v3750_v31, %v3756_v16  ;;  %1306 = vmatpush.msrb.mxu0 %v3756_v16  ;;  %1457 = vmatpush.msrb.mxu3 %v3756_v16  ;;  %v3789_v31 = vand.u32 4294901760, %v1316_v24  ;;  %v1255_v24 = vld [vmem:[%s4363_s2 + $0x18] sm:$0xff] }
 0x168   :  { %v3773_v25 = vpop.f32.mrf.mxu3  ;;  %v3777_v36 = vpop.f32.mrf.mxu1  ;;  %1308 = vmatpush.msrb.mxu0 %v3720_v49  ;;  %1413 = vmatpush.msrb.mxu2 %v1359_v41  ;;  %v1360_v12 = vand.u32 4294901760, %v1359_v41 }
 0x169   :  { %4392 = vst [vmem:[#allocation14_spill] sm:$0xff] %v3773_v25  ;;  %v3780_v14 = vpop.f32.mrf.mxu2  ;;  %1459 = vmatpush.msrb.mxu3 %v3720_v49 }
 0x16a   :  { %4393 = vst [vmem:[#allocation15_spill] sm:$0xff] %v3777_v36  ;;  %1310 = vmatpush.msrb.mxu0 %v3734_v11  ;;  %1416 = vmatpush.msrb.mxu2 %v1365_v28  ;;  %v1361_v38 = vsub.f32 %v1359_v41, %v1360_v12  ;;  %v1368_v28 = vand.u32 4294901760, %v1367_v57  ;;  %v1379_v41 = vsub.f32 %v1377_v35, %v1378_v29  ;;  %v1374_v36 = vand.u32 4294901760, %v1373_v22 }
 0x16b   :  { %4394 = vst [vmem:[#allocation16_spill] sm:$0xff] %v3780_v14  ;;  %1461 = vmatpush.msrb.mxu3 %v3734_v11  ;;  %v3793_v14 = vand.u32 4294901760, %v3783_v39  ;;  %v3808_v57 = vsub.f32 %v1288_v50, %v3795_v7 }
 0x16c   :  { %1312 = vmatpush.msrb.mxu0 %v3744_v19  ;;  %1419 = vmatpush.msrb.mxu2 %v1371_v40  ;;  %v1362_v25 = vand.u32 4294901760, %v1361_v38 }
 0x16d   :  { %4396 = vst [vmem:[#allocation18_spill] sm:$0xff] %v3793_v14  ;;  %1463 = vmatpush.msrb.mxu3 %v3744_v19  ;;  %1318 = vmatmul.f32.vlgmr.msrb.gmra.mxu0 %v3789_v31  ;;  %v3815_v22 = vand.u32 4294901760, %v3808_v57 }
 0x16e   :  { %v844_v34 = vpop.f32.mrf.mxu0  ;;  %1504 = vmatpush.msra.mxu0 %v1360_v12  ;;  %1363 = vmatpush.msrb.mxu1 %v1362_v25  ;;  %v1324_v25 = vsub.f32 %v3783_v39, %v3793_v14  ;;  %4397 = vst [vmem:[#allocation19_spill] sm:$0xff] %v3808_v57 }
 0x16f   :  { %1422 = vmatpush.msrb.mxu2 %v1377_v35  ;;  %v1291_v35 = vsel %vm1280_vm1, %v1255_v24, 0  ;;  %1467 = vmatmul.f32.vlgmr.msrb.gmra.mxu3 %v3753_v20  ;;  %4399 = vst [vmem:[#allocation21_spill] sm:$0xff] %v3815_v22  ;;  %v1332_v50 = vsub.f32 %v3808_v57, %v3815_v22 }
 0x170   :  { %1508 = vmatpush.msra.mxu0 %v1366_v51  ;;  %v3801_v38 = vpop.f32.mrf.mxu3  ;;  %1425 = vmatmul.f32.vlgmr.msrb.gmra.mxu2 %v3730_v48  ;;  %v929_v40 = vpop.f32.mrf.mxu1  ;;  %v1380_v51 = vand.u32 4294901760, %v1379_v41  ;;  %v3812_v12 = vand.u32 4294901760, %v1324_v25 }
 0x171   :  { %1369 = vmatpush.msrb.mxu1 %v1368_v28  ;;  %v1017_v23 = vpop.f32.mrf.mxu2  ;;  %v3817_v28 = vand.u32 4294901760, %v1291_v35 }
 0x172   :  { %1512 = vmatpush.msra.mxu0 %v1372_v43  ;;  %4398 = vst [vmem:[#allocation20_spill] sm:$0xff] %v3812_v12 }
 0x173   :  { %1375 = vmatpush.msrb.mxu1 %v1374_v36  ;;  %v3829_v41 = vsub.f32 %v1291_v35, %v3817_v28 }
 0x174   :  { %1516 = vmatpush.msra.mxu0 %v1378_v29 }
 0x175   :  { %1381 = vmatpush.msrb.mxu1 %v1380_v51  ;;  %1326 = vmatmul.f32.gmra.mxu0 %v3812_v12  ;;  %4400 = vst [vmem:[#allocation22_spill] sm:$0xff] %v3829_v41 }
 0x176   :  { %v849_v48 = vpop.f32.mrf.mxu0  ;;  %1383 = vmatmul.f32.vlgmr.msrb.gmra.mxu1 %v3709_v1 }
 0x177   :  { %1547 = vmatpush.msra.mxu1 %v3756_v16  ;;  %1473 = vmatmul.f32.gmra.mxu3 %v3793_v14  ;;  %v3834_v16 = vand.u32 4294901760, %v1332_v50  ;;  %v769_v50 = vadd.f32 %v3613_v18, %v3616_v15 }
 0x178   :  { %v3821_v43 = vpop.f32.mrf.mxu3  ;;  %1430 = vmatmul.f32.gmra.mxu2 %v3783_v39  ;;  %v935_v29 = vpop.f32.mrf.mxu1 }
 0x179   :  { %1549 = vmatpush.msra.mxu1 %v3720_v49  ;;  %v1021_v36 = vpop.f32.mrf.mxu2  ;;  %4401 = vst [vmem:[#allocation23_spill] sm:$0xff] %v3834_v16  ;;  %v3837_v49 = vand.u32 4294901760, %v3829_v41  ;;  %v845_v14 = vadd.f32 %v844_v34, %v769_v50  ;;  %v785_v50 = vadd.f32 %v3650_v13, %v3652_v32  ;;  %v777_v13 = vadd.f32 %v3633_v55, %v3636_v9 }
 0x17b   :  { %1551 = vmatpush.msra.mxu1 %v3734_v11  ;;  %v1340_v11 = vsub.f32 %v3829_v41, %v3837_v49  ;;  %v930_v15 = vadd.f32 %v929_v40, %v845_v14 }
 0x17d   :  { %1553 = vmatpush.msra.mxu1 %v3744_v19  ;;  %1334 = vmatmul.f32.gmra.mxu0 %v3834_v16  ;;  %v3849_v19 = vand.u32 4294901760, %v1340_v11  ;;  %v773_v11 = vadd.f32 %v3623_v37, %v3626_v30 }
 0x17e   :  { %v854_v24 = vpop.f32.mrf.mxu0  ;;  %1387 = vmatmul.f32.gmra.mxu1 %v3760_v61 }
 0x17f   :  { %1479 = vmatmul.f32.gmra.mxu3 %v3815_v22  ;;  %v850_v34 = vadd.f32 %v849_v48, %v773_v11  ;;  %v855_v48 = vadd.f32 %v854_v24, %v777_v13  ;;  %v4403_v13 = vld [vmem:[#allocation7_spill] sm:$0xff] }
 0x180   :  { %v3840_v25 = vpop.f32.mrf.mxu3  ;;  %1435 = vmatmul.f32.gmra.mxu2 %v3808_v57  ;;  %v941_v35 = vpop.f32.mrf.mxu1  ;;  %v753_v57 = vadd.f32 %v3579_v44, %v3582_v10  ;;  %v757_v10 = vadd.f32 %v3587_v52, %v3590_v53 }
 0x181   :  { %v3843_v51 = vpop.f32.mrf.mxu2  ;;  %v936_v14 = vadd.f32 %v935_v29, %v850_v34  ;;  %v942_v9 = vadd.f32 %v941_v35, %v855_v48  ;;  %v781_v35 = vadd.f32 %v3643_v8, %v3646_v46 }
 0x182   :  { %v825_v18 = vadd.f32 %v3679_v3, %v753_v57  ;;  %v830_v3 = vadd.f32 %v3688_v17, %v757_v10 }
 0x183   :  { %v1022_v32 = vadd.f32 %v1021_v36, %v936_v14 }
 0x184   :  { %v906_v44 = vadd.f32 %v3684_v33, %v825_v18  ;;  %v912_v30 = vadd.f32 %v3698_v0, %v830_v3  ;;  %v761_v0 = vadd.f32 %v3595_v59, %v3598_v60  ;;  %v793_v3 = vadd.f32 %v3665_v54, %v3668_v62 }
 0x185   :  { %1342 = vmatmul.f32.gmra.mxu0 %v3849_v19  ;;  %v1090_v55 = vadd.f32 %v3821_v43, %v1022_v32  ;;  %v1026_v43 = vadd.f32 %v3843_v51, %v942_v9  ;;  %v4404_v32 = vld [vmem:[#allocation6_spill] sm:$0xff] }
 0x186   :  { %v3853_v39 = vpop.f32.mrf.mxu0  ;;  %1391 = vmatmul.f32.gmra.mxu1 %v3795_v7  ;;  %v1002_v40 = vadd.f32 %v3686_v56, %v906_v44  ;;  %v1006_v56 = vadd.f32 %v3700_v26, %v912_v30  ;;  %v4402_v30 = vld [vmem:[#allocation15_spill] sm:$0xff] }
 0x187   :  { %1485 = vmatmul.f32.gmra.mxu3 %v3837_v49  ;;  %v1127_v10 = vmul.f32 %v1090_v55, %v1090_v55  ;;  %v860_v14 = vadd.f32 %v3853_v39, %v781_v35  ;;  %v1094_v51 = vadd.f32 %v3840_v25, %v1026_v43 }
 0x188   :  { %v3858_v12 = vpop.f32.mrf.mxu3  ;;  %1440 = vmatmul.f32.gmra.mxu2 %v3829_v41  ;;  %v3861_v16 = vpop.f32.mrf.mxu1  ;;  %v1018_v41 = vadd.f32 %v1017_v23, %v930_v15  ;;  %v1070_v23 = vadd.f32 %v3682_v27, %v1002_v40  ;;  %v835_v27 = vadd.f32 %v3716_v45, %v761_v0  ;;  %v1074_v11 = vadd.f32 %v3695_v58, %v1006_v56  ;;  %v4405_v56 = vld [vmem:[#allocation16_spill] sm:$0xff] }
 0x189   :  { %v3863_v22 = vpop.f32.mrf.mxu2  ;;  %v765_v58 = vadd.f32 %v3603_v5, %v3606_v6 }
 0x18a   :  { %v1086_v52 = vadd.f32 %v3801_v38, %v1018_v41  ;;  %v1117_v36 = vmul.f32 %v1070_v23, %v1070_v23  ;;  %v797_v23 = vadd.f32 %v4404_v32, %v4403_v13 }
 0x18b   :  { %v840_v8 = vadd.f32 %v3762_v42, %v765_v58 }
 0x18c   :  { %v1125_v29 = vmul.f32 %v1086_v52, %v1086_v52  ;;  %v1129_v52 = vmul.f32 %v1094_v51, %v1094_v51 }
 0x18d   :  { %1518 = vmatmul.f32.vlgmr.msra.gmra.mxu0 %v3709_v1 }
 0x18e   :  { %v864_v20 = vpop.f32.mrf.mxu0  ;;  %1395 = vmatmul.f32.gmra.mxu1 %v3817_v28 }
 0x18f   :  { %v865_v57 = vadd.f32 %v864_v20, %v785_v50  ;;  %v789_v20 = vadd.f32 %v3657_v4, %v3659_v21  ;;  %v918_v4 = vadd.f32 %v3736_v2, %v835_v27  ;;  %v1141_v21 = vadd.f32 %v1125_v29, %v1117_v36  ;;  %v4406_v27 = vld [vmem:[#allocation14_spill] sm:$0xff] }
 0x190   :  { %v1101_v37 = vpop.f32.mrf.mxu3  ;;  %v953_v33 = vpop.f32.mrf.mxu1  ;;  %v1119_v50 = vmul.f32 %v1074_v11, %v1074_v11 }
 0x191   :  { %v1033_v18 = vpop.f32.mrf.mxu2  ;;  %v954_v53 = vadd.f32 %v953_v33, %v865_v57  ;;  %v1010_v2 = vadd.f32 %v3738_v47, %v918_v4  ;;  %v924_v33 = vadd.f32 %v4402_v30, %v840_v8 }
 0x192   :  { %v1143_v46 = vadd.f32 %v1127_v10, %v1119_v50 }
 0x193   :  { %v1034_v17 = vadd.f32 %v1033_v18, %v954_v53  ;;  %v1078_v39 = vadd.f32 %v3727_v63, %v1010_v2  ;;  %v1014_v48 = vadd.f32 %v4405_v56, %v924_v33 }
 0x195   :  { %v1102_v38 = vadd.f32 %v1101_v37, %v1034_v17  ;;  %1522 = vmatmul.f32.gmra.mxu0 %v3760_v61  ;;  %v948_v37 = vadd.f32 %v3861_v16, %v860_v14  ;;  %v1121_v17 = vmul.f32 %v1078_v39, %v1078_v39 }
 0x196   :  { %v869_v15 = vpop.f32.mrf.mxu0  ;;  %1555 = vmatmul.f32.vlgmr.msra.gmra.mxu1 %v3709_v1 }
 0x197   :  { %v870_v41 = vadd.f32 %v869_v15, %v789_v20  ;;  %v1133_v26 = vmul.f32 %v1102_v38, %v1102_v38  ;;  %v1030_v25 = vadd.f32 %v3863_v22, %v948_v37  ;;  %v1145_v20 = vadd.f32 %v1129_v52, %v1121_v17 }
 0x198   :  { %v1105_v24 = vpop.f32.mrf.mxu3  ;;  %v959_v59 = vpop.f32.mrf.mxu1 }
 0x199   :  { %v1037_v60 = vpop.f32.mrf.mxu2  ;;  %v960_v44 = vadd.f32 %v959_v59, %v870_v41  ;;  %v3898_v45 = vadd.f32 %v1141_v21, %v1133_v26  ;;  %v1098_v29 = vadd.f32 %v3858_v12, %v1030_v25  ;;  %v1082_v41 = vadd.f32 %v4406_v27, %v1014_v48 }
 0x19b   :  { %v1038_v34 = vadd.f32 %v1037_v60, %v960_v44  ;;  %3035 = vrsqrt.f32 %v3898_v45  ;;  %v1131_v60 = vmul.f32 %v1098_v29, %v1098_v29  ;;  %v1123_v44 = vmul.f32 %v1082_v41, %v1082_v41 }
 0x19c   :  { %vm1175_vm13 = vcmp.eq.f32.partialorder %v3898_v45, inf  ;;  %v1178_v17 = vand.u32 2147483648, %v3898_v45  ;;  %vm1177_vm15 = vcmp.eq.f32.partialorder %v3898_v45, 0.0 }
 0x19d   :  { %v1106_v57 = vadd.f32 %v1105_v24, %v1038_v34  ;;  %1526 = vmatmul.f32.gmra.mxu0 %v3795_v7  ;;  %v1147_v35 = vadd.f32 %v1131_v60, %v1123_v44  ;;  %v4407_v44 = vld [vmem:[#allocation13_spill] sm:$0xff] }
 0x19e   :  { %v874_v40 = vpop.f32.mrf.mxu0  ;;  %1559 = vmatmul.f32.gmra.mxu1 %v3760_v61 }
 0x19f   :  { %v875_v5 = vadd.f32 %v874_v40, %v793_v3  ;;  %v1135_v6 = vmul.f32 %v1106_v57, %v1106_v57 }
 0x1a0   :  { %v1109_v54 = vpop.f32.mrf.mxu3  ;;  %v965_v62 = vpop.f32.mrf.mxu1 }
 0x1a1   :  { %v1041_v47 = vpop.f32.mrf.mxu2  ;;  %v3914_v18 = vadd.f32 %v1143_v46, %v1135_v6  ;;  %v966_v42 = vadd.f32 %v965_v62, %v875_v5  ;;  %v3036_v53 = vpop.eup %3035 }
 0x1a2   :  { %v1169_v9 = vmul.f32 %v3036_v53, %v3898_v45 }
 0x1a3   :  { %3037 = vrsqrt.f32 %v3914_v18  ;;  %v1042_v16 = vadd.f32 %v1041_v47, %v966_v42  ;;  %vm1199_vm11 = vcmp.eq.f32.partialorder %v3914_v18, inf  ;;  %vm1201_vm14 = vcmp.eq.f32.partialorder %v3914_v18, 0.0 }
 0x1a4   :  { %v1170_v21 = vmul.f32 %v3036_v53, %v1169_v9 }
 0x1a5   :  { %v1110_v63 = vadd.f32 %v1109_v54, %v1042_v16  ;;  %1530 = vmatmul.f32.gmra.mxu0 %v3817_v28 }
 0x1a6   :  { %v879_v0 = vpop.f32.mrf.mxu0  ;;  %1563 = vmatmul.f32.gmra.mxu1 %v3795_v7  ;;  %v1171_v58 = vmul.f32 0.5, %v1170_v21 }
 0x1a7   :  { %v880_v15 = vadd.f32 %v879_v0, %v797_v23  ;;  %v1137_v38 = vmul.f32 %v1110_v63, %v1110_v63 }
 0x1a8   :  { %v971_v22 = vpop.f32.mrf.mxu1  ;;  %v1113_v11 = vpop.f32.mrf.mxu3  ;;  %v1172_v57 = vsub.f32 1.5, %v1171_v58  ;;  %v4410_v58 = vld [vmem:[#allocation18_spill] sm:$0xff] }
 0x1a9   :  { %v1045_v55 = vpop.f32.mrf.mxu2  ;;  %v3038_v36 = vpop.eup %3037  ;;  %v1153_v26 = vadd.f32 %v1145_v20, %v1137_v38  ;;  %v972_v24 = vadd.f32 %v971_v22, %v880_v15 }
 0x1aa   :  { %v1193_v59 = vmul.f32 %v3038_v36, %v3914_v18  ;;  %v1173_v37 = vmul.f32 %v3036_v53, %v1172_v57  ;;  %v1202_v53 = vand.u32 2147483648, %v3914_v18  ;;  %v4415_v57 = vld [vmem:[#allocation22_spill] sm:$0xff] }
 0x1ab   :  { %3039 = vrsqrt.f32 %v1153_v26  ;;  %v1046_v4 = vadd.f32 %v1045_v55, %v972_v24  ;;  %vm1223_vm10 = vcmp.eq.f32.partialorder %v1153_v26, inf  ;;  %v1226_v33 = vand.u32 2147483648, %v1153_v26 }
 0x1ac   :  { %v1194_v12 = vmul.f32 %v3038_v36, %v1193_v59  ;;  %v1174_v30 = vmul.f32 %v1173_v37, %v3898_v45  ;;  %vm1225_vm12 = vcmp.eq.f32.partialorder %v1153_v26, 0.0 }
 0x1ad   :  { %v1114_v10 = vadd.f32 %v1113_v11, %v1046_v4 }
 0x1ae   :  { %1567 = vmatmul.f32.gmra.mxu1 %v3817_v28  ;;  %v1195_v43 = vmul.f32 0.5, %v1194_v12  ;;  %v1176_v32 = vsel %vm1175_vm13, %v3898_v45, %v1174_v30 }
 0x1af   :  { %v1139_v34 = vmul.f32 %v1114_v10, %v1114_v10  ;;  %v3943_v0 = vsel %vm1177_vm15, %v1178_v17, %v1176_v32 }
 0x1b0   :  { %v1196_v14 = vsub.f32 1.5, %v1195_v43  ;;  %v1589_v38 = vand.u32 4294901760, %v3943_v0  ;;  %v4408_v43 = vld [vmem:[#allocation11_spill] sm:$0xff] }
 0x1b1   :  { %v3040_v50 = vpop.eup %3039  ;;  %v1155_v3 = vadd.f32 %v1147_v35, %v1139_v34  ;;  %v2510_v34 = vld [vmem:[#allocation2] sm:$0x1] }
 0x1b2   :  { %v1217_v2 = vmul.f32 %v3040_v50, %v1153_v26  ;;  %v1197_v46 = vmul.f32 %v3038_v36, %v1196_v14  ;;  %v1655_v36 = vsub.f32 %v3943_v0, %v1589_v38  ;;  %2513 = vperm.xlu0 %3024, %v2510_v34   ;;  %v4414_v14 = vld [vmem:[#allocation19_spill] sm:$0xff] }
 0x1b3   :  { %3041 = vrsqrt.f32 %v1155_v3  ;;  %vm1247_vm0 = vcmp.eq.f32.partialorder %v1155_v3, inf  ;;  %v1250_v29 = vand.u32 2147483648, %v1155_v3  ;;  %vm1249_vm2 = vcmp.eq.f32.partialorder %v1155_v3, 0.0 }
 0x1b4   :  { %v1218_v40 = vmul.f32 %v3040_v50, %v1217_v2  ;;  %v1198_v62 = vmul.f32 %v1197_v46, %v3914_v18  ;;  %v1656_v59 = vand.u32 4294901760, %v1655_v36  ;;  %v4413_v2 = vld [vmem:[#allocation21_spill] sm:$0xff] }
 0x1b6   :  { %v1219_v8 = vmul.f32 0.5, %v1218_v40  ;;  %v1200_v25 = vsel %vm1199_vm11, %v3914_v18, %v1198_v62  ;;  %v1657_v21 = vsub.f32 %v1655_v36, %v1656_v59 }
 0x1b7   :  { %v3938_v23 = vsel %vm1201_vm14, %v1202_v53, %v1200_v25 }
 0x1b8   :  { %v1220_v51 = vsub.f32 1.5, %v1219_v8  ;;  %v1587_v20 = vand.u32 4294901760, %v3938_v23  ;;  %v1658_v35 = vand.u32 4294901760, %v1657_v21 }
 0x1b9   :  { %v3042_v5 = vpop.eup %3041 }
 0x1ba   :  { %v1241_v6 = vmul.f32 %v3042_v5, %v1155_v3  ;;  %v1221_v54 = vmul.f32 %v3040_v50, %v1220_v51  ;;  %v1649_v9 = vsub.f32 %v3938_v23, %v1587_v20  ;;  %v4411_v50 = vld [vmem:[#allocation17_spill] sm:$0xff] }
 0x1bc   :  { %v1242_v47 = vmul.f32 %v3042_v5, %v1241_v6  ;;  %v1222_v39 = vmul.f32 %v1221_v54, %v1153_v26  ;;  %v3975_v6 = vpop.permute.xlu1 %1267  ;;  %v3977_v54 = vpop.permute.xlu0 %1277 }
 0x1be   :  { %v1243_v42 = vmul.f32 0.5, %v1242_v47  ;;  %v1224_v52 = vsel %vm1223_vm10, %v1153_v26, %v1222_v39  ;;  %v1650_v26 = vand.u32 4294901760, %v1649_v9 }
 0x1bf   :  { %v3932_v16 = vsel %vm1225_vm12, %v1226_v33, %v1224_v52 }
 0x1c0   :  { %v1244_v13 = vsub.f32 1.5, %v1243_v42  ;;  %v1585_v48 = vand.u32 4294901760, %v3932_v16  ;;  %v1651_v4 = vsub.f32 %v1649_v9, %v1650_v26 }
 0x1c2   :  { %v1245_v56 = vmul.f32 %v3042_v5, %v1244_v13  ;;  %v1643_v18 = vsub.f32 %v3932_v16, %v1585_v48  ;;  %v1652_v10 = vand.u32 4294901760, %v1651_v4 }
 0x1c4   :  { %v1246_v63 = vmul.f32 %v1245_v56, %v1155_v3  ;;  %v1644_v27 = vand.u32 4294901760, %v1643_v18  ;;  %v3982_v42 = vpop.permute.xlu1 %1262 }
 0x1c6   :  { %v1248_v15 = vsel %vm1247_vm0, %v1155_v3, %v1246_v63  ;;  %v1645_v11 = vsub.f32 %v1643_v18, %v1644_v27  ;;  %v4412_v3 = vld [vmem:[#allocation23_spill] sm:$0xff] }
 0x1c7   :  { %v3948_v22 = vsel %vm1249_vm2, %v1250_v29, %v1248_v15 }
 0x1c8   :  { %v1583_v55 = vand.u32 4294901760, %v3948_v22  ;;  %v1646_v12 = vand.u32 4294901760, %v1645_v11 }
 0x1ca   :  { %1584 = vmatpush.msra.mxu2 %v1583_v55  ;;  %1735 = vmatpush.msrb.mxu1 %v1583_v55  ;;  %v1637_v45 = vsub.f32 %v3948_v22, %v1583_v55 }
 0x1cc   :  { %1586 = vmatpush.msra.mxu2 %v1585_v48  ;;  %1691 = vmatpush.msrb.mxu0 %v1637_v45  ;;  %v1638_v41 = vand.u32 4294901760, %v1637_v45 }
 0x1cd   :  { %1737 = vmatpush.msrb.mxu1 %v1585_v48 }
 0x1ce   :  { %1588 = vmatpush.msra.mxu2 %v1587_v20  ;;  %1694 = vmatpush.msrb.mxu0 %v1643_v18  ;;  %v1639_v24 = vsub.f32 %v1637_v45, %v1638_v41 }
 0x1cf   :  { %1739 = vmatpush.msrb.mxu1 %v1587_v20 }
 0x1d0   :  { %1590 = vmatpush.msra.mxu2 %v1589_v38  ;;  %1697 = vmatpush.msrb.mxu0 %v1649_v9  ;;  %v1640_v60 = vand.u32 4294901760, %v1639_v24 }
 0x1d1   :  { %1741 = vmatpush.msrb.mxu1 %v1589_v38  ;;  %1596 = vmatmul.f32.vlgmr.msra.gmra.mxu2 %v3789_v31  ;;  %v4409_v31 = vld [vmem:[#allocation20_spill] sm:$0xff] }
 0x1d2   :  { %1782 = vmatpush.msrb.mxu2 %v1638_v41  ;;  %1641 = vmatpush.msra.mxu3 %v1640_v60 }
 0x1d3   :  { %1700 = vmatpush.msrb.mxu0 %v1655_v36  ;;  %1745 = vmatmul.f32.vlgmr.msrb.gmra.mxu1 %v4407_v44  ;;  %v1857_v44 = vld [vmem:[%s4365_s4] sm:$0xff] }
 0x1d4   :  { %1786 = vmatpush.msrb.mxu2 %v1644_v27  ;;  %1647 = vmatpush.msra.mxu3 %v1646_v12 }
 0x1d5   :  { %1703 = vmatmul.f32.vlgmr.msrb.gmra.mxu0 %v4408_v43  ;;  %v1886_v43 = vsel %vm1280_vm1, %v1857_v44, 0 }
 0x1d6   :  { %1790 = vmatpush.msrb.mxu2 %v1650_v26  ;;  %1653 = vmatpush.msra.mxu3 %v1652_v10  ;;  %v3994_v34 = vand.u32 4294901760, %v1886_v43 }
 0x1d8   :  { %1794 = vmatpush.msrb.mxu2 %v1656_v59  ;;  %1659 = vmatpush.msra.mxu3 %v1658_v35 }
 0x1d9   :  { %1604 = vmatmul.f32.gmra.mxu2 %v4409_v31  ;;  %1661 = vmatmul.f32.vlgmr.msra.gmra.mxu3 %v3709_v1 }
 0x1da   :  { %1825 = vmatpush.msrb.mxu3 %v1583_v55 }
 0x1db   :  { %1751 = vmatmul.f32.gmra.mxu1 %v4410_v58 }
 0x1dc   :  { %1827 = vmatpush.msrb.mxu3 %v1585_v48 }
 0x1dd   :  { %1708 = vmatmul.f32.gmra.mxu0 %v4411_v50 }
 0x1de   :  { %1829 = vmatpush.msrb.mxu3 %v1587_v20 }
 0x1e0   :  { %1831 = vmatpush.msrb.mxu3 %v1589_v38 }
 0x1e1   :  { %1612 = vmatmul.f32.gmra.mxu2 %v4412_v3  ;;  %1665 = vmatmul.f32.gmra.mxu3 %v3760_v61 }
 0x1e3   :  { %1757 = vmatmul.f32.gmra.mxu1 %v4413_v2  ;;  %v1858_v2 = vld [vmem:[%s4365_s4 + $0x8] sm:$0xff] }
 0x1e5   :  { %1713 = vmatmul.f32.gmra.mxu0 %v4414_v14 }
 0x1e9   :  { %1620 = vmatmul.f32.gmra.mxu2 %v3849_v19  ;;  %1669 = vmatmul.f32.gmra.mxu3 %v3795_v7 }
 0x1ea   :  { %v1319_v40 = vpop.f32.mrf.mxu0 }
 0x1eb   :  { %1763 = vmatmul.f32.gmra.mxu1 %v3837_v49  ;;  %v1320_v52 = vadd.f32 %v1319_v40, %v3982_v42 }
 0x1ed   :  { %1718 = vmatmul.f32.gmra.mxu0 %v4415_v57  ;;  %v4002_v57 = vsub.f32 %v1886_v43, %v3994_v34 }
 0x1f1   :  { %1673 = vmatmul.f32.gmra.mxu3 %v3817_v28  ;;  %1796 = vmatmul.f32.vlgmr.msrb.gmra.mxu2 %v3709_v1 }
 0x1f2   :  { %v1327_v46 = vpop.f32.mrf.mxu0  ;;  %v1468_v5 = vpop.f32.mrf.mxu3 }
 0x1f3   :  { %v1384_v8 = vpop.f32.mrf.mxu1  ;;  %v1426_v19 = vpop.f32.mrf.mxu2  ;;  %v1328_v39 = vadd.f32 %v1327_v46, %v3975_v6  ;;  %v1889_v46 = vsel %vm1280_vm1, %v1858_v2, 0 }
 0x1f4   :  { %v1385_v17 = vadd.f32 %v1384_v8, %v1320_v52  ;;  %v4093_v2 = vpop.permute.xlu2 %1882 }
 0x1f6   :  { %v1427_v29 = vadd.f32 %v1426_v19, %v1385_v17  ;;  %v4011_v19 = vand.u32 4294901760, %v4002_v57 }
 0x1f8   :  { %v1469_v9 = vadd.f32 %v1468_v5, %v1427_v29 }
 0x1f9   :  { %1800 = vmatmul.f32.gmra.mxu2 %v3760_v61  ;;  %1833 = vmatmul.f32.vlgmr.msrb.gmra.mxu3 %v3709_v1 }
 0x1fa   :  { %v1335_v37 = vpop.f32.mrf.mxu0  ;;  %v1474_v30 = vpop.f32.mrf.mxu3 }
 0x1fb   :  { %v1388_v51 = vpop.f32.mrf.mxu1  ;;  %v1431_v47 = vpop.f32.mrf.mxu2 }
 0x1fc   :  { %v1389_v53 = vadd.f32 %v1388_v51, %v1328_v39 }
 0x1fe   :  { %v1432_v56 = vadd.f32 %v1431_v47, %v1389_v53  ;;  %v1859_v47 = vld [vmem:[%s4365_s4 + $0x10] sm:$0xff] }
 0x200   :  { %v1475_v18 = vadd.f32 %v1474_v30, %v1432_v56 }
 0x201   :  { %1804 = vmatmul.f32.gmra.mxu2 %v3795_v7  ;;  %1837 = vmatmul.f32.gmra.mxu3 %v3760_v61  ;;  %v3984_v61 = vpop.permute.xlu0 %1272 }
 0x202   :  { %v1343_v62 = vpop.f32.mrf.mxu0  ;;  %v1336_v25 = vadd.f32 %v1335_v37, %v3984_v61  ;;  %v1480_v63 = vpop.f32.mrf.mxu3 }
 0x203   :  { %v1392_v49 = vpop.f32.mrf.mxu1  ;;  %v1436_v32 = vpop.f32.mrf.mxu2  ;;  %v1344_v20 = vadd.f32 %v1343_v62, %v3977_v54 }
 0x209   :  { %1808 = vmatmul.f32.gmra.mxu2 %v3817_v28  ;;  %1841 = vmatmul.f32.gmra.mxu3 %v3795_v7  ;;  %v1393_v7 = vadd.f32 %v1392_v49, %v1336_v25  ;;  %v4013_v49 = vand.u32 4294901760, %v1889_v46 }
 0x20a   :  { %v1519_v33 = vpop.f32.mrf.mxu0  ;;  %v1486_v59 = vpop.f32.mrf.mxu3 }
 0x20b   :  { %v1396_v1 = vpop.f32.mrf.mxu1  ;;  %v1437_v15 = vadd.f32 %v1436_v32, %v1393_v7  ;;  %v1441_v27 = vpop.f32.mrf.mxu2  ;;  %v4023_v52 = vsub.f32 %v1889_v46, %v4013_v49 }
 0x20c   :  { %v1397_v55 = vadd.f32 %v1396_v1, %v1344_v20 }
 0x20d   :  { %v1481_v45 = vadd.f32 %v1480_v63, %v1437_v15  ;;  %v1860_v15 = vld [vmem:[%s4365_s4 + $0x18] sm:$0xff] }
 0x20e   :  { %v1442_v24 = vadd.f32 %v1441_v27, %v1397_v55  ;;  %v1895_v27 = vsel %vm1280_vm1, %v1860_v15, 0 }
 0x210   :  { %v1487_v21 = vadd.f32 %v1486_v59, %v1442_v24  ;;  %v4056_v24 = vand.u32 4294901760, %v1895_v27 }
 0x211   :  { %1845 = vmatmul.f32.gmra.mxu3 %v3817_v28  ;;  %v1520_v28 = vadd.f32 %v1519_v33, %v1469_v9  ;;  %v1920_v33 = vsub.f32 %v4002_v57, %v4011_v19 }
 0x212   :  { %v1523_v48 = vpop.f32.mrf.mxu0  ;;  %v4063_v59 = vsub.f32 %v1895_v27, %v4056_v24 }
 0x213   :  { %v1556_v13 = vpop.f32.mrf.mxu1  ;;  %v1524_v36 = vadd.f32 %v1523_v48, %v1475_v18  ;;  %v4027_v56 = vand.u32 4294901760, %v1920_v33  ;;  %v4031_v48 = vand.u32 4294901760, %v4023_v52 }
 0x214   :  { %v1557_v4 = vadd.f32 %v1556_v13, %v1520_v28  ;;  %v1892_v13 = vsel %vm1280_vm1, %v1859_v47, 0  ;;  %vm2517_vm1 = vcmask 523264  }
 0x215   :  { %v4033_v63 = vand.u32 4294901760, %v1892_v13  ;;  %v1928_v9 = vsub.f32 %v4023_v52, %v4031_v48 }
 0x217   :  { %v4051_v28 = vand.u32 4294901760, %v1928_v9 }
 0x21a   :  { %v1527_v41 = vpop.f32.mrf.mxu0 }
 0x21b   :  { %v1560_v38 = vpop.f32.mrf.mxu1  ;;  %v1528_v26 = vadd.f32 %v1527_v41, %v1481_v45  ;;  %v4046_v45 = vsub.f32 %v1892_v13, %v4033_v63 }
 0x21c   :  { %v1561_v11 = vadd.f32 %v1560_v38, %v1524_v36 }
 0x21e   :  { %3043 = vtanh.f32 %v1561_v11 }
 0x222   :  { %v1531_v10 = vpop.f32.mrf.mxu0 }
 0x223   :  { %v1564_v60 = vpop.f32.mrf.mxu1  ;;  %v1532_v35 = vadd.f32 %v1531_v10, %v1487_v21 }
 0x224   :  { %v1565_v12 = vadd.f32 %v1564_v60, %v1528_v26  ;;  %v3044_v31 = vpop.eup %3043  ;;  %v4054_v26 = vand.u32 4294901760, %v4046_v45 }
 0x225   :  { %v4004_v8 = vand.u32 4294901760, %v3044_v31 }
 0x226   :  { %3045 = vtanh.f32 %v1565_v12  ;;  %v1936_v11 = vsub.f32 %v4046_v45, %v4054_v26 }
 0x227   :  { %3047 = vtanh.f32 %v1557_v4  ;;  %v1975_v5 = vsub.f32 %v3044_v31, %v4004_v8  ;;  %v4071_v4 = vand.u32 4294901760, %v4063_v59 }
 0x228   :  { %v4068_v60 = vand.u32 4294901760, %v1936_v11 }
 0x229   :  { %v1976_v53 = vand.u32 4294901760, %v1975_v5  ;;  %v1944_v12 = vsub.f32 %v4063_v59, %v4071_v4 }
 0x22b   :  { %v1568_v58 = vpop.f32.mrf.mxu1  ;;  %v1977_v29 = vsub.f32 %v1975_v5, %v1976_v53  ;;  %v4081_v21 = vand.u32 4294901760, %v1944_v12 }
 0x22c   :  { %v3046_v50 = vpop.eup %3045  ;;  %v1569_v3 = vadd.f32 %v1568_v58, %v1532_v35 }
 0x22d   :  { %v3999_v14 = vand.u32 4294901760, %v3046_v50  ;;  %v3048_v40 = vpop.eup %3047  ;;  %v1978_v36 = vand.u32 4294901760, %v1977_v29 }
 0x22e   :  { %3049 = vtanh.f32 %v1569_v3  ;;  %v4007_v51 = vand.u32 4294901760, %v3048_v40 }
 0x22f   :  { %v1969_v37 = vsub.f32 %v3046_v50, %v3999_v14 }
 0x230   :  { %v1981_v30 = vsub.f32 %v3048_v40, %v4007_v51 }
 0x231   :  { %v1970_v39 = vand.u32 4294901760, %v1969_v37 }
 0x232   :  { %v1982_v7 = vand.u32 4294901760, %v1981_v30 }
 0x233   :  { %v1971_v17 = vsub.f32 %v1969_v37, %v1970_v39 }
 0x234   :  { %v3050_v62 = vpop.eup %3049  ;;  %v1983_v55 = vsub.f32 %v1981_v30, %v1982_v7 }
 0x235   :  { %v1909_v1 = vand.u32 4294901760, %v3050_v62  ;;  %v1972_v38 = vand.u32 4294901760, %v1971_v17 }
 0x236   :  { %v1984_v41 = vand.u32 4294901760, %v1983_v55 }
 0x237   :  { %1910 = vmatpush.msra.mxu0 %v1909_v1  ;;  %v1963_v25 = vsub.f32 %v3050_v62, %v1909_v1  ;;  %2061 = vmatpush.msra.mxu3 %v1909_v1 }
 0x239   :  { %1912 = vmatpush.msra.mxu0 %v3999_v14  ;;  %2017 = vmatpush.msra.mxu2 %v1963_v25  ;;  %v1964_v32 = vand.u32 4294901760, %v1963_v25 }
 0x23a   :  { %2063 = vmatpush.msra.mxu3 %v3999_v14 }
 0x23b   :  { %1914 = vmatpush.msra.mxu0 %v4004_v8  ;;  %2020 = vmatpush.msra.mxu2 %v1969_v37  ;;  %v1965_v20 = vsub.f32 %v1963_v25, %v1964_v32 }
 0x23c   :  { %2065 = vmatpush.msra.mxu3 %v4004_v8 }
 0x23d   :  { %1916 = vmatpush.msra.mxu0 %v4007_v51  ;;  %v1966_v18 = vand.u32 4294901760, %v1965_v20  ;;  %2023 = vmatpush.msra.mxu2 %v1975_v5 }
 0x23e   :  { %1922 = vmatmul.f32.vlgmr.msra.gmra.mxu0 %v4027_v56  ;;  %2067 = vmatpush.msra.mxu3 %v4007_v51 }
 0x23f   :  { %1967 = vmatpush.msra.mxu1 %v1966_v18  ;;  %2026 = vmatpush.msra.mxu2 %v1981_v30 }
 0x240   :  { %2029 = vmatmul.f32.vlgmr.msra.gmra.mxu2 %v4002_v57  ;;  %2071 = vmatmul.f32.vlgmr.msra.gmra.mxu3 %v4011_v19 }
 0x241   :  { %1973 = vmatpush.msra.mxu1 %v1972_v38  ;;  %2108 = vmatpush.msrb.mxu0 %v1964_v32 }
 0x243   :  { %1979 = vmatpush.msra.mxu1 %v1978_v36  ;;  %2112 = vmatpush.msrb.mxu0 %v1970_v39  ;;  %v4102_v39 = vpop.permute.xlu0 %1872 }
 0x245   :  { %1985 = vmatpush.msra.mxu1 %v1984_v41  ;;  %2116 = vmatpush.msrb.mxu0 %v1976_v53  ;;  %v4105_v53 = vpop.permute.xlu1 %2482 }
 0x246   :  { %1930 = vmatmul.f32.gmra.mxu0 %v4051_v28  ;;  %1987 = vmatmul.f32.vlgmr.msra.gmra.mxu1 %v3994_v34 }
 0x247   :  { %2151 = vmatpush.msrb.mxu1 %v1909_v1  ;;  %2120 = vmatpush.msrb.mxu0 %v1982_v7 }
 0x248   :  { %2034 = vmatmul.f32.gmra.mxu2 %v4023_v52  ;;  %2077 = vmatmul.f32.gmra.mxu3 %v4031_v48 }
 0x249   :  { %2153 = vmatpush.msrb.mxu1 %v3999_v14 }
 0x24b   :  { %2155 = vmatpush.msrb.mxu1 %v4004_v8  ;;  %v4112_v36 = vpop.permute.xlu0 %2477 }
 0x24d   :  { %2157 = vmatpush.msrb.mxu1 %v4007_v51  ;;  %v4097_v51 = vpop.permute.xlu2 %1877  ;;  %v4114_v12 = vpop.permute.xlu1 %2472 }
 0x24e   :  { %1938 = vmatmul.f32.gmra.mxu0 %v4068_v60  ;;  %1991 = vmatmul.f32.gmra.mxu1 %v4013_v49 }
 0x250   :  { %2039 = vmatmul.f32.gmra.mxu2 %v4046_v45  ;;  %2083 = vmatmul.f32.gmra.mxu3 %v4054_v26  ;;  %v1746_v14 = vpop.f32.mrf.mxu1 }
 0x252   :  { %v1704_v58 = vpop.f32.mrf.mxu0 }
 0x254   :  { %v1597_v44 = vpop.f32.mrf.mxu2 }
 0x255   :  { %v1598_v30 = vadd.f32 %v1597_v44, %v3982_v42  ;;  %v4107_v32 = vpop.permute.xlu2 %1867  ;;  %v4416_v42 = vld [vmem:[#allocation12_spill] sm:$0xff] }
 0x256   :  { %1946 = vmatmul.f32.gmra.mxu0 %v4081_v21  ;;  %1995 = vmatmul.f32.gmra.mxu1 %v4033_v63  ;;  %v2491_v9 = vsub.f32 %v4416_v42, %v4105_v53 }
 0x258   :  { %2044 = vmatmul.f32.gmra.mxu2 %v4063_v59  ;;  %2089 = vmatmul.f32.gmra.mxu3 %v4071_v4  ;;  %v1752_v37 = vpop.f32.mrf.mxu1 }
 0x25a   :  { %v1709_v46 = vpop.f32.mrf.mxu0 }
 0x25c   :  { %v1605_v10 = vpop.f32.mrf.mxu2  ;;  %v1662_v43 = vpop.f32.mrf.mxu3 }
 0x25d   :  { %v1606_v47 = vadd.f32 %v1605_v10, %v3975_v6  ;;  %v1663_v17 = vadd.f32 %v1662_v43, %v1598_v30 }
 0x25e   :  { %1999 = vmatmul.f32.gmra.mxu1 %v4056_v24  ;;  %2122 = vmatmul.f32.vlgmr.msrb.gmra.mxu0 %v3994_v34 }
 0x260   :  { %v1758_v7 = vpop.f32.mrf.mxu1 }
 0x262   :  { %v1714_v33 = vpop.f32.mrf.mxu0 }
 0x264   :  { %v1613_v35 = vpop.f32.mrf.mxu2  ;;  %v1666_v31 = vpop.f32.mrf.mxu3 }
 0x265   :  { %v1614_v1 = vadd.f32 %v1613_v35, %v3984_v61  ;;  %v1667_v13 = vadd.f32 %v1666_v31, %v1606_v47  ;;  %v1705_v61 = vadd.f32 %v1704_v58, %v1663_v17  ;;  %v4417_v35 = vld [vmem:[#allocation8_spill] sm:$0xff] }
 0x266   :  { %2126 = vmatmul.f32.gmra.mxu0 %v4013_v49  ;;  %2159 = vmatmul.f32.vlgmr.msrb.gmra.mxu1 %v3994_v34  ;;  %v2489_v31 = vsub.f32 %v4417_v35, %v4112_v36 }
 0x267   :  { %v1710_v15 = vadd.f32 %v1709_v46, %v1667_v13  ;;  %v1747_v44 = vadd.f32 %v1746_v14, %v1705_v61  ;;  %v4419_v14 = vld [vmem:[#allocation10_spill] sm:$0xff] }
 0x268   :  { %v1764_v46 = vpop.f32.mrf.mxu1 }
 0x269   :  { %v1753_v27 = vadd.f32 %v1752_v37, %v1710_v15  ;;  %v4418_v37 = vld [vmem:[#allocation9_spill] sm:$0xff] }
 0x26a   :  { %v1719_v41 = vpop.f32.mrf.mxu0 }
 0x26c   :  { %v1621_v50 = vpop.f32.mrf.mxu2  ;;  %v1670_v3 = vpop.f32.mrf.mxu3 }
 0x26d   :  { %v1671_v25 = vadd.f32 %v1670_v3, %v1614_v1  ;;  %v1622_v6 = vadd.f32 %v1621_v50, %v3977_v54  ;;  %v4118_v50 = vpop.permute.xlu2 %2467  ;;  %v2499_v3 = vmul.f32 0.5, %v2491_v9  ;;  %v2487_v1 = vsub.f32 %v4418_v37, %v4114_v12 }
 0x26e   :  { %2163 = vmatmul.f32.gmra.mxu1 %v4013_v49  ;;  %2130 = vmatmul.f32.gmra.mxu0 %v4033_v63 }
 0x26f   :  { %v1715_v29 = vadd.f32 %v1714_v33, %v1671_v25  ;;  %v2497_v25 = vmul.f32 0.5, %v2489_v31  ;;  %v2507_v17 = vmul.f32 %v2499_v3, %v2491_v9 }
 0x271   :  { %v1759_v38 = vadd.f32 %v1758_v7, %v1715_v29  ;;  %v2495_v7 = vmul.f32 0.5, %v2487_v1  ;;  %v4124_v61 = vand.u32 4294901760, %v2507_v17 }
 0x274   :  { %v1674_v40 = vpop.f32.mrf.mxu3  ;;  %v1797_v8 = vpop.f32.mrf.mxu2 }
 0x275   :  { %v1675_v55 = vadd.f32 %v1674_v40, %v1622_v6  ;;  %v1798_v40 = vadd.f32 %v1797_v8, %v1747_v44 }
 0x276   :  { %2167 = vmatmul.f32.gmra.mxu1 %v4033_v63  ;;  %2134 = vmatmul.f32.gmra.mxu0 %v4056_v24 }
 0x277   :  { %v1720_v54 = vadd.f32 %v1719_v41, %v1675_v55  ;;  %v4131_v41 = vsub.f32 %v2507_v17, %v4124_v61 }
 0x279   :  { %v1765_v13 = vadd.f32 %v1764_v46, %v1720_v54  ;;  %v2564_v3 = vand.u32 4294901760, %v4131_v41 }
 0x27c   :  { %v1801_v5 = vpop.f32.mrf.mxu2  ;;  %v1834_v62 = vpop.f32.mrf.mxu3 }
 0x27d   :  { %v1802_v10 = vadd.f32 %v1801_v5, %v1753_v27  ;;  %v1835_v30 = vadd.f32 %v1834_v62, %v1798_v40  ;;  %v2485_v5 = vsub.f32 %v4419_v14, %v4118_v50  ;;  %v2503_v62 = vmul.f32 %v2495_v7, %v2487_v1 }
 0x27e   :  { %2171 = vmatmul.f32.gmra.mxu1 %v4056_v24 }
 0x27f   :  { %v2493_v8 = vmul.f32 0.5, %v2485_v5 }
 0x281   :  { %v2501_v55 = vmul.f32 %v2493_v8, %v2485_v5  ;;  %v2565_v5 = vsub.f32 %v4131_v41, %v2564_v3 }
 0x284   :  { %v1838_v20 = vpop.f32.mrf.mxu3  ;;  %v1805_v18 = vpop.f32.mrf.mxu2 }
 0x285   :  { %v1806_v11 = vadd.f32 %v1805_v18, %v1759_v38  ;;  %v1839_v47 = vadd.f32 %v1838_v20, %v1802_v10  ;;  %v2505_v18 = vmul.f32 %v2497_v25, %v2489_v31 }
 0x287   :  { %v4126_v42 = vand.u32 4294901760, %v2505_v18 }
 0x289   :  { %v4140_v35 = vsub.f32 %v2505_v18, %v4126_v42  ;;  %v2566_v18 = vand.u32 4294901760, %v2565_v5 }
 0x28c   :  { %v1842_v43 = vpop.f32.mrf.mxu3  ;;  %v1809_v33 = vpop.f32.mrf.mxu2 }
 0x28d   :  { %v1843_v58 = vadd.f32 %v1842_v43, %v1806_v11  ;;  %v1810_v29 = vadd.f32 %v1809_v33, %v1765_v13  ;;  %v4133_v11 = vand.u32 4294901760, %v2503_v62  ;;  %v4137_v43 = vand.u32 4294901760, %v2501_v55 }
 0x28e   :  { %v2570_v33 = vand.u32 4294901760, %v4140_v35 }
 0x28f   :  { %3051 = vtanh.f32 %v1843_v58  ;;  %v4147_v40 = vsub.f32 %v2503_v62, %v4133_v11  ;;  %v4151_v37 = vsub.f32 %v2501_v55, %v4137_v43 }
 0x290   :  { %3053 = vtanh.f32 %v1839_v47  ;;  %v2571_v7 = vsub.f32 %v4140_v35, %v2570_v33 }
 0x291   :  { %3055 = vtanh.f32 %v1835_v30  ;;  %v2576_v13 = vand.u32 4294901760, %v4147_v40  ;;  %v2582_v8 = vand.u32 4294901760, %v4151_v37 }
 0x294   :  { %v1846_v15 = vpop.f32.mrf.mxu3 }
 0x295   :  { %v1847_v20 = vadd.f32 %v1846_v15, %v1810_v29  ;;  %v3052_v6 = vpop.eup %3051 }
 0x296   :  { %v3054_v38 = vpop.eup %3053  ;;  %v4128_v27 = vand.u32 4294901760, %v3052_v6 }
 0x297   :  { %3057 = vtanh.f32 %v1847_v20  ;;  %v3056_v9 = vpop.eup %3055  ;;  %v4135_v44 = vand.u32 4294901760, %v3054_v38 }
 0x298   :  { %v2247_v31 = vsub.f32 %v3052_v6, %v4128_v27  ;;  %v4143_v54 = vand.u32 4294901760, %v3056_v9  ;;  %v2577_v6 = vsub.f32 %v4147_v40, %v2576_v13 }
 0x299   :  { %v2253_v46 = vsub.f32 %v3054_v38, %v4135_v44  ;;  %v2572_v38 = vand.u32 4294901760, %v2571_v7 }
 0x29a   :  { %v2259_v1 = vsub.f32 %v3056_v9, %v4143_v54  ;;  %v2248_v30 = vand.u32 4294901760, %v2247_v31  ;;  %v2583_v9 = vsub.f32 %v4151_v37, %v2582_v8 }
 0x29b   :  { %v2254_v25 = vand.u32 4294901760, %v2253_v46 }
 0x29c   :  { %v2249_v29 = vsub.f32 %v2247_v31, %v2248_v30  ;;  %v2260_v15 = vand.u32 4294901760, %v2259_v1 }
 0x29d   :  { %v3058_v10 = vpop.eup %3057  ;;  %v2255_v62 = vsub.f32 %v2253_v46, %v2254_v25 }
 0x29e   :  { %v2187_v58 = vand.u32 4294901760, %v3058_v10  ;;  %v2250_v55 = vand.u32 4294901760, %v2249_v29 }
 0x2a0   :  { %2188 = vmatpush.msrb.mxu2 %v2187_v58  ;;  %2339 = vmatpush.msra.mxu1 %v2187_v58  ;;  %v2241_v47 = vsub.f32 %v3058_v10, %v2187_v58  ;;  %v2261_v10 = vsub.f32 %v2259_v1, %v2260_v15 }
 0x2a2   :  { %2190 = vmatpush.msrb.mxu2 %v4128_v27  ;;  %2295 = vmatpush.msra.mxu0 %v2241_v47  ;;  %v2242_v14 = vand.u32 4294901760, %v2241_v47 }
 0x2a3   :  { %2341 = vmatpush.msra.mxu1 %v4128_v27 }
 0x2a4   :  { %2192 = vmatpush.msrb.mxu2 %v4135_v44  ;;  %2298 = vmatpush.msra.mxu0 %v2247_v31  ;;  %v2243_v17 = vsub.f32 %v2241_v47, %v2242_v14  ;;  %v2256_v31 = vand.u32 4294901760, %v2255_v62  ;;  %v2262_v47 = vand.u32 4294901760, %v2261_v10 }
 0x2a5   :  { %2343 = vmatpush.msra.mxu1 %v4135_v44 }
 0x2a6   :  { %2194 = vmatpush.msrb.mxu2 %v4143_v54  ;;  %2301 = vmatpush.msra.mxu0 %v2253_v46  ;;  %v2244_v20 = vand.u32 4294901760, %v2243_v17  ;;  %v2584_v46 = vand.u32 4294901760, %v2583_v9 }
 0x2a7   :  { %2345 = vmatpush.msra.mxu1 %v4143_v54  ;;  %2200 = vmatmul.f32.vlgmr.msrb.gmra.mxu2 %v4027_v56  ;;  %v2578_v56 = vand.u32 4294901760, %v2577_v6 }
 0x2a8   :  { %2386 = vmatpush.msra.mxu2 %v2242_v14  ;;  %2245 = vmatpush.msrb.mxu3 %v2244_v20 }
 0x2a9   :  { %2567 = vmatpush.msrb.mxu1 %v2566_v18  ;;  %2304 = vmatpush.msra.mxu0 %v2259_v1 }
 0x2aa   :  { %2390 = vmatpush.msra.mxu2 %v2248_v30  ;;  %2251 = vmatpush.msrb.mxu3 %v2250_v55 }
 0x2ab   :  { %2530 = vmatpush.msrb.mxu0 %v4124_v61  ;;  %2573 = vmatpush.msrb.mxu1 %v2572_v38 }
 0x2ac   :  { %2394 = vmatpush.msra.mxu2 %v2254_v25  ;;  %2257 = vmatpush.msrb.mxu3 %v2256_v31 }
 0x2ad   :  { %2532 = vmatpush.msrb.mxu0 %v4126_v42  ;;  %2579 = vmatpush.msrb.mxu1 %v2578_v56  ;;  %v2492_v56 = vsub.f32 %v3948_v22, %v4105_v53  ;;  %v2488_v22 = vsub.f32 %v3938_v23, %v4114_v12 }
 0x2ae   :  { %2398 = vmatpush.msra.mxu2 %v2260_v15  ;;  %2263 = vmatpush.msrb.mxu3 %v2262_v47 }
 0x2af   :  { %2534 = vmatpush.msrb.mxu0 %v4133_v11  ;;  %2585 = vmatpush.msrb.mxu1 %v2584_v46 }
 0x2b0   :  { %2625 = vmatpush.msrb.mxu2 %v4131_v41  ;;  %2265 = vmatmul.f32.vlgmr.msrb.gmra.mxu3 %v3994_v34 }
 0x2b1   :  { %2208 = vmatmul.f32.gmra.mxu2 %v4051_v28  ;;  %2429 = vmatpush.msra.mxu3 %v2187_v58 }
 0x2b2   :  { %2536 = vmatpush.msrb.mxu0 %v4137_v43  ;;  %2628 = vmatpush.msrb.mxu2 %v4140_v35 }
 0x2b3   :  { %2431 = vmatpush.msra.mxu3 %v4128_v27  ;;  %2307 = vmatmul.f32.vlgmr.msra.gmra.mxu0 %v4002_v57 }
 0x2b4   :  { %2631 = vmatpush.msrb.mxu2 %v4147_v40  ;;  %2349 = vmatmul.f32.vlgmr.msra.gmra.mxu1 %v4011_v19 }
 0x2b5   :  { %2433 = vmatpush.msra.mxu3 %v4135_v44 }
 0x2b6   :  { %2634 = vmatpush.msrb.mxu2 %v4151_v37 }
 0x2b7   :  { %2435 = vmatpush.msra.mxu3 %v4143_v54 }
 0x2b8   :  { %2269 = vmatmul.f32.gmra.mxu3 %v4013_v49 }
 0x2b9   :  { %2662 = vmatpush.msrb.mxu3 %v4124_v61  ;;  %2216 = vmatmul.f32.gmra.mxu2 %v4068_v60 }
 0x2bb   :  { %2664 = vmatpush.msrb.mxu3 %v4126_v42  ;;  %v1923_v28 = vpop.f32.mrf.mxu0  ;;  %2312 = vmatmul.f32.gmra.mxu0 %v4023_v52 }
 0x2bc   :  { %2355 = vmatmul.f32.gmra.mxu1 %v4031_v48 }
 0x2bd   :  { %2666 = vmatpush.msrb.mxu3 %v4133_v11 }
 0x2bf   :  { %2668 = vmatpush.msrb.mxu3 %v4137_v43 }
 0x2c0   :  { %2273 = vmatmul.f32.gmra.mxu3 %v4033_v63 }
 0x2c1   :  { %2224 = vmatmul.f32.gmra.mxu2 %v4081_v21 }
 0x2c3   :  { %v1931_v57 = vpop.f32.mrf.mxu0  ;;  %v1988_v19 = vpop.f32.mrf.mxu1  ;;  %2317 = vmatmul.f32.gmra.mxu0 %v4046_v45 }
 0x2c4   :  { %2361 = vmatmul.f32.gmra.mxu1 %v4054_v26  ;;  %v2030_v48 = vpop.f32.mrf.mxu2  ;;  %v2072_v45 = vpop.f32.mrf.mxu3  ;;  %v1932_v17 = vadd.f32 %v1931_v57, %v4102_v39 }
 0x2c8   :  { %2277 = vmatmul.f32.gmra.mxu3 %v4056_v24 }
 0x2c9   :  { %2400 = vmatmul.f32.vlgmr.msra.gmra.mxu2 %v3994_v34 }
 0x2cb   :  { %v1939_v52 = vpop.f32.mrf.mxu0  ;;  %v1992_v60 = vpop.f32.mrf.mxu1  ;;  %2322 = vmatmul.f32.gmra.mxu0 %v4063_v59 }
 0x2cc   :  { %2367 = vmatmul.f32.gmra.mxu1 %v4071_v4  ;;  %v2035_v44 = vpop.f32.mrf.mxu2  ;;  %v2078_v58 = vpop.f32.mrf.mxu3  ;;  %v1940_v59 = vadd.f32 %v1939_v52, %v4097_v51  ;;  %v1924_v4 = vadd.f32 %v1923_v28, %v4107_v32  ;;  %v1993_v15 = vadd.f32 %v1992_v60, %v1932_v17  ;;  %v2490_v28 = vsub.f32 %v3932_v16, %v4112_v36  ;;  %v2509_v60 = vld [vmem:[%s4367_s6] sm:$0x1]  ;;  %s3102_s6 = smov [#allocation3]  }
 0x2cd   :  { %s3011_s13 = sshll.u32 %s3102_s6, 4  ;;  %s3012_s13 = int_to_ptr.vmem [resolvable:$true] %s3011_s13 }
 0x2ce   :  { %v1989_v5 = vadd.f32 %v1988_v19, %v1924_v4  ;;  %v2036_v55 = vadd.f32 %v2035_v44, %v1993_v15  ;;  %v2498_v16 = vmul.f32 0.5, %v2490_v28 }
 0x2d0   :  { %2437 = vmatmul.f32.vlgmr.msra.gmra.mxu3 %v3994_v34  ;;  %v2031_v29 = vadd.f32 %v2030_v48, %v1989_v5  ;;  %v2079_v47 = vadd.f32 %v2078_v58, %v2036_v55  ;;  %v2500_v48 = vmul.f32 0.5, %v2492_v56  ;;  %v2496_v58 = vmul.f32 0.5, %v2488_v22 }
 0x2d1   :  { %2404 = vmatmul.f32.gmra.mxu2 %v4013_v49 }
 0x2d2   :  { %v2508_v36 = vmul.f32 %v2500_v48, %v2492_v56  ;;  %v2504_v5 = vmul.f32 %v2496_v58, %v2488_v22 }
 0x2d3   :  { %v1947_v21 = vpop.f32.mrf.mxu0  ;;  %v1996_v27 = vpop.f32.mrf.mxu1 }
 0x2d4   :  { %v2040_v34 = vpop.f32.mrf.mxu2  ;;  %v1997_v14 = vadd.f32 %v1996_v27, %v1940_v59  ;;  %v2084_v25 = vpop.f32.mrf.mxu3  ;;  %v4249_v15 = vand.u32 4294901760, %v2504_v5 }
 0x2d6   :  { %v2041_v7 = vadd.f32 %v2040_v34, %v1997_v14  ;;  %v4267_v56 = vsub.f32 %v2504_v5, %v4249_v15 }
 0x2d8   :  { %2441 = vmatmul.f32.gmra.mxu3 %v4013_v49  ;;  %v1948_v49 = vadd.f32 %v1947_v21, %v4093_v2  ;;  %v2085_v62 = vadd.f32 %v2084_v25, %v2041_v7  ;;  %v2813_v48 = vand.u32 4294901760, %v4267_v56 }
 0x2d9   :  { %2408 = vmatmul.f32.gmra.mxu2 %v4033_v63 }
 0x2db   :  { %v2000_v26 = vpop.f32.mrf.mxu1  ;;  %v2123_v54 = vpop.f32.mrf.mxu0 }
 0x2dc   :  { %v2001_v6 = vadd.f32 %v2000_v26, %v1948_v49  ;;  %v2045_v38 = vpop.f32.mrf.mxu2  ;;  %v2090_v46 = vpop.f32.mrf.mxu3  ;;  %v2486_v26 = vsub.f32 %v3943_v0, %v4118_v50 }
 0x2de   :  { %v2046_v10 = vadd.f32 %v2045_v38, %v2001_v6  ;;  %v2494_v23 = vmul.f32 0.5, %v2486_v26 }
 0x2e0   :  { %2445 = vmatmul.f32.gmra.mxu3 %v4033_v63  ;;  %v2073_v63 = vadd.f32 %v2072_v45, %v2031_v29  ;;  %v2091_v52 = vadd.f32 %v2090_v46, %v2046_v10  ;;  %v2519_v45 = vsel %vm2517_vm1, %v2509_v60, 0  ;;  %v2502_v49 = vmul.f32 %v2494_v23, %v2486_v26 }
 0x2e1   :  { %2412 = vmatmul.f32.gmra.mxu2 %v4056_v24  ;;  %v2814_v26 = vsub.f32 %v4267_v56, %v2813_v48 }
 0x2e2   :  { %v2124_v31 = vadd.f32 %v2123_v54, %v2073_v63  ;;  %v4229_v54 = vand.u32 4294901760, %v2519_v45  ;;  %v4261_v55 = vand.u32 4294901760, %v2502_v49 }
 0x2e3   :  { %v2127_v1 = vpop.f32.mrf.mxu0  ;;  %v2160_v30 = vpop.f32.mrf.mxu1 }
 0x2e4   :  { %v2161_v21 = vadd.f32 %v2160_v30, %v2124_v31  ;;  %v4231_v30 = vand.u32 4294901760, %v2508_v36  ;;  %v4236_v14 = vsub.f32 %v2519_v45, %v4229_v54 }
 0x2e6   :  { %v4241_v17 = vsub.f32 %v2508_v36, %v4231_v30  ;;  %v4247_v29 = vand.u32 4294901760, %v4236_v14 }
 0x2e8   :  { %2449 = vmatmul.f32.gmra.mxu3 %v4056_v24  ;;  %v2128_v24 = vadd.f32 %v2127_v1, %v2079_v47  ;;  %v2506_v1 = vmul.f32 %v2498_v16, %v2490_v28  ;;  %v2801_v38 = vand.u32 4294901760, %v4241_v17 }
 0x2ea   :  { %v4238_v25 = vand.u32 4294901760, %v2506_v1 }
 0x2eb   :  { %v2164_v18 = vpop.f32.mrf.mxu1  ;;  %v2131_v20 = vpop.f32.mrf.mxu0 }
 0x2ec   :  { %v2132_v9 = vadd.f32 %v2131_v20, %v2085_v62  ;;  %v2165_v53 = vadd.f32 %v2164_v18, %v2128_v24  ;;  %v4256_v62 = vsub.f32 %v2506_v1, %v4238_v25  ;;  %v2815_v1 = vand.u32 4294901760, %v2814_v26 }
 0x2ee   :  { %v2807_v28 = vand.u32 4294901760, %v4256_v62 }
 0x2f3   :  { %v2168_v57 = vpop.f32.mrf.mxu1  ;;  %v2135_v27 = vpop.f32.mrf.mxu0 }
 0x2f4   :  { %v2169_v19 = vadd.f32 %v2168_v57, %v2132_v9  ;;  %v2136_v44 = vadd.f32 %v2135_v27, %v2091_v52  ;;  %v2548_v9 = vsub.f32 %v4236_v14, %v4247_v29  ;;  %v2802_v57 = vsub.f32 %v4241_v17, %v2801_v38 }
 0x2f6   :  { %3059 = vtanh.f32 %v2169_v19  ;;  %v4280_v19 = vsub.f32 %v2502_v49, %v4261_v55  ;;  %v4283_v52 = vand.u32 4294901760, %v2548_v9  ;;  %v2803_v45 = vand.u32 4294901760, %v2802_v57 }
 0x2f7   :  { %3061 = vtanh.f32 %v2161_v21 }
 0x2f8   :  { %3063 = vtanh.f32 %v2165_v53  ;;  %v2808_v53 = vsub.f32 %v4256_v62, %v2807_v28  ;;  %v2819_v16 = vand.u32 4294901760, %v4280_v19 }
 0x2fb   :  { %v2172_v59 = vpop.f32.mrf.mxu1 }
 0x2fc   :  { %v3060_v4 = vpop.eup %3059  ;;  %v2173_v34 = vadd.f32 %v2172_v59, %v2136_v44 }
 0x2fd   :  { %v4233_v12 = vand.u32 4294901760, %v3060_v4  ;;  %v3062_v0 = vpop.eup %3061 }
 0x2fe   :  { %3065 = vtanh.f32 %v2173_v34  ;;  %v3064_v50 = vpop.eup %3063  ;;  %v4253_v20 = vand.u32 4294901760, %v3062_v0  ;;  %v2820_v34 = vsub.f32 %v4280_v19, %v2819_v16 }
 0x2ff   :  { %v4244_v7 = vsub.f32 %v3060_v4, %v4233_v12  ;;  %v4251_v18 = vand.u32 4294901760, %v3064_v50  ;;  %v2809_v4 = vand.u32 4294901760, %v2808_v53 }
 0x300   :  { %v2605_v47 = vsub.f32 %v3062_v0, %v4253_v20  ;;  %v2821_v35 = vand.u32 4294901760, %v2820_v34 }
 0x301   :  { %v2594_v10 = vand.u32 4294901760, %v4244_v7  ;;  %v2599_v46 = vsub.f32 %v3064_v50, %v4251_v18 }
 0x302   :  { %v2606_v22 = vand.u32 4294901760, %v2605_v47 }
 0x303   :  { %v2595_v60 = vsub.f32 %v4244_v7, %v2594_v10  ;;  %v2600_v27 = vand.u32 4294901760, %v2599_v46 }
 0x304   :  { %v3066_v6 = vpop.eup %3065  ;;  %v2607_v59 = vsub.f32 %v2605_v47, %v2606_v22 }
 0x305   :  { %v4258_v63 = vand.u32 4294901760, %v3066_v6  ;;  %v2596_v36 = vand.u32 4294901760, %v2595_v60  ;;  %v2601_v58 = vsub.f32 %v2599_v46, %v2600_v27 }
 0x307   :  { %2538 = vmatpush.msrb.mxu0 %v4258_v63  ;;  %2670 = vmatpush.msrb.mxu3 %v4258_v63  ;;  %v2587_v31 = vsub.f32 %v3066_v6, %v4258_v63  ;;  %v2602_v41 = vand.u32 4294901760, %v2601_v58 }
 0x309   :  { %2540 = vmatpush.msrb.mxu0 %v4233_v12  ;;  %2637 = vmatpush.msrb.mxu2 %v2587_v31  ;;  %v2588_v24 = vand.u32 4294901760, %v2587_v31 }
 0x30a   :  { %2672 = vmatpush.msrb.mxu3 %v4233_v12 }
 0x30b   :  { %2542 = vmatpush.msrb.mxu0 %v4251_v18  ;;  %2640 = vmatpush.msrb.mxu2 %v4244_v7  ;;  %v2589_v21 = vsub.f32 %v2587_v31, %v2588_v24 }
 0x30c   :  { %2674 = vmatpush.msrb.mxu3 %v4251_v18 }
 0x30d   :  { %2544 = vmatpush.msrb.mxu0 %v4253_v20  ;;  %2643 = vmatpush.msrb.mxu2 %v2599_v46  ;;  %v2590_v44 = vand.u32 4294901760, %v2589_v21 }
 0x30e   :  { %2676 = vmatpush.msrb.mxu3 %v4253_v20  ;;  %2550 = vmatmul.f32.vlgmr.msrb.gmra.mxu0 %v4283_v52 }
 0x30f   :  { %2695 = vmatpush.msra.mxu0 %v2564_v3  ;;  %2591 = vmatpush.msrb.mxu1 %v2590_v44  ;;  %v2608_v3 = vand.u32 4294901760, %v2607_v59 }
 0x310   :  { %2804 = vmatpush.msra.mxu3 %v2803_v45  ;;  %2646 = vmatpush.msrb.mxu2 %v2605_v47 }
 0x311   :  { %2699 = vmatpush.msra.mxu0 %v2570_v33  ;;  %2597 = vmatpush.msrb.mxu1 %v2596_v36 }
 0x312   :  { %2767 = vmatpush.msra.mxu2 %v4231_v30  ;;  %2810 = vmatpush.msra.mxu3 %v2809_v4 }
 0x313   :  { %2649 = vmatmul.f32.vlgmr.msrb.gmra.mxu2 %v4236_v14  ;;  %2703 = vmatpush.msra.mxu0 %v2576_v13 }
 0x314   :  { %2769 = vmatpush.msra.mxu2 %v4238_v25  ;;  %2816 = vmatpush.msra.mxu3 %v2815_v1 }
 0x315   :  { %2603 = vmatpush.msrb.mxu1 %v2602_v41  ;;  %2680 = vmatmul.f32.vlgmr.msrb.gmra.mxu3 %v4247_v29 }
 0x316   :  { %2707 = vmatpush.msra.mxu0 %v2582_v8  ;;  %2771 = vmatpush.msra.mxu2 %v4249_v15 }
 0x317   :  { %2822 = vmatpush.msra.mxu3 %v2821_v35  ;;  %2609 = vmatpush.msrb.mxu1 %v2608_v3 }
 0x318   :  { %2611 = vmatmul.f32.vlgmr.msrb.gmra.mxu1 %v4229_v54  ;;  %2711 = vmatpush.msra.mxu0 %v2588_v24 }
 0x319   :  { %2738 = vmatpush.msra.mxu1 %v4124_v61  ;;  %2773 = vmatpush.msra.mxu2 %v4261_v55 }
 0x31a   :  { %2715 = vmatpush.msra.mxu0 %v2594_v10 }
 0x31b   :  { %2740 = vmatpush.msra.mxu1 %v4126_v42 }
 0x31c   :  { %2719 = vmatpush.msra.mxu0 %v2600_v27 }
 0x31d   :  { %2742 = vmatpush.msra.mxu1 %v4133_v11 }
 0x31e   :  { %2723 = vmatpush.msra.mxu0 %v2606_v22 }
 0x31f   :  { %2744 = vmatpush.msra.mxu1 %v4137_v43  ;;  %2725 = vmatmul.f32.vlgmr.msra.gmra.mxu0 %v4229_v54 }
 0x320   :  { %2862 = vmatpush.msrb.mxu0 %v4241_v17 }
 0x321   :  { %2746 = vmatpush.msra.mxu1 %v4258_v63 }
 0x322   :  { %2865 = vmatpush.msrb.mxu0 %v4256_v62  ;;  %v2514_v62 = vpop.permute.xlu0 %2513 }
 0x323   :  { %2748 = vmatpush.msra.mxu1 %v4233_v12 }
 0x324   :  { %2868 = vmatpush.msrb.mxu0 %v4267_v56  ;;  %v2516_v56 = vperm.slane %v2514_v62, 0 }
 0x325   :  { %2750 = vmatpush.msra.mxu1 %v4251_v18 }
 0x326   :  { %2871 = vmatpush.msrb.mxu0 %v4280_v19 }
 0x327   :  { %2752 = vmatpush.msra.mxu1 %v4253_v20 }
 0x328   :  { %2754 = vmatmul.f32.vlgmr.msra.gmra.mxu1 %v4229_v54 }
 0x329   :  { %2899 = vmatpush.msrb.mxu1 %v4231_v30 }
 0x32a   :  { %v2201_v61 = vpop.f32.mrf.mxu2 }
 0x32b   :  { %2901 = vmatpush.msrb.mxu1 %v4238_v25  ;;  %v2202_v18 = vadd.f32 %v2201_v61, %v4107_v32 }
 0x32d   :  { %2903 = vmatpush.msrb.mxu1 %v4249_v15 }
 0x32f   :  { %2905 = vmatpush.msrb.mxu1 %v4261_v55 }
 0x330   :  { %v2308_v37 = vpop.f32.mrf.mxu0 }
 0x331   :  { %v2350_v8 = vpop.f32.mrf.mxu1 }
 0x333   :  { %v2266_v42 = vpop.f32.mrf.mxu3 }
 0x334   :  { %v2209_v11 = vpop.f32.mrf.mxu2  ;;  %v2267_v10 = vadd.f32 %v2266_v42, %v2202_v18 }
 0x335   :  { %v2210_v20 = vadd.f32 %v2209_v11, %v4102_v39 }
 0x336   :  { %v2309_v60 = vadd.f32 %v2308_v37, %v2267_v10 }
 0x338   :  { %v2313_v5 = vpop.f32.mrf.mxu0  ;;  %v2351_v45 = vadd.f32 %v2350_v8, %v2309_v60 }
 0x339   :  { %v2356_v0 = vpop.f32.mrf.mxu1 }
 0x33b   :  { %v2270_v40 = vpop.f32.mrf.mxu3 }
 0x33c   :  { %v2217_v43 = vpop.f32.mrf.mxu2  ;;  %v2271_v63 = vadd.f32 %v2270_v40, %v2210_v20 }
 0x33d   :  { %v2218_v7 = vadd.f32 %v2217_v43, %v4097_v51 }
 0x33e   :  { %v2314_v47 = vadd.f32 %v2313_v5, %v2271_v63 }
 0x340   :  { %v2318_v6 = vpop.f32.mrf.mxu0  ;;  %v2357_v27 = vadd.f32 %v2356_v0, %v2314_v47 }
 0x341   :  { %v2362_v31 = vpop.f32.mrf.mxu1 }
 0x343   :  { %v2274_v13 = vpop.f32.mrf.mxu3 }
 0x344   :  { %v2225_v33 = vpop.f32.mrf.mxu2  ;;  %v2275_v9 = vadd.f32 %v2274_v13, %v2218_v7 }
 0x345   :  { %v2226_v21 = vadd.f32 %v2225_v33, %v4093_v2 }
 0x346   :  { %v2319_v57 = vadd.f32 %v2318_v6, %v2275_v9 }
 0x348   :  { %v2363_v53 = vadd.f32 %v2362_v31, %v2319_v57  ;;  %v2323_v51 = vpop.f32.mrf.mxu0 }
 0x349   :  { %v2368_v4 = vpop.f32.mrf.mxu1 }
 0x34b   :  { %v2278_v23 = vpop.f32.mrf.mxu3 }
 0x34c   :  { %v2401_v12 = vpop.f32.mrf.mxu2  ;;  %v2279_v22 = vadd.f32 %v2278_v23, %v2226_v21 }
 0x34d   :  { %v2402_v36 = vadd.f32 %v2401_v12, %v2351_v45 }
 0x34e   :  { %v2324_v58 = vadd.f32 %v2323_v51, %v2279_v22  ;;  %v3001_v22 = vlaneseq }
 0x350   :  { %v2369_v41 = vadd.f32 %v2368_v4, %v2324_v58  ;;  %vm3003_vm4 = vcmp.lt.s32.totalorder %v3001_v22, 256 }
 0x353   :  { %v2438_v49 = vpop.f32.mrf.mxu3 }
 0x354   :  { %v2405_v50 = vpop.f32.mrf.mxu2  ;;  %v2439_v34 = vadd.f32 %v2438_v49, %v2402_v36 }
 0x355   :  { %v2406_v32 = vadd.f32 %v2405_v50, %v2357_v27 }
 0x35b   :  { %v2442_v46 = vpop.f32.mrf.mxu3 }
 0x35c   :  { %v2409_v24 = vpop.f32.mrf.mxu2  ;;  %v2443_v26 = vadd.f32 %v2442_v46, %v2406_v32 }
 0x35d   :  { %v2410_v44 = vadd.f32 %v2409_v24, %v2363_v53 }
 0x363   :  { %v2446_v39 = vpop.f32.mrf.mxu3 }
 0x364   :  { %v2447_v59 = vadd.f32 %v2446_v39, %v2410_v44  ;;  %v2413_v1 = vpop.f32.mrf.mxu2 }
 0x365   :  { %v2414_v2 = vadd.f32 %v2413_v1, %v2369_v41 }
 0x366   :  { %3067 = vtanh.f32 %v2447_v59 }
 0x367   :  { %3069 = vtanh.f32 %v2443_v26 }
 0x368   :  { %3071 = vtanh.f32 %v2439_v34 }
 0x36b   :  { %v2450_v3 = vpop.f32.mrf.mxu3 }
 0x36c   :  { %v3068_v35 = vpop.eup %3067  ;;  %v2451_v61 = vadd.f32 %v2450_v3, %v2414_v2 }
 0x36d   :  { %v3070_v42 = vpop.eup %3069  ;;  %v2776_v11 = vand.u32 4294901760, %v3068_v35 }
 0x36e   :  { %3073 = vtanh.f32 %v2451_v61  ;;  %v3072_v43 = vpop.eup %3071  ;;  %v2778_v40 = vand.u32 4294901760, %v3070_v42 }
 0x36f   :  { %v2830_v37 = vsub.f32 %v3068_v35, %v2776_v11  ;;  %v2780_v33 = vand.u32 4294901760, %v3072_v43 }
 0x370   :  { %v2836_v23 = vsub.f32 %v3070_v42, %v2778_v40 }
 0x371   :  { %v2842_v5 = vsub.f32 %v3072_v43, %v2780_v33  ;;  %v2831_v0 = vand.u32 4294901760, %v2830_v37 }
 0x372   :  { %v2837_v49 = vand.u32 4294901760, %v2836_v23 }
 0x373   :  { %v2832_v18 = vsub.f32 %v2830_v37, %v2831_v0  ;;  %v2843_v20 = vand.u32 4294901760, %v2842_v5 }
 0x374   :  { %v3074_v13 = vpop.eup %3073  ;;  %v2838_v63 = vsub.f32 %v2836_v23, %v2837_v49 }
 0x375   :  { %v2774_v8 = vand.u32 4294901760, %v3074_v13  ;;  %v2833_v9 = vand.u32 4294901760, %v2832_v18  ;;  %v2844_v10 = vsub.f32 %v2842_v5, %v2843_v20 }
 0x376   :  { %v2839_v31 = vand.u32 4294901760, %v2838_v63 }
 0x377   :  { %2775 = vmatpush.msra.mxu2 %v2774_v8  ;;  %2907 = vmatpush.msrb.mxu1 %v2774_v8  ;;  %v2824_v12 = vsub.f32 %v3074_v13, %v2774_v8 }
 0x379   :  { %2777 = vmatpush.msra.mxu2 %v2776_v11  ;;  %2874 = vmatpush.msrb.mxu0 %v2824_v12  ;;  %v2825_v50 = vand.u32 4294901760, %v2824_v12 }
 0x37a   :  { %2909 = vmatpush.msrb.mxu1 %v2776_v11 }
 0x37b   :  { %2779 = vmatpush.msra.mxu2 %v2778_v40  ;;  %2877 = vmatpush.msrb.mxu0 %v2830_v37  ;;  %v2826_v7 = vsub.f32 %v2824_v12, %v2825_v50 }
 0x37c   :  { %2911 = vmatpush.msrb.mxu1 %v2778_v40 }
 0x37d   :  { %2781 = vmatpush.msra.mxu2 %v2780_v33  ;;  %2880 = vmatpush.msrb.mxu0 %v2836_v23  ;;  %v2827_v6 = vand.u32 4294901760, %v2826_v7 }
 0x37e   :  { %2913 = vmatpush.msrb.mxu1 %v2780_v33  ;;  %2787 = vmatmul.f32.vlgmr.msra.gmra.mxu2 %v4283_v52  ;;  %v2845_v52 = vand.u32 4294901760, %v2844_v10 }
 0x37f   :  { %2932 = vmatpush.msrb.mxu2 %v2801_v38  ;;  %2828 = vmatpush.msra.mxu3 %v2827_v6 }
 0x380   :  { %2883 = vmatpush.msrb.mxu0 %v2842_v5  ;;  %2917 = vmatmul.f32.vlgmr.msrb.gmra.mxu1 %v4247_v29 }
 0x381   :  { %2936 = vmatpush.msrb.mxu2 %v2807_v28  ;;  %2834 = vmatpush.msra.mxu3 %v2833_v9 }
 0x382   :  { %2886 = vmatmul.f32.vlgmr.msrb.gmra.mxu0 %v4236_v14 }
 0x383   :  { %2940 = vmatpush.msrb.mxu2 %v2813_v48  ;;  %2840 = vmatpush.msra.mxu3 %v2839_v31 }
 0x385   :  { %2944 = vmatpush.msrb.mxu2 %v2819_v16  ;;  %2846 = vmatpush.msra.mxu3 %v2845_v52 }
 0x386   :  { %2848 = vmatmul.f32.vlgmr.msra.gmra.mxu3 %v4229_v54 }
 0x387   :  { %2948 = vmatpush.msrb.mxu2 %v2825_v50  ;;  %2975 = vmatpush.msrb.mxu3 %v4231_v30 }
 0x389   :  { %2952 = vmatpush.msrb.mxu2 %v2831_v0  ;;  %2977 = vmatpush.msrb.mxu3 %v4238_v25 }
 0x38b   :  { %2956 = vmatpush.msrb.mxu2 %v2837_v49  ;;  %2979 = vmatpush.msrb.mxu3 %v4249_v15  ;;  %v2551_v14 = vpop.f32.mrf.mxu0 }
 0x38d   :  { %2960 = vmatpush.msrb.mxu2 %v2843_v20  ;;  %2981 = vmatpush.msrb.mxu3 %v4261_v55  ;;  %v2552_v55 = vadd.f32 %v2551_v14, %v2516_v56 }
 0x38e   :  { %2962 = vmatmul.f32.vlgmr.msrb.gmra.mxu2 %v4229_v54 }
 0x38f   :  { %2983 = vmatpush.msrb.mxu3 %v2774_v8 }
 0x391   :  { %2985 = vmatpush.msrb.mxu3 %v2776_v11 }
 0x393   :  { %2987 = vmatpush.msrb.mxu3 %v2778_v40 }
 0x395   :  { %2989 = vmatpush.msrb.mxu3 %v2780_v33  ;;  %v2612_v30 = vpop.f32.mrf.mxu1 }
 0x396   :  { %2991 = vmatmul.f32.vlgmr.msrb.gmra.mxu3 %v4229_v54  ;;  %v2650_v17 = vpop.f32.mrf.mxu2  ;;  %v2613_v46 = vadd.f32 %v2612_v30, %v2552_v55 }
 0x398   :  { %v2681_v29 = vpop.f32.mrf.mxu3  ;;  %v2651_v24 = vadd.f32 %v2650_v17, %v2613_v46 }
 0x39a   :  { %v2682_v21 = vadd.f32 %v2681_v29, %v2651_v24 }
 0x39c   :  { %v2726_v25 = vpop.f32.mrf.mxu0 }
 0x39d   :  { %v2727_v51 = vadd.f32 %v2726_v25, %v2682_v21 }
 0x3a5   :  { %v2755_v15 = vpop.f32.mrf.mxu1 }
 0x3a6   :  { %v2756_v32 = vadd.f32 %v2755_v15, %v2727_v51 }
 0x3fd   :  { %v2918_v57 = vpop.f32.mrf.mxu1 }
 0x3ff   :  { %v2887_v16 = vpop.f32.mrf.mxu0 }
 0x401   :  { %v2788_v38 = vpop.f32.mrf.mxu2 }
 0x402   :  { %v2789_v19 = vadd.f32 %v2788_v38, %v2516_v56 }
 0x409   :  { %v2849_v28 = vpop.f32.mrf.mxu3 }
 0x40a   :  { %v2850_v48 = vadd.f32 %v2849_v28, %v2789_v19 }
 0x40c   :  { %v2888_v47 = vadd.f32 %v2887_v16, %v2850_v48 }
 0x40e   :  { %v2919_v60 = vadd.f32 %v2918_v57, %v2888_v47 }
 0x411   :  { %v2963_v54 = vpop.f32.mrf.mxu2 }
 0x412   :  { %v2964_v27 = vadd.f32 %v2963_v54, %v2919_v60 }
 0x419   :  { %v2992_v53 = vpop.f32.mrf.mxu3 }
 0x41a   :  { %v2993_v45 = vadd.f32 %v2992_v53, %v2964_v27 }
 0x41c   :  { %v2997_v44 = vrot.slane %v2993_v45, 7 }
 0x41e   :  { %v2999_v39 = vsel %vm2998_vm3, %v2756_v32, %v2997_v44 }
 0x41f   :  { %3005 = vst.msk [vmem:[#allocation3] sm:$0x3] %vm3003_vm4, %v2999_v39 }
 0x420   :  { %3016 = dma.vmem_to_hbm [thread:$0]  %s3012_s13, 32, %s3014_s16, [#allocation4]  }
 0x421   :  { %3099 = dma.done.wait [#allocation4], 32  }
 0x422   :  { %3100 = vsyncadd [#allocation4], 4294967264 }
 0x423   :  { %3021 = vsyncpa [#allocation4], 1 }

// kernel: tpu_custom_call.1
= control target key start
LH: loop header
LB: loop body
LE: loop exit
PB: predicated region body
PF: predicated region fallthrough
CT: control target
= control target key end

     0   :  { %s4361_s0 = inlined_call_operand.vmem [shape: f32[24,256], index: 0, kind: input, shape index: {}]   ;;  %s4362_s1 = inlined_call_operand.vmem [shape: f32[96,24], index: 1, kind: input, shape index: {}]   ;;  %s4363_s2 = inlined_call_operand.vmem [shape: f32[32,32], index: 2, kind: input, shape index: {}]   ;;  %s4364_s3 = inlined_call_operand.vmem [shape: f32[32,1], index: 3, kind: input, shape index: {}]   ;;  %s4365_s4 = inlined_call_operand.vmem [shape: f32[32,32], index: 4, kind: input, shape index: {}]   ;;  %s4366_s5 = inlined_call_operand.vmem [shape: f32[32,1], index: 5, kind: input, shape index: {}]   ;;  %s4367_s6 = inlined_call_operand.vmem [shape: f32[1,64], index: 6, kind: input, shape index: {}]   ;;  %s4368_s7 = inlined_call_operand.<no memory space> [shape: f32[1,1], index: 7, kind: input, shape index: {}]   ;;  %s4369_s8 = inlined_call_operand.vmem [shape: f32[32,1], index: 8, kind: input, shape index: {}]   ;;  %s4370_s9 = inlined_call_operand.hbm [shape: f32[1,256], index: 9, kind: output, shape index: {}]  }
   0x1   :  { %v14_v0 = vstv %s4368_s7 }
   0x2   :  { %15 = vst [vmem:[#allocation2] sm:$0x1] %v14_v0 }
   0x3   :  { %v51_v1 = vld [vmem:[%s4361_s0 + $0x20] sm:$0xff]  ;;  %v49_v2 = vld [vmem:[%s4361_s0 + $0x10] sm:$0xff]  ;;  %vm53_vm0 = vcmask 195584   ;;  %v36_v8 = vld [vmem:[%s4362_s1 + $0x8] sm:$0xff] }
   0x4   :  { %v47_v3 = vld [vmem:[%s4361_s0] sm:$0xff]  ;;  %v3165_v4 = vand.u32 4294901760, %v51_v1  ;;  %v3167_v5 = vand.u32 4294901760, %v49_v2  ;;  %v37_v9 = vld [vmem:[%s4362_s1 + $0x10] sm:$0xff]  ;;  %v58_v11 = vsel %vm53_vm0, %v36_v8, 0 }
   0x5   :  { %v3169_v6 = vand.u32 4294901760, %v47_v3  ;;  %v35_v7 = vld [vmem:[%s4362_s1] sm:$0xff] }
   0x6   :  { %v55_v10 = vsel %vm53_vm0, %v35_v7, 0  ;;  %104 = vmatpush.msra.mxu0 %v3165_v4  ;;  %v220_v12 = vsub.f32 %v51_v1, %v3165_v4  ;;  %383 = vmatpush.msra.mxu3 %v3165_v4  ;;  %v226_v13 = vsub.f32 %v49_v2, %v3167_v5 }
   0x7   :  { %v232_v14 = vsub.f32 %v47_v3, %v3169_v6  ;;  %v3187_v15 = vand.u32 4294901760, %v55_v10 }
   0x8   :  { %16 = vsyncpa [#allocation4], 0  ;;  %v3189_v16 = vand.u32 4294901760, %v58_v11  ;;  %v61_v17 = vsel %vm53_vm0, %v37_v9, 0  ;;  %301 = vmatpush.msra.mxu2 %v220_v12  ;;  %106 = vmatpush.msra.mxu0 %v3167_v5  ;;  %v221_v18 = vand.u32 4294901760, %v220_v12  ;;  %v227_v20 = vand.u32 4294901760, %v226_v13 }
   0x9   :  { %v3194_v19 = vsub.f32 %v55_v10, %v3187_v15  ;;  %v233_v21 = vand.u32 4294901760, %v232_v14  ;;  %v52_v22 = vld [vmem:[%s4361_s0 + $0x28] sm:$0xff]  ;;  %385 = vmatpush.msra.mxu3 %v3167_v5  ;;  %v3210_v29 = vand.u32 4294901760, %v61_v17  ;;  %v38_v38 = vld [vmem:[%s4362_s1 + $0x18] sm:$0xff]  ;;  %v39_v47 = vld [vmem:[%s4362_s1 + $0x20] sm:$0xff]  ;;  %vm1280_vm1 = vcmask 261120  }
   0xa   :  { %v3201_v23 = vsub.f32 %v58_v11, %v3189_v16  ;;  %v3203_v24 = vand.u32 4294901760, %v52_v22  ;;  %304 = vmatpush.msra.mxu2 %v226_v13  ;;  %108 = vmatpush.msra.mxu0 %v3169_v6  ;;  %v222_v25 = vsub.f32 %v220_v12, %v221_v18  ;;  %v228_v27 = vsub.f32 %v226_v13, %v227_v20  ;;  %v40_v54 = vld [vmem:[%s4362_s1 + $0x28] sm:$0xff]  ;;  %v41_v61 = vld [vmem:[%s4362_s1 + $0x30] sm:$0xff]  ;;  %v50_v0 = vld [vmem:[%s4361_s0 + $0x18] sm:$0xff]  ;;  %s3013_s16 = sshll.u32 %s4370_s9, 4  ;;  %s3014_s16 = int_to_ptr.hbm [resolvable:$true] %s3013_s16 }
   0xb   :  { %v3207_v26 = vand.u32 4294901760, %v3194_v19  ;;  %v234_v28 = vsub.f32 %v232_v14, %v233_v21  ;;  %387 = vmatpush.msra.mxu3 %v3169_v6  ;;  %v3236_v41 = vsub.f32 %v61_v17, %v3210_v29  ;;  %v64_v42 = vsel %vm53_vm0, %v38_v38, 0  ;;  %v42_v8 = vld [vmem:[%s4362_s1 + $0x38] sm:$0xff] }
   0xc   :  { %477 = vmatpush.msrb.mxu0 %v221_v18  ;;  %v3213_v30 = vsub.f32 %v52_v22, %v3203_v24  ;;  %v223_v31 = vand.u32 4294901760, %v222_v25  ;;  %307 = vmatpush.msra.mxu2 %v232_v14  ;;  %v229_v33 = vand.u32 4294901760, %v228_v27  ;;  %v3219_v34 = vand.u32 4294901760, %v3201_v23 }
   0xd   :  { %v112_v32 = vsub.f32 %v3194_v19, %v3207_v26  ;;  %391 = vmatmul.f32.vlgmr.msra.gmra.mxu3 %v3207_v26  ;;  %310 = vmatmul.f32.vlgmr.msra.gmra.mxu2 %v3194_v19  ;;  %v235_v37 = vand.u32 4294901760, %v234_v28  ;;  %v3245_v45 = vand.u32 4294901760, %v3236_v41  ;;  %v3247_v46 = vand.u32 4294901760, %v64_v42 }
   0xe   :  { %v734_v35 = vand.u32 4294901760, %v3213_v30  ;;  %481 = vmatpush.msrb.mxu0 %v227_v20  ;;  %224 = vmatpush.msra.mxu1 %v223_v31  ;;  %v120_v40 = vsub.f32 %v3201_v23, %v3219_v34  ;;  %v67_v50 = vsel %vm53_vm0, %v39_v47, 0  ;;  %v70_v57 = vsel %vm53_vm0, %v40_v54, 0  ;;  %v43_v20 = vld [vmem:[%s4362_s1 + $0x40] sm:$0xff] }
   0xf   :  { %v3223_v36 = vand.u32 4294901760, %v112_v32  ;;  %617 = vmatpush.msrb.mxu2 %v3203_v24  ;;  %v128_v48 = vsub.f32 %v3236_v41, %v3245_v45  ;;  %v3259_v49 = vsub.f32 %v64_v42, %v3247_v46  ;;  %v3271_v53 = vand.u32 4294901760, %v67_v50  ;;  %v44_v32 = vld [vmem:[%s4362_s1 + $0x48] sm:$0xff] }
  0x10   :  { %v735_v39 = vsub.f32 %v3213_v30, %v734_v35  ;;  %485 = vmatpush.msrb.mxu0 %v233_v21  ;;  %230 = vmatpush.msra.mxu1 %v229_v33  ;;  %v3241_v44 = vand.u32 4294901760, %v120_v40  ;;  %v3291_v60 = vand.u32 4294901760, %v70_v57  ;;  %v73_v1 = vsel %vm53_vm0, %v41_v61, 0 }
  0x11   :  { %114 = vmatmul.f32.vlgmr.msra.gmra.mxu0 %v3223_v36  ;;  %v3265_v51 = vand.u32 4294901760, %v128_v48  ;;  %v3269_v52 = vand.u32 4294901760, %v3259_v49  ;;  %v3281_v56 = vsub.f32 %v67_v50, %v3271_v53  ;;  %v3307_v2 = vand.u32 4294901760, %v50_v0  ;;  %v45_v48 = vld [vmem:[%s4362_s1 + $0x50] sm:$0xff] }
  0x12   :  { %v736_v43 = vand.u32 4294901760, %v735_v39  ;;  %814 = vmatpush.msra.mxu0 %v3213_v30  ;;  %236 = vmatpush.msra.mxu1 %v235_v37  ;;  %v3301_v63 = vsub.f32 %v70_v57, %v3291_v60  ;;  %v76_v12 = vsel %vm53_vm0, %v42_v8, 0  ;;  %v79_v25 = vsel %vm53_vm0, %v43_v20, 0 }
  0x13   :  { %238 = vmatmul.f32.vlgmr.msra.gmra.mxu1 %v3187_v15  ;;  %v136_v55 = vsub.f32 %v3259_v49, %v3269_v52  ;;  %v3289_v59 = vand.u32 4294901760, %v3281_v56  ;;  %619 = vmatpush.msrb.mxu2 %v3307_v2  ;;  %v739_v3 = vsub.f32 %v50_v0, %v3307_v2  ;;  %v3339_v18 = vand.u32 4294901760, %v76_v12 }
  0x14   :  { %737 = vmatpush.msrb.mxu3 %v736_v43  ;;  %549 = vmatpush.msrb.mxu1 %v3165_v4  ;;  %v3359_v31 = vand.u32 4294901760, %v79_v25  ;;  %v82_v38 = vsel %vm53_vm0, %v44_v32, 0  ;;  %v48_v43 = vld [vmem:[%s4361_s0 + $0x8] sm:$0xff]  ;;  %v85_v57 = vsel %vm53_vm0, %v45_v48, 0 }
  0x15   :  { %397 = vmatmul.f32.gmra.mxu3 %v3219_v34  ;;  %315 = vmatmul.f32.gmra.mxu2 %v3201_v23  ;;  %v3285_v58 = vand.u32 4294901760, %v136_v55  ;;  %v144_v62 = vsub.f32 %v3281_v56, %v3289_v59  ;;  %v740_v7 = vand.u32 4294901760, %v739_v3  ;;  %v3349_v22 = vsub.f32 %v76_v12, %v3339_v18 }
  0x16   :  { %551 = vmatpush.msrb.mxu1 %v3167_v5  ;;  %v3316_v5 = vand.u32 4294901760, %v3301_v63  ;;  %817 = vmatpush.msra.mxu0 %v739_v3  ;;  %v3369_v37 = vsub.f32 %v79_v25, %v3359_v31  ;;  %v3379_v42 = vand.u32 4294901760, %v82_v38  ;;  %v620_v47 = vand.u32 4294901760, %v48_v43 }
  0x17   :  { %v3312_v4 = vand.u32 4294901760, %v144_v62  ;;  %v741_v9 = vsub.f32 %v739_v3, %v740_v7  ;;  %v3357_v28 = vand.u32 4294901760, %v3349_v22  ;;  %v3404_v3 = vand.u32 4294901760, %v85_v57 }
  0x18   :  { %553 = vmatpush.msrb.mxu1 %v3169_v6  ;;  %v3318_v6 = vand.u32 4294901760, %v73_v1  ;;  %v152_v10 = vsub.f32 %v3301_v63, %v3316_v5  ;;  %v3377_v40 = vand.u32 4294901760, %v3369_v37  ;;  %621 = vmatpush.msrb.mxu2 %v620_v47  ;;  %v745_v50 = vsub.f32 %v48_v43, %v620_v47 }
  0x19   :  { %122 = vmatmul.f32.gmra.mxu0 %v3241_v44  ;;  %v742_v13 = vand.u32 4294901760, %v741_v9  ;;  %v168_v33 = vsub.f32 %v3349_v22, %v3357_v28  ;;  %v3392_v55 = vsub.f32 %v82_v38, %v3379_v42  ;;  %v3414_v8 = vsub.f32 %v85_v57, %v3404_v3 }
  0x1a   :  { %896 = vmatpush.msra.mxu1 %v3203_v24  ;;  %v3329_v11 = vsub.f32 %v73_v1, %v3318_v6  ;;  %v3333_v14 = vand.u32 4294901760, %v152_v10  ;;  %v176_v54 = vsub.f32 %v3369_v37, %v3377_v40  ;;  %990 = vmatpush.msra.mxu2 %v734_v35  ;;  %v746_v61 = vand.u32 4294901760, %v745_v50  ;;  %v46_v35 = vld [vmem:[%s4362_s1 + $0x58] sm:$0xff] }
  0x1b   :  { %242 = vmatmul.f32.gmra.mxu1 %v3189_v16  ;;  %743 = vmatpush.msrb.mxu3 %v742_v13  ;;  %v3373_v39 = vand.u32 4294901760, %v168_v33  ;;  %v3402_v1 = vand.u32 4294901760, %v3392_v55  ;;  %v88_v9 = vsel %vm53_vm0, %v46_v35, 0  ;;  %v3424_v12 = vand.u32 4294901760, %v3414_v8 }
  0x1c   :  { %898 = vmatpush.msra.mxu1 %v3307_v2  ;;  %v3337_v17 = vand.u32 4294901760, %v3329_v11  ;;  %820 = vmatpush.msra.mxu0 %v745_v50  ;;  %v747_v62 = vsub.f32 %v745_v50, %v746_v61  ;;  %v3398_v0 = vand.u32 4294901760, %v176_v54  ;;  %v3426_v13 = vand.u32 4294901760, %v88_v9 }
  0x1d   :  { %403 = vmatmul.f32.gmra.mxu3 %v3245_v45  ;;  %320 = vmatmul.f32.gmra.mxu2 %v3236_v41 }
  0x1e   :  { %v160_v21 = vsub.f32 %v3329_v11, %v3337_v17  ;;  %900 = vmatpush.msra.mxu1 %v620_v47  ;;  %994 = vmatpush.msra.mxu2 %v740_v7  ;;  %v748_v30 = vand.u32 4294901760, %v747_v62  ;;  %v184_v7 = vsub.f32 %v3392_v55, %v3402_v1 }
  0x20   :  { %v3353_v27 = vand.u32 4294901760, %v160_v21  ;;  %998 = vmatpush.msra.mxu2 %v746_v61  ;;  %749 = vmatpush.msrb.mxu3 %v748_v30  ;;  %v3420_v10 = vand.u32 4294901760, %v184_v7 }
  0x21   :  { %130 = vmatmul.f32.gmra.mxu0 %v3265_v51 }
  0x22   :  { %1062 = vmatpush.msra.mxu3 %v3203_v24  ;;  %v192_v24 = vsub.f32 %v3414_v8, %v3424_v12 }
  0x23   :  { %246 = vmatmul.f32.gmra.mxu1 %v3210_v29 }
  0x24   :  { %1064 = vmatpush.msra.mxu3 %v3307_v2  ;;  %v3433_v2 = vsub.f32 %v88_v9, %v3426_v13  ;;  %v3436_v20 = vand.u32 4294901760, %v192_v24 }
  0x25   :  { %409 = vmatmul.f32.gmra.mxu3 %v3269_v52  ;;  %325 = vmatmul.f32.gmra.mxu2 %v3259_v49 }
  0x26   :  { %1066 = vmatpush.msra.mxu3 %v620_v47  ;;  %v3440_v21 = vand.u32 4294901760, %v3433_v2 }
  0x28   :  { %v200_v25 = vsub.f32 %v3433_v2, %v3440_v21 }
  0x29   :  { %138 = vmatmul.f32.gmra.mxu0 %v3285_v58 }
  0x2a   :  { %v3447_v32 = vand.u32 4294901760, %v200_v25 }
  0x2b   :  { %250 = vmatmul.f32.gmra.mxu1 %v3247_v46 }
  0x2d   :  { %415 = vmatmul.f32.gmra.mxu3 %v3289_v59  ;;  %330 = vmatmul.f32.gmra.mxu2 %v3281_v56 }
  0x31   :  { %146 = vmatmul.f32.gmra.mxu0 %v3312_v4 }
  0x33   :  { %254 = vmatmul.f32.gmra.mxu1 %v3271_v53 }
  0x35   :  { %421 = vmatmul.f32.gmra.mxu3 %v3316_v5  ;;  %335 = vmatmul.f32.gmra.mxu2 %v3301_v63 }
  0x39   :  { %154 = vmatmul.f32.gmra.mxu0 %v3333_v14 }
  0x3b   :  { %258 = vmatmul.f32.gmra.mxu1 %v3291_v60 }
  0x3d   :  { %427 = vmatmul.f32.gmra.mxu3 %v3337_v17  ;;  %340 = vmatmul.f32.gmra.mxu2 %v3329_v11 }
  0x41   :  { %162 = vmatmul.f32.gmra.mxu0 %v3353_v27 }
  0x43   :  { %262 = vmatmul.f32.gmra.mxu1 %v3318_v6 }
  0x45   :  { %433 = vmatmul.f32.gmra.mxu3 %v3357_v28  ;;  %345 = vmatmul.f32.gmra.mxu2 %v3349_v22 }
  0x49   :  { %170 = vmatmul.f32.gmra.mxu0 %v3373_v39 }
  0x4b   :  { %266 = vmatmul.f32.gmra.mxu1 %v3339_v18 }
  0x4d   :  { %439 = vmatmul.f32.gmra.mxu3 %v3377_v40  ;;  %350 = vmatmul.f32.gmra.mxu2 %v3369_v37 }
  0x51   :  { %178 = vmatmul.f32.gmra.mxu0 %v3398_v0 }
  0x53   :  { %270 = vmatmul.f32.gmra.mxu1 %v3359_v31 }
  0x55   :  { %445 = vmatmul.f32.gmra.mxu3 %v3402_v1  ;;  %355 = vmatmul.f32.gmra.mxu2 %v3392_v55 }
  0x59   :  { %186 = vmatmul.f32.gmra.mxu0 %v3420_v10 }
  0x5b   :  { %274 = vmatmul.f32.gmra.mxu1 %v3379_v42 }
  0x5d   :  { %451 = vmatmul.f32.gmra.mxu3 %v3424_v12  ;;  %360 = vmatmul.f32.gmra.mxu2 %v3414_v8 }
  0x61   :  { %194 = vmatmul.f32.gmra.mxu0 %v3436_v20 }
  0x63   :  { %278 = vmatmul.f32.gmra.mxu1 %v3404_v3 }
  0x65   :  { %457 = vmatmul.f32.gmra.mxu3 %v3440_v21  ;;  %365 = vmatmul.f32.gmra.mxu2 %v3433_v2 }
  0x69   :  { %202 = vmatmul.f32.gmra.mxu0 %v3447_v32 }
  0x6b   :  { %282 = vmatmul.f32.gmra.mxu1 %v3426_v13 }
  0x6d   :  { %751 = vmatmul.f32.vlgmr.msrb.gmra.mxu3 %v3187_v15  ;;  %627 = vmatmul.f32.vlgmr.msrb.gmra.mxu2 %v3223_v36 }
  0x71   :  { %487 = vmatmul.f32.vlgmr.msrb.gmra.mxu0 %v3187_v15 }
  0x73   :  { %555 = vmatmul.f32.vlgmr.msrb.gmra.mxu1 %v3187_v15 }
  0x75   :  { %755 = vmatmul.f32.gmra.mxu3 %v3189_v16  ;;  %635 = vmatmul.f32.gmra.mxu2 %v3241_v44 }
  0x79   :  { %491 = vmatmul.f32.gmra.mxu0 %v3189_v16 }
  0x7b   :  { %559 = vmatmul.f32.gmra.mxu1 %v3189_v16 }
  0x7d   :  { %759 = vmatmul.f32.gmra.mxu3 %v3210_v29  ;;  %643 = vmatmul.f32.gmra.mxu2 %v3265_v51 }
  0x81   :  { %495 = vmatmul.f32.gmra.mxu0 %v3210_v29 }
  0x83   :  { %563 = vmatmul.f32.gmra.mxu1 %v3210_v29 }
  0x85   :  { %763 = vmatmul.f32.gmra.mxu3 %v3247_v46  ;;  %651 = vmatmul.f32.gmra.mxu2 %v3285_v58 }
  0x89   :  { %499 = vmatmul.f32.gmra.mxu0 %v3247_v46 }
  0x8b   :  { %567 = vmatmul.f32.gmra.mxu1 %v3247_v46 }
  0x8d   :  { %767 = vmatmul.f32.gmra.mxu3 %v3271_v53  ;;  %659 = vmatmul.f32.gmra.mxu2 %v3312_v4 }
  0x8e   :  { %v115_v36 = vpop.f32.mrf.mxu0 }
  0x90   :  { %v392_v44 = vpop.f32.mrf.mxu3  ;;  %v239_v51 = vpop.f32.mrf.mxu1 }
  0x91   :  { %503 = vmatmul.f32.gmra.mxu0 %v3271_v53  ;;  %v311_v33 = vpop.f32.mrf.mxu2  ;;  %v240_v38 = vadd.f32 %v239_v51, %v115_v36 }
  0x93   :  { %v312_v43 = vadd.f32 %v311_v33, %v240_v38  ;;  %571 = vmatmul.f32.gmra.mxu1 %v3271_v53  ;;  %v3101_v33 = vmov 0   ;;  %v1257_v38 = vld [vmem:[%s4364_s3 + $0x8] sm:$0xff] }
  0x94   :  { %3025 = vset.pattern.permute.xlu1 %v3101_v33  ;;  %3024 = vset.pattern.permute.xlu0 %v3101_v33 }
  0x95   :  { %771 = vmatmul.f32.gmra.mxu3 %v3291_v60  ;;  %v3474_v58 = vadd.f32 %v392_v44, %v312_v43  ;;  %667 = vmatmul.f32.gmra.mxu2 %v3333_v14 }
  0x96   :  { %v123_v47 = vpop.f32.mrf.mxu0  ;;  %1267 = vperm.xlu1 %3025, %v1257_v38   ;;  %3026 = vset.pattern.permute.xlu2 %v3101_v33 }
  0x98   :  { %v398_v48 = vpop.f32.mrf.mxu3  ;;  %v243_v4 = vpop.f32.mrf.mxu1 }
  0x99   :  { %507 = vmatmul.f32.gmra.mxu0 %v3291_v60  ;;  %v316_v50 = vpop.f32.mrf.mxu2  ;;  %v244_v54 = vadd.f32 %v243_v4, %v123_v47 }
  0x9b   :  { %v317_v57 = vadd.f32 %v316_v50, %v244_v54  ;;  %575 = vmatmul.f32.gmra.mxu1 %v3291_v60 }
  0x9d   :  { %775 = vmatmul.f32.gmra.mxu3 %v3318_v6  ;;  %v3480_v61 = vadd.f32 %v398_v48, %v317_v57  ;;  %675 = vmatmul.f32.gmra.mxu2 %v3353_v27  ;;  %v1259_v57 = vld [vmem:[%s4364_s3 + $0x18] sm:$0xff] }
  0x9e   :  { %v131_v62 = vpop.f32.mrf.mxu0  ;;  %1277 = vperm.xlu0 %3024, %v1259_v57  }
  0xa0   :  { %v404_v30 = vpop.f32.mrf.mxu3  ;;  %v247_v14 = vpop.f32.mrf.mxu1 }
  0xa1   :  { %511 = vmatmul.f32.gmra.mxu0 %v3318_v6  ;;  %v321_v35 = vpop.f32.mrf.mxu2  ;;  %v248_v7 = vadd.f32 %v247_v14, %v131_v62  ;;  %v1256_v62 = vld [vmem:[%s4364_s3] sm:$0xff] }
  0xa2   :  { %1262 = vperm.xlu1 %3025, %v1256_v62  }
  0xa3   :  { %v322_v9 = vadd.f32 %v321_v35, %v248_v7  ;;  %579 = vmatmul.f32.gmra.mxu1 %v3318_v6 }
  0xa5   :  { %779 = vmatmul.f32.gmra.mxu3 %v3339_v18  ;;  %v3486_v24 = vadd.f32 %v404_v30, %v322_v9  ;;  %683 = vmatmul.f32.gmra.mxu2 %v3373_v39 }
  0xa6   :  { %v139_v25 = vpop.f32.mrf.mxu0 }
  0xa8   :  { %v410_v36 = vpop.f32.mrf.mxu3  ;;  %v251_v27 = vpop.f32.mrf.mxu1 }
  0xa9   :  { %515 = vmatmul.f32.gmra.mxu0 %v3339_v18  ;;  %v326_v44 = vpop.f32.mrf.mxu2  ;;  %v252_v51 = vadd.f32 %v251_v27, %v139_v25  ;;  %v1258_v27 = vld [vmem:[%s4364_s3 + $0x10] sm:$0xff] }
  0xaa   :  { %1272 = vperm.xlu0 %3024, %v1258_v27  }
  0xab   :  { %v327_v43 = vadd.f32 %v326_v44, %v252_v51  ;;  %583 = vmatmul.f32.gmra.mxu1 %v3339_v18  ;;  %v2464_v44 = vld [vmem:[%s4369_s8 + $0x18] sm:$0xff] }
  0xac   :  { %2482 = vperm.xlu1 %3025, %v2464_v44  }
  0xad   :  { %783 = vmatmul.f32.gmra.mxu3 %v3359_v31  ;;  %v3495_v39 = vadd.f32 %v410_v36, %v327_v43  ;;  %691 = vmatmul.f32.gmra.mxu2 %v3398_v0  ;;  %v1864_v36 = vld [vmem:[%s4366_s5 + $0x18] sm:$0xff] }
  0xae   :  { %v147_v47 = vpop.f32.mrf.mxu0  ;;  %1882 = vperm.xlu2 %3026, %v1864_v36  }
  0xb0   :  { %v416_v48 = vpop.f32.mrf.mxu3  ;;  %v255_v4 = vpop.f32.mrf.mxu1 }
  0xb1   :  { %519 = vmatmul.f32.gmra.mxu0 %v3359_v31  ;;  %v331_v50 = vpop.f32.mrf.mxu2  ;;  %v256_v54 = vadd.f32 %v255_v4, %v147_v47  ;;  %v1863_v4 = vld [vmem:[%s4366_s5 + $0x10] sm:$0xff] }
  0xb3   :  { %v332_v30 = vadd.f32 %v331_v50, %v256_v54  ;;  %587 = vmatmul.f32.gmra.mxu1 %v3359_v31  ;;  %v1862_v50 = vld [vmem:[%s4366_s5 + $0x8] sm:$0xff] }
  0xb4   :  { %v2462_v54 = vld [vmem:[%s4369_s8 + $0x8] sm:$0xff]  ;;  %1872 = vperm.xlu0 %3024, %v1862_v50  }
  0xb5   :  { %787 = vmatmul.f32.gmra.mxu3 %v3379_v42  ;;  %v3507_v0 = vadd.f32 %v416_v48, %v332_v30  ;;  %699 = vmatmul.f32.gmra.mxu2 %v3420_v10 }
  0xb6   :  { %v155_v14 = vpop.f32.mrf.mxu0  ;;  %1877 = vperm.xlu2 %3026, %v1863_v4   ;;  %2472 = vperm.xlu1 %3025, %v2462_v54  }
  0xb8   :  { %v422_v35 = vpop.f32.mrf.mxu3  ;;  %v259_v7 = vpop.f32.mrf.mxu1 }
  0xb9   :  { %523 = vmatmul.f32.gmra.mxu0 %v3379_v42  ;;  %v336_v9 = vpop.f32.mrf.mxu2  ;;  %v260_v25 = vadd.f32 %v259_v7, %v155_v14 }
  0xbb   :  { %v337_v10 = vadd.f32 %v336_v9, %v260_v25  ;;  %591 = vmatmul.f32.gmra.mxu1 %v3379_v42  ;;  %v1861_v9 = vld [vmem:[%s4366_s5] sm:$0xff]  ;;  %v2463_v25 = vld [vmem:[%s4369_s8 + $0x10] sm:$0xff] }
  0xbc   :  { %2477 = vperm.xlu0 %3024, %v2463_v25  }
  0xbd   :  { %791 = vmatmul.f32.gmra.mxu3 %v3404_v3  ;;  %v3522_v51 = vadd.f32 %v422_v35, %v337_v10  ;;  %707 = vmatmul.f32.gmra.mxu2 %v3436_v20 }
  0xbe   :  { %v163_v33 = vpop.f32.mrf.mxu0  ;;  %1867 = vperm.xlu2 %3026, %v1861_v9  }
  0xc0   :  { %v428_v38 = vpop.f32.mrf.mxu3  ;;  %v263_v43 = vpop.f32.mrf.mxu1 }
  0xc1   :  { %527 = vmatmul.f32.gmra.mxu0 %v3404_v3  ;;  %v341_v47 = vpop.f32.mrf.mxu2  ;;  %v264_v48 = vadd.f32 %v263_v43, %v163_v33  ;;  %v2461_v43 = vld [vmem:[%s4369_s8] sm:$0xff] }
  0xc3   :  { %v342_v20 = vadd.f32 %v341_v47, %v264_v48  ;;  %595 = vmatmul.f32.gmra.mxu1 %v3404_v3 }
  0xc5   :  { %795 = vmatmul.f32.gmra.mxu3 %v3426_v13  ;;  %v3537_v57 = vadd.f32 %v428_v38, %v342_v20  ;;  %715 = vmatmul.f32.gmra.mxu2 %v3447_v32 }
  0xc6   :  { %v171_v62 = vpop.f32.mrf.mxu0  ;;  %2467 = vperm.xlu2 %3026, %v2461_v43  }
  0xc8   :  { %v434_v30 = vpop.f32.mrf.mxu3  ;;  %v267_v14 = vpop.f32.mrf.mxu1 }
  0xc9   :  { %531 = vmatmul.f32.gmra.mxu0 %v3426_v13  ;;  %v346_v35 = vpop.f32.mrf.mxu2  ;;  %v268_v7 = vadd.f32 %v267_v14, %v171_v62 }
  0xcb   :  { %v347_v36 = vadd.f32 %v346_v35, %v268_v7  ;;  %599 = vmatmul.f32.gmra.mxu1 %v3426_v13 }
  0xcd   :  { %1068 = vmatmul.f32.vlgmr.msra.gmra.mxu3 %v3187_v15  ;;  %v3549_v32 = vadd.f32 %v434_v30, %v347_v36  ;;  %1000 = vmatmul.f32.vlgmr.msra.gmra.mxu2 %v3187_v15 }
  0xce   :  { %v179_v27 = vpop.f32.mrf.mxu0 }
  0xd0   :  { %v440_v44 = vpop.f32.mrf.mxu3  ;;  %v271_v10 = vpop.f32.mrf.mxu1 }
  0xd1   :  { %823 = vmatmul.f32.vlgmr.msra.gmra.mxu0 %v3194_v19  ;;  %v351_v33 = vpop.f32.mrf.mxu2  ;;  %v272_v38 = vadd.f32 %v271_v10, %v179_v27 }
  0xd3   :  { %v352_v47 = vadd.f32 %v351_v33, %v272_v38  ;;  %904 = vmatmul.f32.vlgmr.msra.gmra.mxu1 %v3207_v26 }
  0xd5   :  { %1072 = vmatmul.f32.gmra.mxu3 %v3189_v16  ;;  %v3558_v48 = vadd.f32 %v440_v44, %v352_v47  ;;  %1004 = vmatmul.f32.gmra.mxu2 %v3189_v16 }
  0xd6   :  { %v187_v4 = vpop.f32.mrf.mxu0 }
  0xd8   :  { %v446_v15 = vpop.f32.mrf.mxu3  ;;  %v275_v19 = vpop.f32.mrf.mxu1 }
  0xd9   :  { %828 = vmatmul.f32.gmra.mxu0 %v3201_v23  ;;  %v356_v50 = vpop.f32.mrf.mxu2  ;;  %v276_v54 = vadd.f32 %v275_v19, %v187_v4 }
  0xdb   :  { %v357_v20 = vadd.f32 %v356_v50, %v276_v54  ;;  %910 = vmatmul.f32.gmra.mxu1 %v3219_v34 }
  0xdd   :  { %1076 = vmatmul.f32.gmra.mxu3 %v3210_v29  ;;  %v3564_v62 = vadd.f32 %v446_v15, %v357_v20  ;;  %1008 = vmatmul.f32.gmra.mxu2 %v3210_v29 }
  0xde   :  { %v195_v26 = vpop.f32.mrf.mxu0 }
  0xe0   :  { %v452_v30 = vpop.f32.mrf.mxu3  ;;  %v279_v16 = vpop.f32.mrf.mxu1 }
  0xe1   :  { %833 = vmatmul.f32.gmra.mxu0 %v3236_v41  ;;  %v361_v14 = vpop.f32.mrf.mxu2  ;;  %v280_v35 = vadd.f32 %v279_v16, %v195_v26 }
  0xe3   :  { %v362_v23 = vadd.f32 %v361_v14, %v280_v35  ;;  %916 = vmatmul.f32.gmra.mxu1 %v3245_v45 }
  0xe5   :  { %1080 = vmatmul.f32.gmra.mxu3 %v3247_v46  ;;  %v3570_v7 = vadd.f32 %v452_v30, %v362_v23  ;;  %1012 = vmatmul.f32.gmra.mxu2 %v3247_v46 }
  0xe6   :  { %v203_v34 = vpop.f32.mrf.mxu0 }
  0xe8   :  { %v458_v9 = vpop.f32.mrf.mxu3  ;;  %v283_v29 = vpop.f32.mrf.mxu1 }
  0xe9   :  { %838 = vmatmul.f32.gmra.mxu0 %v3259_v49  ;;  %v366_v25 = vpop.f32.mrf.mxu2  ;;  %v284_v36 = vadd.f32 %v283_v29, %v203_v34 }
  0xeb   :  { %v367_v41 = vadd.f32 %v366_v25, %v284_v36  ;;  %922 = vmatmul.f32.gmra.mxu1 %v3269_v52 }
  0xed   :  { %1084 = vmatmul.f32.gmra.mxu3 %v3271_v53  ;;  %v3576_v27 = vadd.f32 %v458_v9, %v367_v41  ;;  %1016 = vmatmul.f32.gmra.mxu2 %v3271_v53 }
  0xee   :  { %v488_v45 = vpop.f32.mrf.mxu0 }
  0xf0   :  { %v3579_v44 = vpop.f32.mrf.mxu3  ;;  %v556_v46 = vpop.f32.mrf.mxu1 }
  0xf1   :  { %843 = vmatmul.f32.gmra.mxu0 %v3281_v56  ;;  %v3582_v10 = vpop.f32.mrf.mxu2 }
  0xf3   :  { %928 = vmatmul.f32.gmra.mxu1 %v3289_v59 }
  0xf5   :  { %1088 = vmatmul.f32.gmra.mxu3 %v3291_v60  ;;  %1020 = vmatmul.f32.gmra.mxu2 %v3291_v60 }
  0xf6   :  { %v492_v49 = vpop.f32.mrf.mxu0 }
  0xf8   :  { %v3587_v52 = vpop.f32.mrf.mxu3  ;;  %v560_v33 = vpop.f32.mrf.mxu1 }
  0xf9   :  { %848 = vmatmul.f32.gmra.mxu0 %v3301_v63  ;;  %v3590_v53 = vpop.f32.mrf.mxu2 }
  0xfb   :  { %934 = vmatmul.f32.gmra.mxu1 %v3316_v5 }
  0xfd   :  { %1092 = vmatmul.f32.gmra.mxu3 %v3318_v6  ;;  %1024 = vmatmul.f32.gmra.mxu2 %v3318_v6 }
  0xfe   :  { %v496_v56 = vpop.f32.mrf.mxu0 }
 0x100   :  { %v3595_v59 = vpop.f32.mrf.mxu3  ;;  %v564_v38 = vpop.f32.mrf.mxu1 }
 0x101   :  { %853 = vmatmul.f32.gmra.mxu0 %v3329_v11  ;;  %v3598_v60 = vpop.f32.mrf.mxu2  ;;  %v489_v11 = vadd.f32 %v488_v45, %v3474_v58  ;;  %v493_v58 = vadd.f32 %v492_v49, %v3480_v61  ;;  %v497_v61 = vadd.f32 %v496_v56, %v3486_v24 }
 0x103   :  { %940 = vmatmul.f32.gmra.mxu1 %v3337_v17  ;;  %v557_v17 = vadd.f32 %v556_v46, %v489_v11 }
 0x105   :  { %1096 = vmatmul.f32.gmra.mxu3 %v3339_v18  ;;  %1028 = vmatmul.f32.gmra.mxu2 %v3339_v18  ;;  %v1116_v50 = vmul.f32 %v557_v17, %v557_v17 }
 0x106   :  { %v500_v63 = vpop.f32.mrf.mxu0 }
 0x107   :  { %v501_v24 = vadd.f32 %v500_v63, %v3495_v39 }
 0x108   :  { %v3603_v5 = vpop.f32.mrf.mxu3  ;;  %v568_v43 = vpop.f32.mrf.mxu1 }
 0x109   :  { %858 = vmatmul.f32.gmra.mxu0 %v3349_v22  ;;  %v3606_v6 = vpop.f32.mrf.mxu2 }
 0x10b   :  { %946 = vmatmul.f32.gmra.mxu1 %v3357_v28 }
 0x10d   :  { %1100 = vmatmul.f32.gmra.mxu3 %v3359_v31  ;;  %1032 = vmatmul.f32.gmra.mxu2 %v3359_v31 }
 0x10e   :  { %v504_v47 = vpop.f32.mrf.mxu0 }
 0x10f   :  { %v505_v4 = vadd.f32 %v504_v47, %v3507_v0  ;;  %v561_v0 = vadd.f32 %v560_v33, %v493_v58 }
 0x110   :  { %v3613_v18 = vpop.f32.mrf.mxu3  ;;  %v572_v22 = vpop.f32.mrf.mxu1 }
 0x111   :  { %863 = vmatmul.f32.gmra.mxu0 %v3369_v37  ;;  %v3616_v15 = vpop.f32.mrf.mxu2  ;;  %v573_v19 = vadd.f32 %v572_v22, %v505_v4 }
 0x113   :  { %v1124_v28 = vmul.f32 %v573_v19, %v573_v19  ;;  %952 = vmatmul.f32.gmra.mxu1 %v3377_v40  ;;  %v1118_v40 = vmul.f32 %v561_v0, %v561_v0 }
 0x115   :  { %1104 = vmatmul.f32.gmra.mxu3 %v3379_v42  ;;  %v1140_v31 = vadd.f32 %v1124_v28, %v1116_v50  ;;  %1036 = vmatmul.f32.gmra.mxu2 %v3379_v42 }
 0x116   :  { %v508_v54 = vpop.f32.mrf.mxu0 }
 0x117   :  { %v509_v20 = vadd.f32 %v508_v54, %v3522_v51  ;;  %v565_v51 = vadd.f32 %v564_v38, %v497_v61 }
 0x118   :  { %v3623_v37 = vpop.f32.mrf.mxu3  ;;  %v576_v26 = vpop.f32.mrf.mxu1 }
 0x119   :  { %868 = vmatmul.f32.gmra.mxu0 %v3392_v55  ;;  %v3626_v30 = vpop.f32.mrf.mxu2  ;;  %v577_v16 = vadd.f32 %v576_v26, %v509_v20 }
 0x11b   :  { %v1126_v14 = vmul.f32 %v577_v16, %v577_v16  ;;  %958 = vmatmul.f32.gmra.mxu1 %v3402_v1  ;;  %v1120_v1 = vmul.f32 %v565_v51, %v565_v51 }
 0x11d   :  { %1108 = vmatmul.f32.gmra.mxu3 %v3404_v3  ;;  %v1142_v42 = vadd.f32 %v1126_v14, %v1118_v40  ;;  %1040 = vmatmul.f32.gmra.mxu2 %v3404_v3 }
 0x11e   :  { %v512_v35 = vpop.f32.mrf.mxu0 }
 0x11f   :  { %v513_v23 = vadd.f32 %v512_v35, %v3537_v57  ;;  %v569_v57 = vadd.f32 %v568_v43, %v501_v24 }
 0x120   :  { %v3633_v55 = vpop.f32.mrf.mxu3  ;;  %v580_v34 = vpop.f32.mrf.mxu1 }
 0x121   :  { %873 = vmatmul.f32.gmra.mxu0 %v3414_v8  ;;  %v3636_v9 = vpop.f32.mrf.mxu2  ;;  %v581_v29 = vadd.f32 %v580_v34, %v513_v23 }
 0x123   :  { %v1128_v25 = vmul.f32 %v581_v29, %v581_v29  ;;  %964 = vmatmul.f32.gmra.mxu1 %v3424_v12  ;;  %v1122_v12 = vmul.f32 %v569_v57, %v569_v57 }
 0x125   :  { %1112 = vmatmul.f32.gmra.mxu3 %v3426_v13  ;;  %v1144_v3 = vadd.f32 %v1128_v25, %v1120_v1  ;;  %1044 = vmatmul.f32.gmra.mxu2 %v3426_v13 }
 0x126   :  { %v516_v36 = vpop.f32.mrf.mxu0 }
 0x127   :  { %v517_v41 = vadd.f32 %v516_v36, %v3549_v32 }
 0x128   :  { %v3643_v8 = vpop.f32.mrf.mxu3  ;;  %v584_v45 = vpop.f32.mrf.mxu1 }
 0x129   :  { %878 = vmatmul.f32.gmra.mxu0 %v3433_v2  ;;  %v3646_v46 = vpop.f32.mrf.mxu2  ;;  %v585_v49 = vadd.f32 %v584_v45, %v517_v41 }
 0x12b   :  { %v1130_v33 = vmul.f32 %v585_v49, %v585_v49  ;;  %970 = vmatmul.f32.gmra.mxu1 %v3440_v21 }
 0x12d   :  { %v1146_v39 = vadd.f32 %v1130_v33, %v1122_v12 }
 0x12e   :  { %v520_v56 = vpop.f32.mrf.mxu0 }
 0x12f   :  { %v521_v38 = vadd.f32 %v520_v56, %v3558_v48 }
 0x130   :  { %v3650_v13 = vpop.f32.mrf.mxu3  ;;  %v588_v63 = vpop.f32.mrf.mxu1 }
 0x131   :  { %v3652_v32 = vpop.f32.mrf.mxu2  ;;  %v589_v43 = vadd.f32 %v588_v63, %v521_v38 }
 0x133   :  { %v1132_v11 = vmul.f32 %v589_v43, %v589_v43 }
 0x135   :  { %v3654_v2 = vadd.f32 %v1140_v31, %v1132_v11 }
 0x136   :  { %v524_v47 = vpop.f32.mrf.mxu0 }
 0x137   :  { %v525_v17 = vadd.f32 %v524_v47, %v3564_v62  ;;  %3027 = vrsqrt.f32 %v3654_v2  ;;  %vm1163_vm5 = vcmp.eq.f32.partialorder %v3654_v2, inf  ;;  %vm1165_vm7 = vcmp.eq.f32.partialorder %v3654_v2, 0.0 }
 0x138   :  { %v3657_v4 = vpop.f32.mrf.mxu3  ;;  %v592_v22 = vpop.f32.mrf.mxu1 }
 0x139   :  { %v3659_v21 = vpop.f32.mrf.mxu2  ;;  %v593_v19 = vadd.f32 %v592_v22, %v525_v17  ;;  %v1252_v22 = vld [vmem:[%s4363_s2] sm:$0xff] }
 0x13b   :  { %v1134_v50 = vmul.f32 %v593_v19, %v593_v19 }
 0x13d   :  { %v3662_v48 = vadd.f32 %v1142_v42, %v1134_v50  ;;  %v3028_v0 = vpop.eup %3027 }
 0x13e   :  { %v528_v28 = vpop.f32.mrf.mxu0  ;;  %v1157_v16 = vmul.f32 %v3028_v0, %v3654_v2 }
 0x13f   :  { %v529_v58 = vadd.f32 %v528_v28, %v3570_v7  ;;  %3029 = vrsqrt.f32 %v3662_v48  ;;  %vm1187_vm2 = vcmp.eq.f32.partialorder %v3662_v48, inf  ;;  %vm1189_vm6 = vcmp.eq.f32.partialorder %v3662_v48, 0.0 }
 0x140   :  { %v3665_v54 = vpop.f32.mrf.mxu3  ;;  %v596_v31 = vpop.f32.mrf.mxu1  ;;  %v1158_v34 = vmul.f32 %v3028_v0, %v1157_v16 }
 0x141   :  { %v3668_v62 = vpop.f32.mrf.mxu2  ;;  %v597_v20 = vadd.f32 %v596_v31, %v529_v58 }
 0x142   :  { %v1159_v36 = vmul.f32 0.5, %v1158_v34  ;;  %v1190_v34 = vand.u32 2147483648, %v3662_v48 }
 0x143   :  { %v1136_v26 = vmul.f32 %v597_v20, %v597_v20 }
 0x144   :  { %v1160_v12 = vsub.f32 1.5, %v1159_v36  ;;  %v1166_v36 = vand.u32 2147483648, %v3654_v2 }
 0x145   :  { %v3030_v40 = vpop.eup %3029  ;;  %v1152_v14 = vadd.f32 %v1144_v3, %v1136_v26 }
 0x146   :  { %v532_v61 = vpop.f32.mrf.mxu0  ;;  %v1181_v42 = vmul.f32 %v3030_v40, %v3662_v48  ;;  %v1161_v11 = vmul.f32 %v3028_v0, %v1160_v12  ;;  %v1253_v12 = vld [vmem:[%s4363_s2 + $0x8] sm:$0xff] }
 0x147   :  { %v533_v35 = vadd.f32 %v532_v61, %v3576_v27  ;;  %3031 = vrsqrt.f32 %v1152_v14  ;;  %vm1211_vm3 = vcmp.eq.f32.partialorder %v1152_v14, inf  ;;  %v1214_v61 = vand.u32 2147483648, %v1152_v14 }
 0x148   :  { %v3673_v7 = vpop.f32.mrf.mxu3  ;;  %v600_v51 = vpop.f32.mrf.mxu1  ;;  %v1182_v29 = vmul.f32 %v3030_v40, %v1181_v42  ;;  %v1162_v31 = vmul.f32 %v1161_v11, %v3654_v2  ;;  %vm1213_vm4 = vcmp.eq.f32.partialorder %v1152_v14, 0.0 }
 0x149   :  { %4384 = vst [vmem:[#allocation6_spill] sm:$0xff] %v3673_v7  ;;  %v3675_v23 = vpop.f32.mrf.mxu2  ;;  %v601_v1 = vadd.f32 %v600_v51, %v533_v35 }
 0x14a   :  { %4385 = vst [vmem:[#allocation7_spill] sm:$0xff] %v3675_v23  ;;  %v1183_v25 = vmul.f32 0.5, %v1182_v29 }
 0x14b   :  { %v1138_v24 = vmul.f32 %v601_v1, %v601_v1 }
 0x14c   :  { %v1184_v45 = vsub.f32 1.5, %v1183_v25  ;;  %v1164_v25 = vsel %vm1163_vm5, %v3654_v2, %v1162_v31 }
 0x14d   :  { %v3032_v57 = vpop.eup %3031  ;;  %v3677_v41 = vadd.f32 %v1146_v39, %v1138_v24 }
 0x14e   :  { %v3679_v3 = vpop.f32.mrf.mxu0  ;;  %v1205_v49 = vmul.f32 %v3032_v57, %v1152_v14  ;;  %v1185_v63 = vmul.f32 %v3030_v40, %v1184_v45  ;;  %v1282_v40 = vsel %vm1280_vm1, %v1252_v22, 0  ;;  %v1285_v22 = vsel %vm1280_vm1, %v1253_v12, 0 }
 0x14f   :  { %3033 = vrsqrt.f32 %v3677_v41  ;;  %v3709_v1 = vand.u32 4294901760, %v1282_v40  ;;  %vm1235_vm8 = vcmp.eq.f32.partialorder %v3677_v41, inf  ;;  %vm1237_vm9 = vcmp.eq.f32.partialorder %v3677_v41, 0.0 }
 0x150   :  { %v3682_v27 = vpop.f32.mrf.mxu3  ;;  %v3684_v33 = vpop.f32.mrf.mxu1  ;;  %v1206_v38 = vmul.f32 %v3032_v57, %v1205_v49  ;;  %v1186_v50 = vmul.f32 %v1185_v63, %v3662_v48 }
 0x151   :  { %v3686_v56 = vpop.f32.mrf.mxu2 }
 0x152   :  { %v1207_v43 = vmul.f32 0.5, %v1206_v38  ;;  %v1188_v35 = vsel %vm1187_vm2, %v3662_v48, %v1186_v50  ;;  %v3725_v38 = vsel %vm1165_vm7, %v1166_v36, %v1164_v25  ;;  %v3730_v48 = vsub.f32 %v1282_v40, %v3709_v1 }
 0x153   :  { %4388 = vst [vmem:[#allocation10_spill] sm:$0xff] %v3725_v38 }
 0x154   :  { %v1208_v47 = vsub.f32 1.5, %v1207_v43  ;;  %4389 = vst [vmem:[#allocation11_spill] sm:$0xff] %v3730_v48 }
 0x155   :  { %v3034_v39 = vpop.eup %3033 }
 0x156   :  { %v3688_v17 = vpop.f32.mrf.mxu0  ;;  %v1229_v19 = vmul.f32 %v3034_v39, %v3677_v41  ;;  %v1209_v28 = vmul.f32 %v3032_v57, %v1208_v47  ;;  %v3714_v57 = vsel %vm1189_vm6, %v1190_v34, %v1188_v35  ;;  %v1254_v34 = vld [vmem:[%s4363_s2 + $0x10] sm:$0xff] }
 0x157   :  { %4387 = vst [vmem:[#allocation9_spill] sm:$0xff] %v3714_v57  ;;  %v3734_v11 = vand.u32 4294901760, %v3714_v57 }
 0x158   :  { %v3695_v58 = vpop.f32.mrf.mxu3  ;;  %v1230_v20 = vmul.f32 %v3034_v39, %v1229_v19  ;;  %v3698_v0 = vpop.f32.mrf.mxu1  ;;  %v1210_v16 = vmul.f32 %v1209_v28, %v1152_v14  ;;  %v3744_v19 = vand.u32 4294901760, %v3725_v38 }
 0x159   :  { %v3700_v26 = vpop.f32.mrf.mxu2  ;;  %v1371_v40 = vsub.f32 %v3714_v57, %v3734_v11 }
 0x15a   :  { %v1231_v42 = vmul.f32 0.5, %v1230_v20  ;;  %v1212_v51 = vsel %vm1211_vm3, %v1152_v14, %v1210_v16  ;;  %v3753_v20 = vand.u32 4294901760, %v3730_v48  ;;  %v1377_v35 = vsub.f32 %v3725_v38, %v3744_v19 }
 0x15b   :  { %v3707_v29 = vsel %vm1213_vm4, %v1214_v61, %v1212_v51  ;;  %v3760_v61 = vand.u32 4294901760, %v1285_v22  ;;  %vm2998_vm3 = vcmask 1040384  }
 0x15c   :  { %4386 = vst [vmem:[#allocation8_spill] sm:$0xff] %v3707_v29  ;;  %v1232_v24 = vsub.f32 1.5, %v1231_v42  ;;  %v3720_v49 = vand.u32 4294901760, %v3707_v29 }
 0x15d   :  { %4391 = vst [vmem:[#allocation13_spill] sm:$0xff] %v3753_v20 }
 0x15e   :  { %v3716_v45 = vpop.f32.mrf.mxu0  ;;  %v1233_v14 = vmul.f32 %v3034_v39, %v1232_v24  ;;  %v1238_v39 = vand.u32 2147483648, %v3677_v41  ;;  %v1365_v28 = vsub.f32 %v3707_v29, %v3720_v49  ;;  %v1316_v24 = vsub.f32 %v3730_v48, %v3753_v20 }
 0x15f   :  { %v1378_v29 = vand.u32 4294901760, %v1377_v35 }
 0x160   :  { %v3727_v63 = vpop.f32.mrf.mxu3  ;;  %v1234_v43 = vmul.f32 %v1233_v14, %v3677_v41  ;;  %v3736_v2 = vpop.f32.mrf.mxu1  ;;  %v1366_v51 = vand.u32 4294901760, %v1365_v28 }
 0x161   :  { %v3738_v47 = vpop.f32.mrf.mxu2 }
 0x162   :  { %v1236_v50 = vsel %vm1235_vm8, %v3677_v41, %v1234_v43  ;;  %v1372_v43 = vand.u32 4294901760, %v1371_v40  ;;  %v1367_v57 = vsub.f32 %v1365_v28, %v1366_v51 }
 0x163   :  { %v3750_v31 = vsel %vm1237_vm9, %v1238_v39, %v1236_v50  ;;  %v3783_v39 = vsub.f32 %v1285_v22, %v3760_v61  ;;  %v1288_v50 = vsel %vm1280_vm1, %v1254_v34, 0 }
 0x164   :  { %4390 = vst [vmem:[#allocation12_spill] sm:$0xff] %v3750_v31  ;;  %v3756_v16 = vand.u32 4294901760, %v3750_v31  ;;  %v1373_v22 = vsub.f32 %v1371_v40, %v1372_v43  ;;  %v3795_v7 = vand.u32 4294901760, %v1288_v50 }
 0x165   :  { %4395 = vst [vmem:[#allocation17_spill] sm:$0xff] %v3783_v39 }
 0x166   :  { %v3762_v42 = vpop.f32.mrf.mxu0  ;;  %v1359_v41 = vsub.f32 %v3750_v31, %v3756_v16  ;;  %1306 = vmatpush.msrb.mxu0 %v3756_v16  ;;  %1457 = vmatpush.msrb.mxu3 %v3756_v16  ;;  %v3789_v31 = vand.u32 4294901760, %v1316_v24  ;;  %v1255_v24 = vld [vmem:[%s4363_s2 + $0x18] sm:$0xff] }
 0x168   :  { %v3773_v25 = vpop.f32.mrf.mxu3  ;;  %v3777_v36 = vpop.f32.mrf.mxu1  ;;  %1308 = vmatpush.msrb.mxu0 %v3720_v49  ;;  %1413 = vmatpush.msrb.mxu2 %v1359_v41  ;;  %v1360_v12 = vand.u32 4294901760, %v1359_v41 }
 0x169   :  { %4392 = vst [vmem:[#allocation14_spill] sm:$0xff] %v3773_v25  ;;  %v3780_v14 = vpop.f32.mrf.mxu2  ;;  %1459 = vmatpush.msrb.mxu3 %v3720_v49 }
 0x16a   :  { %4393 = vst [vmem:[#allocation15_spill] sm:$0xff] %v3777_v36  ;;  %1310 = vmatpush.msrb.mxu0 %v3734_v11  ;;  %1416 = vmatpush.msrb.mxu2 %v1365_v28  ;;  %v1361_v38 = vsub.f32 %v1359_v41, %v1360_v12  ;;  %v1368_v28 = vand.u32 4294901760, %v1367_v57  ;;  %v1379_v41 = vsub.f32 %v1377_v35, %v1378_v29  ;;  %v1374_v36 = vand.u32 4294901760, %v1373_v22 }
 0x16b   :  { %4394 = vst [vmem:[#allocation16_spill] sm:$0xff] %v3780_v14  ;;  %1461 = vmatpush.msrb.mxu3 %v3734_v11  ;;  %v3793_v14 = vand.u32 4294901760, %v3783_v39  ;;  %v3808_v57 = vsub.f32 %v1288_v50, %v3795_v7 }
 0x16c   :  { %1312 = vmatpush.msrb.mxu0 %v3744_v19  ;;  %1419 = vmatpush.msrb.mxu2 %v1371_v40  ;;  %v1362_v25 = vand.u32 4294901760, %v1361_v38 }
 0x16d   :  { %4396 = vst [vmem:[#allocation18_spill] sm:$0xff] %v3793_v14  ;;  %1463 = vmatpush.msrb.mxu3 %v3744_v19  ;;  %1318 = vmatmul.f32.vlgmr.msrb.gmra.mxu0 %v3789_v31  ;;  %v3815_v22 = vand.u32 4294901760, %v3808_v57 }
 0x16e   :  { %v844_v34 = vpop.f32.mrf.mxu0  ;;  %1504 = vmatpush.msra.mxu0 %v1360_v12  ;;  %1363 = vmatpush.msrb.mxu1 %v1362_v25  ;;  %v1324_v25 = vsub.f32 %v3783_v39, %v3793_v14  ;;  %4397 = vst [vmem:[#allocation19_spill] sm:$0xff] %v3808_v57 }
 0x16f   :  { %1422 = vmatpush.msrb.mxu2 %v1377_v35  ;;  %v1291_v35 = vsel %vm1280_vm1, %v1255_v24, 0  ;;  %1467 = vmatmul.f32.vlgmr.msrb.gmra.mxu3 %v3753_v20  ;;  %4399 = vst [vmem:[#allocation21_spill] sm:$0xff] %v3815_v22  ;;  %v1332_v50 = vsub.f32 %v3808_v57, %v3815_v22 }
 0x170   :  { %1508 = vmatpush.msra.mxu0 %v1366_v51  ;;  %v3801_v38 = vpop.f32.mrf.mxu3  ;;  %1425 = vmatmul.f32.vlgmr.msrb.gmra.mxu2 %v3730_v48  ;;  %v929_v40 = vpop.f32.mrf.mxu1  ;;  %v1380_v51 = vand.u32 4294901760, %v1379_v41  ;;  %v3812_v12 = vand.u32 4294901760, %v1324_v25 }
 0x171   :  { %1369 = vmatpush.msrb.mxu1 %v1368_v28  ;;  %v1017_v23 = vpop.f32.mrf.mxu2  ;;  %v3817_v28 = vand.u32 4294901760, %v1291_v35 }
 0x172   :  { %1512 = vmatpush.msra.mxu0 %v1372_v43  ;;  %4398 = vst [vmem:[#allocation20_spill] sm:$0xff] %v3812_v12 }
 0x173   :  { %1375 = vmatpush.msrb.mxu1 %v1374_v36  ;;  %v3829_v41 = vsub.f32 %v1291_v35, %v3817_v28 }
 0x174   :  { %1516 = vmatpush.msra.mxu0 %v1378_v29 }
 0x175   :  { %1381 = vmatpush.msrb.mxu1 %v1380_v51  ;;  %1326 = vmatmul.f32.gmra.mxu0 %v3812_v12  ;;  %4400 = vst [vmem:[#allocation22_spill] sm:$0xff] %v3829_v41 }
 0x176   :  { %v849_v48 = vpop.f32.mrf.mxu0  ;;  %1383 = vmatmul.f32.vlgmr.msrb.gmra.mxu1 %v3709_v1 }
 0x177   :  { %1547 = vmatpush.msra.mxu1 %v3756_v16  ;;  %1473 = vmatmul.f32.gmra.mxu3 %v3793_v14  ;;  %v3834_v16 = vand.u32 4294901760, %v1332_v50  ;;  %v769_v50 = vadd.f32 %v3613_v18, %v3616_v15 }
 0x178   :  { %v3821_v43 = vpop.f32.mrf.mxu3  ;;  %1430 = vmatmul.f32.gmra.mxu2 %v3783_v39  ;;  %v935_v29 = vpop.f32.mrf.mxu1 }
 0x179   :  { %1549 = vmatpush.msra.mxu1 %v3720_v49  ;;  %v1021_v36 = vpop.f32.mrf.mxu2  ;;  %4401 = vst [vmem:[#allocation23_spill] sm:$0xff] %v3834_v16  ;;  %v3837_v49 = vand.u32 4294901760, %v3829_v41  ;;  %v845_v14 = vadd.f32 %v844_v34, %v769_v50  ;;  %v785_v50 = vadd.f32 %v3650_v13, %v3652_v32  ;;  %v777_v13 = vadd.f32 %v3633_v55, %v3636_v9 }
 0x17b   :  { %1551 = vmatpush.msra.mxu1 %v3734_v11  ;;  %v1340_v11 = vsub.f32 %v3829_v41, %v3837_v49  ;;  %v930_v15 = vadd.f32 %v929_v40, %v845_v14 }
 0x17d   :  { %1553 = vmatpush.msra.mxu1 %v3744_v19  ;;  %1334 = vmatmul.f32.gmra.mxu0 %v3834_v16  ;;  %v3849_v19 = vand.u32 4294901760, %v1340_v11  ;;  %v773_v11 = vadd.f32 %v3623_v37, %v3626_v30 }
 0x17e   :  { %v854_v24 = vpop.f32.mrf.mxu0  ;;  %1387 = vmatmul.f32.gmra.mxu1 %v3760_v61 }
 0x17f   :  { %1479 = vmatmul.f32.gmra.mxu3 %v3815_v22  ;;  %v850_v34 = vadd.f32 %v849_v48, %v773_v11  ;;  %v855_v48 = vadd.f32 %v854_v24, %v777_v13  ;;  %v4403_v13 = vld [vmem:[#allocation7_spill] sm:$0xff] }
 0x180   :  { %v3840_v25 = vpop.f32.mrf.mxu3  ;;  %1435 = vmatmul.f32.gmra.mxu2 %v3808_v57  ;;  %v941_v35 = vpop.f32.mrf.mxu1  ;;  %v753_v57 = vadd.f32 %v3579_v44, %v3582_v10  ;;  %v757_v10 = vadd.f32 %v3587_v52, %v3590_v53 }
 0x181   :  { %v3843_v51 = vpop.f32.mrf.mxu2  ;;  %v936_v14 = vadd.f32 %v935_v29, %v850_v34  ;;  %v942_v9 = vadd.f32 %v941_v35, %v855_v48  ;;  %v781_v35 = vadd.f32 %v3643_v8, %v3646_v46 }
 0x182   :  { %v825_v18 = vadd.f32 %v3679_v3, %v753_v57  ;;  %v830_v3 = vadd.f32 %v3688_v17, %v757_v10 }
 0x183   :  { %v1022_v32 = vadd.f32 %v1021_v36, %v936_v14 }
 0x184   :  { %v906_v44 = vadd.f32 %v3684_v33, %v825_v18  ;;  %v912_v30 = vadd.f32 %v3698_v0, %v830_v3  ;;  %v761_v0 = vadd.f32 %v3595_v59, %v3598_v60  ;;  %v793_v3 = vadd.f32 %v3665_v54, %v3668_v62 }
 0x185   :  { %1342 = vmatmul.f32.gmra.mxu0 %v3849_v19  ;;  %v1090_v55 = vadd.f32 %v3821_v43, %v1022_v32  ;;  %v1026_v43 = vadd.f32 %v3843_v51, %v942_v9  ;;  %v4404_v32 = vld [vmem:[#allocation6_spill] sm:$0xff] }
 0x186   :  { %v3853_v39 = vpop.f32.mrf.mxu0  ;;  %1391 = vmatmul.f32.gmra.mxu1 %v3795_v7  ;;  %v1002_v40 = vadd.f32 %v3686_v56, %v906_v44  ;;  %v1006_v56 = vadd.f32 %v3700_v26, %v912_v30  ;;  %v4402_v30 = vld [vmem:[#allocation15_spill] sm:$0xff] }
 0x187   :  { %1485 = vmatmul.f32.gmra.mxu3 %v3837_v49  ;;  %v1127_v10 = vmul.f32 %v1090_v55, %v1090_v55  ;;  %v860_v14 = vadd.f32 %v3853_v39, %v781_v35  ;;  %v1094_v51 = vadd.f32 %v3840_v25, %v1026_v43 }
 0x188   :  { %v3858_v12 = vpop.f32.mrf.mxu3  ;;  %1440 = vmatmul.f32.gmra.mxu2 %v3829_v41  ;;  %v3861_v16 = vpop.f32.mrf.mxu1  ;;  %v1018_v41 = vadd.f32 %v1017_v23, %v930_v15  ;;  %v1070_v23 = vadd.f32 %v3682_v27, %v1002_v40  ;;  %v835_v27 = vadd.f32 %v3716_v45, %v761_v0  ;;  %v1074_v11 = vadd.f32 %v3695_v58, %v1006_v56  ;;  %v4405_v56 = vld [vmem:[#allocation16_spill] sm:$0xff] }
 0x189   :  { %v3863_v22 = vpop.f32.mrf.mxu2  ;;  %v765_v58 = vadd.f32 %v3603_v5, %v3606_v6 }
 0x18a   :  { %v1086_v52 = vadd.f32 %v3801_v38, %v1018_v41  ;;  %v1117_v36 = vmul.f32 %v1070_v23, %v1070_v23  ;;  %v797_v23 = vadd.f32 %v4404_v32, %v4403_v13 }
 0x18b   :  { %v840_v8 = vadd.f32 %v3762_v42, %v765_v58 }
 0x18c   :  { %v1125_v29 = vmul.f32 %v1086_v52, %v1086_v52  ;;  %v1129_v52 = vmul.f32 %v1094_v51, %v1094_v51 }
 0x18d   :  { %1518 = vmatmul.f32.vlgmr.msra.gmra.mxu0 %v3709_v1 }
 0x18e   :  { %v864_v20 = vpop.f32.mrf.mxu0  ;;  %1395 = vmatmul.f32.gmra.mxu1 %v3817_v28 }
 0x18f   :  { %v865_v57 = vadd.f32 %v864_v20, %v785_v50  ;;  %v789_v20 = vadd.f32 %v3657_v4, %v3659_v21  ;;  %v918_v4 = vadd.f32 %v3736_v2, %v835_v27  ;;  %v1141_v21 = vadd.f32 %v1125_v29, %v1117_v36  ;;  %v4406_v27 = vld [vmem:[#allocation14_spill] sm:$0xff] }
 0x190   :  { %v1101_v37 = vpop.f32.mrf.mxu3  ;;  %v953_v33 = vpop.f32.mrf.mxu1  ;;  %v1119_v50 = vmul.f32 %v1074_v11, %v1074_v11 }
 0x191   :  { %v1033_v18 = vpop.f32.mrf.mxu2  ;;  %v954_v53 = vadd.f32 %v953_v33, %v865_v57  ;;  %v1010_v2 = vadd.f32 %v3738_v47, %v918_v4  ;;  %v924_v33 = vadd.f32 %v4402_v30, %v840_v8 }
 0x192   :  { %v1143_v46 = vadd.f32 %v1127_v10, %v1119_v50 }
 0x193   :  { %v1034_v17 = vadd.f32 %v1033_v18, %v954_v53  ;;  %v1078_v39 = vadd.f32 %v3727_v63, %v1010_v2  ;;  %v1014_v48 = vadd.f32 %v4405_v56, %v924_v33 }
 0x195   :  { %v1102_v38 = vadd.f32 %v1101_v37, %v1034_v17  ;;  %1522 = vmatmul.f32.gmra.mxu0 %v3760_v61  ;;  %v948_v37 = vadd.f32 %v3861_v16, %v860_v14  ;;  %v1121_v17 = vmul.f32 %v1078_v39, %v1078_v39 }
 0x196   :  { %v869_v15 = vpop.f32.mrf.mxu0  ;;  %1555 = vmatmul.f32.vlgmr.msra.gmra.mxu1 %v3709_v1 }
 0x197   :  { %v870_v41 = vadd.f32 %v869_v15, %v789_v20  ;;  %v1133_v26 = vmul.f32 %v1102_v38, %v1102_v38  ;;  %v1030_v25 = vadd.f32 %v3863_v22, %v948_v37  ;;  %v1145_v20 = vadd.f32 %v1129_v52, %v1121_v17 }
 0x198   :  { %v1105_v24 = vpop.f32.mrf.mxu3  ;;  %v959_v59 = vpop.f32.mrf.mxu1 }
 0x199   :  { %v1037_v60 = vpop.f32.mrf.mxu2  ;;  %v960_v44 = vadd.f32 %v959_v59, %v870_v41  ;;  %v3898_v45 = vadd.f32 %v1141_v21, %v1133_v26  ;;  %v1098_v29 = vadd.f32 %v3858_v12, %v1030_v25  ;;  %v1082_v41 = vadd.f32 %v4406_v27, %v1014_v48 }
 0x19b   :  { %v1038_v34 = vadd.f32 %v1037_v60, %v960_v44  ;;  %3035 = vrsqrt.f32 %v3898_v45  ;;  %v1131_v60 = vmul.f32 %v1098_v29, %v1098_v29  ;;  %v1123_v44 = vmul.f32 %v1082_v41, %v1082_v41 }
 0x19c   :  { %vm1175_vm13 = vcmp.eq.f32.partialorder %v3898_v45, inf  ;;  %v1178_v17 = vand.u32 2147483648, %v3898_v45  ;;  %vm1177_vm15 = vcmp.eq.f32.partialorder %v3898_v45, 0.0 }
 0x19d   :  { %v1106_v57 = vadd.f32 %v1105_v24, %v1038_v34  ;;  %1526 = vmatmul.f32.gmra.mxu0 %v3795_v7  ;;  %v1147_v35 = vadd.f32 %v1131_v60, %v1123_v44  ;;  %v4407_v44 = vld [vmem:[#allocation13_spill] sm:$0xff] }
 0x19e   :  { %v874_v40 = vpop.f32.mrf.mxu0  ;;  %1559 = vmatmul.f32.gmra.mxu1 %v3760_v61 }
 0x19f   :  { %v875_v5 = vadd.f32 %v874_v40, %v793_v3  ;;  %v1135_v6 = vmul.f32 %v1106_v57, %v1106_v57 }
 0x1a0   :  { %v1109_v54 = vpop.f32.mrf.mxu3  ;;  %v965_v62 = vpop.f32.mrf.mxu1 }
 0x1a1   :  { %v1041_v47 = vpop.f32.mrf.mxu2  ;;  %v3914_v18 = vadd.f32 %v1143_v46, %v1135_v6  ;;  %v966_v42 = vadd.f32 %v965_v62, %v875_v5  ;;  %v3036_v53 = vpop.eup %3035 }
 0x1a2   :  { %v1169_v9 = vmul.f32 %v3036_v53, %v3898_v45 }
 0x1a3   :  { %3037 = vrsqrt.f32 %v3914_v18  ;;  %v1042_v16 = vadd.f32 %v1041_v47, %v966_v42  ;;  %vm1199_vm11 = vcmp.eq.f32.partialorder %v3914_v18, inf  ;;  %vm1201_vm14 = vcmp.eq.f32.partialorder %v3914_v18, 0.0 }
 0x1a4   :  { %v1170_v21 = vmul.f32 %v3036_v53, %v1169_v9 }
 0x1a5   :  { %v1110_v63 = vadd.f32 %v1109_v54, %v1042_v16  ;;  %1530 = vmatmul.f32.gmra.mxu0 %v3817_v28 }
 0x1a6   :  { %v879_v0 = vpop.f32.mrf.mxu0  ;;  %1563 = vmatmul.f32.gmra.mxu1 %v3795_v7  ;;  %v1171_v58 = vmul.f32 0.5, %v1170_v21 }
 0x1a7   :  { %v880_v15 = vadd.f32 %v879_v0, %v797_v23  ;;  %v1137_v38 = vmul.f32 %v1110_v63, %v1110_v63 }
 0x1a8   :  { %v971_v22 = vpop.f32.mrf.mxu1  ;;  %v1113_v11 = vpop.f32.mrf.mxu3  ;;  %v1172_v57 = vsub.f32 1.5, %v1171_v58  ;;  %v4410_v58 = vld [vmem:[#allocation18_spill] sm:$0xff] }
 0x1a9   :  { %v1045_v55 = vpop.f32.mrf.mxu2  ;;  %v3038_v36 = vpop.eup %3037  ;;  %v1153_v26 = vadd.f32 %v1145_v20, %v1137_v38  ;;  %v972_v24 = vadd.f32 %v971_v22, %v880_v15 }
 0x1aa   :  { %v1193_v59 = vmul.f32 %v3038_v36, %v3914_v18  ;;  %v1173_v37 = vmul.f32 %v3036_v53, %v1172_v57  ;;  %v1202_v53 = vand.u32 2147483648, %v3914_v18  ;;  %v4415_v57 = vld [vmem:[#allocation22_spill] sm:$0xff] }
 0x1ab   :  { %3039 = vrsqrt.f32 %v1153_v26  ;;  %v1046_v4 = vadd.f32 %v1045_v55, %v972_v24  ;;  %vm1223_vm10 = vcmp.eq.f32.partialorder %v1153_v26, inf  ;;  %v1226_v33 = vand.u32 2147483648, %v1153_v26 }
 0x1ac   :  { %v1194_v12 = vmul.f32 %v3038_v36, %v1193_v59  ;;  %v1174_v30 = vmul.f32 %v1173_v37, %v3898_v45  ;;  %vm1225_vm12 = vcmp.eq.f32.partialorder %v1153_v26, 0.0 }
 0x1ad   :  { %v1114_v10 = vadd.f32 %v1113_v11, %v1046_v4 }
 0x1ae   :  { %1567 = vmatmul.f32.gmra.mxu1 %v3817_v28  ;;  %v1195_v43 = vmul.f32 0.5, %v1194_v12  ;;  %v1176_v32 = vsel %vm1175_vm13, %v3898_v45, %v1174_v30 }
 0x1af   :  { %v1139_v34 = vmul.f32 %v1114_v10, %v1114_v10  ;;  %v3943_v0 = vsel %vm1177_vm15, %v1178_v17, %v1176_v32 }
 0x1b0   :  { %v1196_v14 = vsub.f32 1.5, %v1195_v43  ;;  %v1589_v38 = vand.u32 4294901760, %v3943_v0  ;;  %v4408_v43 = vld [vmem:[#allocation11_spill] sm:$0xff] }
 0x1b1   :  { %v3040_v50 = vpop.eup %3039  ;;  %v1155_v3 = vadd.f32 %v1147_v35, %v1139_v34  ;;  %v2510_v34 = vld [vmem:[#allocation2] sm:$0x1] }
 0x1b2   :  { %v1217_v2 = vmul.f32 %v3040_v50, %v1153_v26  ;;  %v1197_v46 = vmul.f32 %v3038_v36, %v1196_v14  ;;  %v1655_v36 = vsub.f32 %v3943_v0, %v1589_v38  ;;  %2513 = vperm.xlu0 %3024, %v2510_v34   ;;  %v4414_v14 = vld [vmem:[#allocation19_spill] sm:$0xff] }
 0x1b3   :  { %3041 = vrsqrt.f32 %v1155_v3  ;;  %vm1247_vm0 = vcmp.eq.f32.partialorder %v1155_v3, inf  ;;  %v1250_v29 = vand.u32 2147483648, %v1155_v3  ;;  %vm1249_vm2 = vcmp.eq.f32.partialorder %v1155_v3, 0.0 }
 0x1b4   :  { %v1218_v40 = vmul.f32 %v3040_v50, %v1217_v2  ;;  %v1198_v62 = vmul.f32 %v1197_v46, %v3914_v18  ;;  %v1656_v59 = vand.u32 4294901760, %v1655_v36  ;;  %v4413_v2 = vld [vmem:[#allocation21_spill] sm:$0xff] }
 0x1b6   :  { %v1219_v8 = vmul.f32 0.5, %v1218_v40  ;;  %v1200_v25 = vsel %vm1199_vm11, %v3914_v18, %v1198_v62  ;;  %v1657_v21 = vsub.f32 %v1655_v36, %v1656_v59 }
 0x1b7   :  { %v3938_v23 = vsel %vm1201_vm14, %v1202_v53, %v1200_v25 }
 0x1b8   :  { %v1220_v51 = vsub.f32 1.5, %v1219_v8  ;;  %v1587_v20 = vand.u32 4294901760, %v3938_v23  ;;  %v1658_v35 = vand.u32 4294901760, %v1657_v21 }
 0x1b9   :  { %v3042_v5 = vpop.eup %3041 }
 0x1ba   :  { %v1241_v6 = vmul.f32 %v3042_v5, %v1155_v3  ;;  %v1221_v54 = vmul.f32 %v3040_v50, %v1220_v51  ;;  %v1649_v9 = vsub.f32 %v3938_v23, %v1587_v20  ;;  %v4411_v50 = vld [vmem:[#allocation17_spill] sm:$0xff] }
 0x1bc   :  { %v1242_v47 = vmul.f32 %v3042_v5, %v1241_v6  ;;  %v1222_v39 = vmul.f32 %v1221_v54, %v1153_v26  ;;  %v3975_v6 = vpop.permute.xlu1 %1267  ;;  %v3977_v54 = vpop.permute.xlu0 %1277 }
 0x1be   :  { %v1243_v42 = vmul.f32 0.5, %v1242_v47  ;;  %v1224_v52 = vsel %vm1223_vm10, %v1153_v26, %v1222_v39  ;;  %v1650_v26 = vand.u32 4294901760, %v1649_v9 }
 0x1bf   :  { %v3932_v16 = vsel %vm1225_vm12, %v1226_v33, %v1224_v52 }
 0x1c0   :  { %v1244_v13 = vsub.f32 1.5, %v1243_v42  ;;  %v1585_v48 = vand.u32 4294901760, %v3932_v16  ;;  %v1651_v4 = vsub.f32 %v1649_v9, %v1650_v26 }
 0x1c2   :  { %v1245_v56 = vmul.f32 %v3042_v5, %v1244_v13  ;;  %v1643_v18 = vsub.f32 %v3932_v16, %v1585_v48  ;;  %v1652_v10 = vand.u32 4294901760, %v1651_v4 }
 0x1c4   :  { %v1246_v63 = vmul.f32 %v1245_v56, %v1155_v3  ;;  %v1644_v27 = vand.u32 4294901760, %v1643_v18  ;;  %v3982_v42 = vpop.permute.xlu1 %1262 }
 0x1c6   :  { %v1248_v15 = vsel %vm1247_vm0, %v1155_v3, %v1246_v63  ;;  %v1645_v11 = vsub.f32 %v1643_v18, %v1644_v27  ;;  %v4412_v3 = vld [vmem:[#allocation23_spill] sm:$0xff] }
 0x1c7   :  { %v3948_v22 = vsel %vm1249_vm2, %v1250_v29, %v1248_v15 }
 0x1c8   :  { %v1583_v55 = vand.u32 4294901760, %v3948_v22  ;;  %v1646_v12 = vand.u32 4294901760, %v1645_v11 }
 0x1ca   :  { %1584 = vmatpush.msra.mxu2 %v1583_v55  ;;  %1735 = vmatpush.msrb.mxu1 %v1583_v55  ;;  %v1637_v45 = vsub.f32 %v3948_v22, %v1583_v55 }
 0x1cc   :  { %1586 = vmatpush.msra.mxu2 %v1585_v48  ;;  %1691 = vmatpush.msrb.mxu0 %v1637_v45  ;;  %v1638_v41 = vand.u32 4294901760, %v1637_v45 }
 0x1cd   :  { %1737 = vmatpush.msrb.mxu1 %v1585_v48 }
 0x1ce   :  { %1588 = vmatpush.msra.mxu2 %v1587_v20  ;;  %1694 = vmatpush.msrb.mxu0 %v1643_v18  ;;  %v1639_v24 = vsub.f32 %v1637_v45, %v1638_v41 }
 0x1cf   :  { %1739 = vmatpush.msrb.mxu1 %v1587_v20 }
 0x1d0   :  { %1590 = vmatpush.msra.mxu2 %v1589_v38  ;;  %1697 = vmatpush.msrb.mxu0 %v1649_v9  ;;  %v1640_v60 = vand.u32 4294901760, %v1639_v24 }
 0x1d1   :  { %1741 = vmatpush.msrb.mxu1 %v1589_v38  ;;  %1596 = vmatmul.f32.vlgmr.msra.gmra.mxu2 %v3789_v31  ;;  %v4409_v31 = vld [vmem:[#allocation20_spill] sm:$0xff] }
 0x1d2   :  { %1782 = vmatpush.msrb.mxu2 %v1638_v41  ;;  %1641 = vmatpush.msra.mxu3 %v1640_v60 }
 0x1d3   :  { %1700 = vmatpush.msrb.mxu0 %v1655_v36  ;;  %1745 = vmatmul.f32.vlgmr.msrb.gmra.mxu1 %v4407_v44  ;;  %v1857_v44 = vld [vmem:[%s4365_s4] sm:$0xff] }
 0x1d4   :  { %1786 = vmatpush.msrb.mxu2 %v1644_v27  ;;  %1647 = vmatpush.msra.mxu3 %v1646_v12 }
 0x1d5   :  { %1703 = vmatmul.f32.vlgmr.msrb.gmra.mxu0 %v4408_v43  ;;  %v1886_v43 = vsel %vm1280_vm1, %v1857_v44, 0 }
 0x1d6   :  { %1790 = vmatpush.msrb.mxu2 %v1650_v26  ;;  %1653 = vmatpush.msra.mxu3 %v1652_v10  ;;  %v3994_v34 = vand.u32 4294901760, %v1886_v43 }
 0x1d8   :  { %1794 = vmatpush.msrb.mxu2 %v1656_v59  ;;  %1659 = vmatpush.msra.mxu3 %v1658_v35 }
 0x1d9   :  { %1604 = vmatmul.f32.gmra.mxu2 %v4409_v31  ;;  %1661 = vmatmul.f32.vlgmr.msra.gmra.mxu3 %v3709_v1 }
 0x1da   :  { %1825 = vmatpush.msrb.mxu3 %v1583_v55 }
 0x1db   :  { %1751 = vmatmul.f32.gmra.mxu1 %v4410_v58 }
 0x1dc   :  { %1827 = vmatpush.msrb.mxu3 %v1585_v48 }
 0x1dd   :  { %1708 = vmatmul.f32.gmra.mxu0 %v4411_v50 }
 0x1de   :  { %1829 = vmatpush.msrb.mxu3 %v1587_v20 }
 0x1e0   :  { %1831 = vmatpush.msrb.mxu3 %v1589_v38 }
 0x1e1   :  { %1612 = vmatmul.f32.gmra.mxu2 %v4412_v3  ;;  %1665 = vmatmul.f32.gmra.mxu3 %v3760_v61 }
 0x1e3   :  { %1757 = vmatmul.f32.gmra.mxu1 %v4413_v2  ;;  %v1858_v2 = vld [vmem:[%s4365_s4 + $0x8] sm:$0xff] }
 0x1e5   :  { %1713 = vmatmul.f32.gmra.mxu0 %v4414_v14 }
 0x1e9   :  { %1620 = vmatmul.f32.gmra.mxu2 %v3849_v19  ;;  %1669 = vmatmul.f32.gmra.mxu3 %v3795_v7 }
 0x1ea   :  { %v1319_v40 = vpop.f32.mrf.mxu0 }
 0x1eb   :  { %1763 = vmatmul.f32.gmra.mxu1 %v3837_v49  ;;  %v1320_v52 = vadd.f32 %v1319_v40, %v3982_v42 }
 0x1ed   :  { %1718 = vmatmul.f32.gmra.mxu0 %v4415_v57  ;;  %v4002_v57 = vsub.f32 %v1886_v43, %v3994_v34 }
 0x1f1   :  { %1673 = vmatmul.f32.gmra.mxu3 %v3817_v28  ;;  %1796 = vmatmul.f32.vlgmr.msrb.gmra.mxu2 %v3709_v1 }
 0x1f2   :  { %v1327_v46 = vpop.f32.mrf.mxu0  ;;  %v1468_v5 = vpop.f32.mrf.mxu3 }
 0x1f3   :  { %v1384_v8 = vpop.f32.mrf.mxu1  ;;  %v1426_v19 = vpop.f32.mrf.mxu2  ;;  %v1328_v39 = vadd.f32 %v1327_v46, %v3975_v6  ;;  %v1889_v46 = vsel %vm1280_vm1, %v1858_v2, 0 }
 0x1f4   :  { %v1385_v17 = vadd.f32 %v1384_v8, %v1320_v52  ;;  %v4093_v2 = vpop.permute.xlu2 %1882 }
 0x1f6   :  { %v1427_v29 = vadd.f32 %v1426_v19, %v1385_v17  ;;  %v4011_v19 = vand.u32 4294901760, %v4002_v57 }
 0x1f8   :  { %v1469_v9 = vadd.f32 %v1468_v5, %v1427_v29 }
 0x1f9   :  { %1800 = vmatmul.f32.gmra.mxu2 %v3760_v61  ;;  %1833 = vmatmul.f32.vlgmr.msrb.gmra.mxu3 %v3709_v1 }
 0x1fa   :  { %v1335_v37 = vpop.f32.mrf.mxu0  ;;  %v1474_v30 = vpop.f32.mrf.mxu3 }
 0x1fb   :  { %v1388_v51 = vpop.f32.mrf.mxu1  ;;  %v1431_v47 = vpop.f32.mrf.mxu2 }
 0x1fc   :  { %v1389_v53 = vadd.f32 %v1388_v51, %v1328_v39 }
 0x1fe   :  { %v1432_v56 = vadd.f32 %v1431_v47, %v1389_v53  ;;  %v1859_v47 = vld [vmem:[%s4365_s4 + $0x10] sm:$0xff] }
 0x200   :  { %v1475_v18 = vadd.f32 %v1474_v30, %v1432_v56 }
 0x201   :  { %1804 = vmatmul.f32.gmra.mxu2 %v3795_v7  ;;  %1837 = vmatmul.f32.gmra.mxu3 %v3760_v61  ;;  %v3984_v61 = vpop.permute.xlu0 %1272 }
 0x202   :  { %v1343_v62 = vpop.f32.mrf.mxu0  ;;  %v1336_v25 = vadd.f32 %v1335_v37, %v3984_v61  ;;  %v1480_v63 = vpop.f32.mrf.mxu3 }
 0x203   :  { %v1392_v49 = vpop.f32.mrf.mxu1  ;;  %v1436_v32 = vpop.f32.mrf.mxu2  ;;  %v1344_v20 = vadd.f32 %v1343_v62, %v3977_v54 }
 0x209   :  { %1808 = vmatmul.f32.gmra.mxu2 %v3817_v28  ;;  %1841 = vmatmul.f32.gmra.mxu3 %v3795_v7  ;;  %v1393_v7 = vadd.f32 %v1392_v49, %v1336_v25  ;;  %v4013_v49 = vand.u32 4294901760, %v1889_v46 }
 0x20a   :  { %v1519_v33 = vpop.f32.mrf.mxu0  ;;  %v1486_v59 = vpop.f32.mrf.mxu3 }
 0x20b   :  { %v1396_v1 = vpop.f32.mrf.mxu1  ;;  %v1437_v15 = vadd.f32 %v1436_v32, %v1393_v7  ;;  %v1441_v27 = vpop.f32.mrf.mxu2  ;;  %v4023_v52 = vsub.f32 %v1889_v46, %v4013_v49 }
 0x20c   :  { %v1397_v55 = vadd.f32 %v1396_v1, %v1344_v20 }
 0x20d   :  { %v1481_v45 = vadd.f32 %v1480_v63, %v1437_v15  ;;  %v1860_v15 = vld [vmem:[%s4365_s4 + $0x18] sm:$0xff] }
 0x20e   :  { %v1442_v24 = vadd.f32 %v1441_v27, %v1397_v55  ;;  %v1895_v27 = vsel %vm1280_vm1, %v1860_v15, 0 }
 0x210   :  { %v1487_v21 = vadd.f32 %v1486_v59, %v1442_v24  ;;  %v4056_v24 = vand.u32 4294901760, %v1895_v27 }
 0x211   :  { %1845 = vmatmul.f32.gmra.mxu3 %v3817_v28  ;;  %v1520_v28 = vadd.f32 %v1519_v33, %v1469_v9  ;;  %v1920_v33 = vsub.f32 %v4002_v57, %v4011_v19 }
 0x212   :  { %v1523_v48 = vpop.f32.mrf.mxu0  ;;  %v4063_v59 = vsub.f32 %v1895_v27, %v4056_v24 }
 0x213   :  { %v1556_v13 = vpop.f32.mrf.mxu1  ;;  %v1524_v36 = vadd.f32 %v1523_v48, %v1475_v18  ;;  %v4027_v56 = vand.u32 4294901760, %v1920_v33  ;;  %v4031_v48 = vand.u32 4294901760, %v4023_v52 }
 0x214   :  { %v1557_v4 = vadd.f32 %v1556_v13, %v1520_v28  ;;  %v1892_v13 = vsel %vm1280_vm1, %v1859_v47, 0  ;;  %vm2517_vm1 = vcmask 523264  }
 0x215   :  { %v4033_v63 = vand.u32 4294901760, %v1892_v13  ;;  %v1928_v9 = vsub.f32 %v4023_v52, %v4031_v48 }
 0x217   :  { %v4051_v28 = vand.u32 4294901760, %v1928_v9 }
 0x21a   :  { %v1527_v41 = vpop.f32.mrf.mxu0 }
 0x21b   :  { %v1560_v38 = vpop.f32.mrf.mxu1  ;;  %v1528_v26 = vadd.f32 %v1527_v41, %v1481_v45  ;;  %v4046_v45 = vsub.f32 %v1892_v13, %v4033_v63 }
 0x21c   :  { %v1561_v11 = vadd.f32 %v1560_v38, %v1524_v36 }
 0x21e   :  { %3043 = vtanh.f32 %v1561_v11 }
 0x222   :  { %v1531_v10 = vpop.f32.mrf.mxu0 }
 0x223   :  { %v1564_v60 = vpop.f32.mrf.mxu1  ;;  %v1532_v35 = vadd.f32 %v1531_v10, %v1487_v21 }
 0x224   :  { %v1565_v12 = vadd.f32 %v1564_v60, %v1528_v26  ;;  %v3044_v31 = vpop.eup %3043  ;;  %v4054_v26 = vand.u32 4294901760, %v4046_v45 }
 0x225   :  { %v4004_v8 = vand.u32 4294901760, %v3044_v31 }
 0x226   :  { %3045 = vtanh.f32 %v1565_v12  ;;  %v1936_v11 = vsub.f32 %v4046_v45, %v4054_v26 }
 0x227   :  { %3047 = vtanh.f32 %v1557_v4  ;;  %v1975_v5 = vsub.f32 %v3044_v31, %v4004_v8  ;;  %v4071_v4 = vand.u32 4294901760, %v4063_v59 }
 0x228   :  { %v4068_v60 = vand.u32 4294901760, %v1936_v11 }
 0x229   :  { %v1976_v53 = vand.u32 4294901760, %v1975_v5  ;;  %v1944_v12 = vsub.f32 %v4063_v59, %v4071_v4 }
 0x22b   :  { %v1568_v58 = vpop.f32.mrf.mxu1  ;;  %v1977_v29 = vsub.f32 %v1975_v5, %v1976_v53  ;;  %v4081_v21 = vand.u32 4294901760, %v1944_v12 }
 0x22c   :  { %v3046_v50 = vpop.eup %3045  ;;  %v1569_v3 = vadd.f32 %v1568_v58, %v1532_v35 }
 0x22d   :  { %v3999_v14 = vand.u32 4294901760, %v3046_v50  ;;  %v3048_v40 = vpop.eup %3047  ;;  %v1978_v36 = vand.u32 4294901760, %v1977_v29 }
 0x22e   :  { %3049 = vtanh.f32 %v1569_v3  ;;  %v4007_v51 = vand.u32 4294901760, %v3048_v40 }
 0x22f   :  { %v1969_v37 = vsub.f32 %v3046_v50, %v3999_v14 }
 0x230   :  { %v1981_v30 = vsub.f32 %v3048_v40, %v4007_v51 }
 0x231   :  { %v1970_v39 = vand.u32 4294901760, %v1969_v37 }
 0x232   :  { %v1982_v7 = vand.u32 4294901760, %v1981_v30 }
 0x233   :  { %v1971_v17 = vsub.f32 %v1969_v37, %v1970_v39 }
 0x234   :  { %v3050_v62 = vpop.eup %3049  ;;  %v1983_v55 = vsub.f32 %v1981_v30, %v1982_v7 }
 0x235   :  { %v1909_v1 = vand.u32 4294901760, %v3050_v62  ;;  %v1972_v38 = vand.u32 4294901760, %v1971_v17 }
 0x236   :  { %v1984_v41 = vand.u32 4294901760, %v1983_v55 }
 0x237   :  { %1910 = vmatpush.msra.mxu0 %v1909_v1  ;;  %v1963_v25 = vsub.f32 %v3050_v62, %v1909_v1  ;;  %2061 = vmatpush.msra.mxu3 %v1909_v1 }
 0x239   :  { %1912 = vmatpush.msra.mxu0 %v3999_v14  ;;  %2017 = vmatpush.msra.mxu2 %v1963_v25  ;;  %v1964_v32 = vand.u32 4294901760, %v1963_v25 }
 0x23a   :  { %2063 = vmatpush.msra.mxu3 %v3999_v14 }
 0x23b   :  { %1914 = vmatpush.msra.mxu0 %v4004_v8  ;;  %2020 = vmatpush.msra.mxu2 %v1969_v37  ;;  %v1965_v20 = vsub.f32 %v1963_v25, %v1964_v32 }
 0x23c   :  { %2065 = vmatpush.msra.mxu3 %v4004_v8 }
 0x23d   :  { %1916 = vmatpush.msra.mxu0 %v4007_v51  ;;  %v1966_v18 = vand.u32 4294901760, %v1965_v20  ;;  %2023 = vmatpush.msra.mxu2 %v1975_v5 }
 0x23e   :  { %1922 = vmatmul.f32.vlgmr.msra.gmra.mxu0 %v4027_v56  ;;  %2067 = vmatpush.msra.mxu3 %v4007_v51 }
 0x23f   :  { %1967 = vmatpush.msra.mxu1 %v1966_v18  ;;  %2026 = vmatpush.msra.mxu2 %v1981_v30 }
 0x240   :  { %2029 = vmatmul.f32.vlgmr.msra.gmra.mxu2 %v4002_v57  ;;  %2071 = vmatmul.f32.vlgmr.msra.gmra.mxu3 %v4011_v19 }
 0x241   :  { %1973 = vmatpush.msra.mxu1 %v1972_v38  ;;  %2108 = vmatpush.msrb.mxu0 %v1964_v32 }
 0x243   :  { %1979 = vmatpush.msra.mxu1 %v1978_v36  ;;  %2112 = vmatpush.msrb.mxu0 %v1970_v39  ;;  %v4102_v39 = vpop.permute.xlu0 %1872 }
 0x245   :  { %1985 = vmatpush.msra.mxu1 %v1984_v41  ;;  %2116 = vmatpush.msrb.mxu0 %v1976_v53  ;;  %v4105_v53 = vpop.permute.xlu1 %2482 }
 0x246   :  { %1930 = vmatmul.f32.gmra.mxu0 %v4051_v28  ;;  %1987 = vmatmul.f32.vlgmr.msra.gmra.mxu1 %v3994_v34 }
 0x247   :  { %2151 = vmatpush.msrb.mxu1 %v1909_v1  ;;  %2120 = vmatpush.msrb.mxu0 %v1982_v7 }
 0x248   :  { %2034 = vmatmul.f32.gmra.mxu2 %v4023_v52  ;;  %2077 = vmatmul.f32.gmra.mxu3 %v4031_v48 }
 0x249   :  { %2153 = vmatpush.msrb.mxu1 %v3999_v14 }
 0x24b   :  { %2155 = vmatpush.msrb.mxu1 %v4004_v8  ;;  %v4112_v36 = vpop.permute.xlu0 %2477 }
 0x24d   :  { %2157 = vmatpush.msrb.mxu1 %v4007_v51  ;;  %v4097_v51 = vpop.permute.xlu2 %1877  ;;  %v4114_v12 = vpop.permute.xlu1 %2472 }
 0x24e   :  { %1938 = vmatmul.f32.gmra.mxu0 %v4068_v60  ;;  %1991 = vmatmul.f32.gmra.mxu1 %v4013_v49 }
 0x250   :  { %2039 = vmatmul.f32.gmra.mxu2 %v4046_v45  ;;  %2083 = vmatmul.f32.gmra.mxu3 %v4054_v26  ;;  %v1746_v14 = vpop.f32.mrf.mxu1 }
 0x252   :  { %v1704_v58 = vpop.f32.mrf.mxu0 }
 0x254   :  { %v1597_v44 = vpop.f32.mrf.mxu2 }
 0x255   :  { %v1598_v30 = vadd.f32 %v1597_v44, %v3982_v42  ;;  %v4107_v32 = vpop.permute.xlu2 %1867  ;;  %v4416_v42 = vld [vmem:[#allocation12_spill] sm:$0xff] }
 0x256   :  { %1946 = vmatmul.f32.gmra.mxu0 %v4081_v21  ;;  %1995 = vmatmul.f32.gmra.mxu1 %v4033_v63  ;;  %v2491_v9 = vsub.f32 %v4416_v42, %v4105_v53 }
 0x258   :  { %2044 = vmatmul.f32.gmra.mxu2 %v4063_v59  ;;  %2089 = vmatmul.f32.gmra.mxu3 %v4071_v4  ;;  %v1752_v37 = vpop.f32.mrf.mxu1 }
 0x25a   :  { %v1709_v46 = vpop.f32.mrf.mxu0 }
 0x25c   :  { %v1605_v10 = vpop.f32.mrf.mxu2  ;;  %v1662_v43 = vpop.f32.mrf.mxu3 }
 0x25d   :  { %v1606_v47 = vadd.f32 %v1605_v10, %v3975_v6  ;;  %v1663_v17 = vadd.f32 %v1662_v43, %v1598_v30 }
 0x25e   :  { %1999 = vmatmul.f32.gmra.mxu1 %v4056_v24  ;;  %2122 = vmatmul.f32.vlgmr.msrb.gmra.mxu0 %v3994_v34 }
 0x260   :  { %v1758_v7 = vpop.f32.mrf.mxu1 }
 0x262   :  { %v1714_v33 = vpop.f32.mrf.mxu0 }
 0x264   :  { %v1613_v35 = vpop.f32.mrf.mxu2  ;;  %v1666_v31 = vpop.f32.mrf.mxu3 }
 0x265   :  { %v1614_v1 = vadd.f32 %v1613_v35, %v3984_v61  ;;  %v1667_v13 = vadd.f32 %v1666_v31, %v1606_v47  ;;  %v1705_v61 = vadd.f32 %v1704_v58, %v1663_v17  ;;  %v4417_v35 = vld [vmem:[#allocation8_spill] sm:$0xff] }
 0x266   :  { %2126 = vmatmul.f32.gmra.mxu0 %v4013_v49  ;;  %2159 = vmatmul.f32.vlgmr.msrb.gmra.mxu1 %v3994_v34  ;;  %v2489_v31 = vsub.f32 %v4417_v35, %v4112_v36 }
 0x267   :  { %v1710_v15 = vadd.f32 %v1709_v46, %v1667_v13  ;;  %v1747_v44 = vadd.f32 %v1746_v14, %v1705_v61  ;;  %v4419_v14 = vld [vmem:[#allocation10_spill] sm:$0xff] }
 0x268   :  { %v1764_v46 = vpop.f32.mrf.mxu1 }
 0x269   :  { %v1753_v27 = vadd.f32 %v1752_v37, %v1710_v15  ;;  %v4418_v37 = vld [vmem:[#allocation9_spill] sm:$0xff] }
 0x26a   :  { %v1719_v41 = vpop.f32.mrf.mxu0 }
 0x26c   :  { %v1621_v50 = vpop.f32.mrf.mxu2  ;;  %v1670_v3 = vpop.f32.mrf.mxu3 }
 0x26d   :  { %v1671_v25 = vadd.f32 %v1670_v3, %v1614_v1  ;;  %v1622_v6 = vadd.f32 %v1621_v50, %v3977_v54  ;;  %v4118_v50 = vpop.permute.xlu2 %2467  ;;  %v2499_v3 = vmul.f32 0.5, %v2491_v9  ;;  %v2487_v1 = vsub.f32 %v4418_v37, %v4114_v12 }
 0x26e   :  { %2163 = vmatmul.f32.gmra.mxu1 %v4013_v49  ;;  %2130 = vmatmul.f32.gmra.mxu0 %v4033_v63 }
 0x26f   :  { %v1715_v29 = vadd.f32 %v1714_v33, %v1671_v25  ;;  %v2497_v25 = vmul.f32 0.5, %v2489_v31  ;;  %v2507_v17 = vmul.f32 %v2499_v3, %v2491_v9 }
 0x271   :  { %v1759_v38 = vadd.f32 %v1758_v7, %v1715_v29  ;;  %v2495_v7 = vmul.f32 0.5, %v2487_v1  ;;  %v4124_v61 = vand.u32 4294901760, %v2507_v17 }
 0x274   :  { %v1674_v40 = vpop.f32.mrf.mxu3  ;;  %v1797_v8 = vpop.f32.mrf.mxu2 }
 0x275   :  { %v1675_v55 = vadd.f32 %v1674_v40, %v1622_v6  ;;  %v1798_v40 = vadd.f32 %v1797_v8, %v1747_v44 }
 0x276   :  { %2167 = vmatmul.f32.gmra.mxu1 %v4033_v63  ;;  %2134 = vmatmul.f32.gmra.mxu0 %v4056_v24 }
 0x277   :  { %v1720_v54 = vadd.f32 %v1719_v41, %v1675_v55  ;;  %v4131_v41 = vsub.f32 %v2507_v17, %v4124_v61 }
 0x279   :  { %v1765_v13 = vadd.f32 %v1764_v46, %v1720_v54  ;;  %v2564_v3 = vand.u32 4294901760, %v4131_v41 }
 0x27c   :  { %v1801_v5 = vpop.f32.mrf.mxu2  ;;  %v1834_v62 = vpop.f32.mrf.mxu3 }
 0x27d   :  { %v1802_v10 = vadd.f32 %v1801_v5, %v1753_v27  ;;  %v1835_v30 = vadd.f32 %v1834_v62, %v1798_v40  ;;  %v2485_v5 = vsub.f32 %v4419_v14, %v4118_v50  ;;  %v2503_v62 = vmul.f32 %v2495_v7, %v2487_v1 }
 0x27e   :  { %2171 = vmatmul.f32.gmra.mxu1 %v4056_v24 }
 0x27f   :  { %v2493_v8 = vmul.f32 0.5, %v2485_v5 }
 0x281   :  { %v2501_v55 = vmul.f32 %v2493_v8, %v2485_v5  ;;  %v2565_v5 = vsub.f32 %v4131_v41, %v2564_v3 }
 0x284   :  { %v1838_v20 = vpop.f32.mrf.mxu3  ;;  %v1805_v18 = vpop.f32.mrf.mxu2 }
 0x285   :  { %v1806_v11 = vadd.f32 %v1805_v18, %v1759_v38  ;;  %v1839_v47 = vadd.f32 %v1838_v20, %v1802_v10  ;;  %v2505_v18 = vmul.f32 %v2497_v25, %v2489_v31 }
 0x287   :  { %v4126_v42 = vand.u32 4294901760, %v2505_v18 }
 0x289   :  { %v4140_v35 = vsub.f32 %v2505_v18, %v4126_v42  ;;  %v2566_v18 = vand.u32 4294901760, %v2565_v5 }
 0x28c   :  { %v1842_v43 = vpop.f32.mrf.mxu3  ;;  %v1809_v33 = vpop.f32.mrf.mxu2 }
 0x28d   :  { %v1843_v58 = vadd.f32 %v1842_v43, %v1806_v11  ;;  %v1810_v29 = vadd.f32 %v1809_v33, %v1765_v13  ;;  %v4133_v11 = vand.u32 4294901760, %v2503_v62  ;;  %v4137_v43 = vand.u32 4294901760, %v2501_v55 }
 0x28e   :  { %v2570_v33 = vand.u32 4294901760, %v4140_v35 }
 0x28f   :  { %3051 = vtanh.f32 %v1843_v58  ;;  %v4147_v40 = vsub.f32 %v2503_v62, %v4133_v11  ;;  %v4151_v37 = vsub.f32 %v2501_v55, %v4137_v43 }
 0x290   :  { %3053 = vtanh.f32 %v1839_v47  ;;  %v2571_v7 = vsub.f32 %v4140_v35, %v2570_v33 }
 0x291   :  { %3055 = vtanh.f32 %v1835_v30  ;;  %v2576_v13 = vand.u32 4294901760, %v4147_v40  ;;  %v2582_v8 = vand.u32 4294901760, %v4151_v37 }
 0x294   :  { %v1846_v15 = vpop.f32.mrf.mxu3 }
 0x295   :  { %v1847_v20 = vadd.f32 %v1846_v15, %v1810_v29  ;;  %v3052_v6 = vpop.eup %3051 }
 0x296   :  { %v3054_v38 = vpop.eup %3053  ;;  %v4128_v27 = vand.u32 4294901760, %v3052_v6 }
 0x297   :  { %3057 = vtanh.f32 %v1847_v20  ;;  %v3056_v9 = vpop.eup %3055  ;;  %v4135_v44 = vand.u32 4294901760, %v3054_v38 }
 0x298   :  { %v2247_v31 = vsub.f32 %v3052_v6, %v4128_v27  ;;  %v4143_v54 = vand.u32 4294901760, %v3056_v9  ;;  %v2577_v6 = vsub.f32 %v4147_v40, %v2576_v13 }
 0x299   :  { %v2253_v46 = vsub.f32 %v3054_v38, %v4135_v44  ;;  %v2572_v38 = vand.u32 4294901760, %v2571_v7 }
 0x29a   :  { %v2259_v1 = vsub.f32 %v3056_v9, %v4143_v54  ;;  %v2248_v30 = vand.u32 4294901760, %v2247_v31  ;;  %v2583_v9 = vsub.f32 %v4151_v37, %v2582_v8 }
 0x29b   :  { %v2254_v25 = vand.u32 4294901760, %v2253_v46 }
 0x29c   :  { %v2249_v29 = vsub.f32 %v2247_v31, %v2248_v30  ;;  %v2260_v15 = vand.u32 4294901760, %v2259_v1 }
 0x29d   :  { %v3058_v10 = vpop.eup %3057  ;;  %v2255_v62 = vsub.f32 %v2253_v46, %v2254_v25 }
 0x29e   :  { %v2187_v58 = vand.u32 4294901760, %v3058_v10  ;;  %v2250_v55 = vand.u32 4294901760, %v2249_v29 }
 0x2a0   :  { %2188 = vmatpush.msrb.mxu2 %v2187_v58  ;;  %2339 = vmatpush.msra.mxu1 %v2187_v58  ;;  %v2241_v47 = vsub.f32 %v3058_v10, %v2187_v58  ;;  %v2261_v10 = vsub.f32 %v2259_v1, %v2260_v15 }
 0x2a2   :  { %2190 = vmatpush.msrb.mxu2 %v4128_v27  ;;  %2295 = vmatpush.msra.mxu0 %v2241_v47  ;;  %v2242_v14 = vand.u32 4294901760, %v2241_v47 }
 0x2a3   :  { %2341 = vmatpush.msra.mxu1 %v4128_v27 }
 0x2a4   :  { %2192 = vmatpush.msrb.mxu2 %v4135_v44  ;;  %2298 = vmatpush.msra.mxu0 %v2247_v31  ;;  %v2243_v17 = vsub.f32 %v2241_v47, %v2242_v14  ;;  %v2256_v31 = vand.u32 4294901760, %v2255_v62  ;;  %v2262_v47 = vand.u32 4294901760, %v2261_v10 }
 0x2a5   :  { %2343 = vmatpush.msra.mxu1 %v4135_v44 }
 0x2a6   :  { %2194 = vmatpush.msrb.mxu2 %v4143_v54  ;;  %2301 = vmatpush.msra.mxu0 %v2253_v46  ;;  %v2244_v20 = vand.u32 4294901760, %v2243_v17  ;;  %v2584_v46 = vand.u32 4294901760, %v2583_v9 }
 0x2a7   :  { %2345 = vmatpush.msra.mxu1 %v4143_v54  ;;  %2200 = vmatmul.f32.vlgmr.msrb.gmra.mxu2 %v4027_v56  ;;  %v2578_v56 = vand.u32 4294901760, %v2577_v6 }
 0x2a8   :  { %2386 = vmatpush.msra.mxu2 %v2242_v14  ;;  %2245 = vmatpush.msrb.mxu3 %v2244_v20 }
 0x2a9   :  { %2567 = vmatpush.msrb.mxu1 %v2566_v18  ;;  %2304 = vmatpush.msra.mxu0 %v2259_v1 }
 0x2aa   :  { %2390 = vmatpush.msra.mxu2 %v2248_v30  ;;  %2251 = vmatpush.msrb.mxu3 %v2250_v55 }
 0x2ab   :  { %2530 = vmatpush.msrb.mxu0 %v4124_v61  ;;  %2573 = vmatpush.msrb.mxu1 %v2572_v38 }
 0x2ac   :  { %2394 = vmatpush.msra.mxu2 %v2254_v25  ;;  %2257 = vmatpush.msrb.mxu3 %v2256_v31 }
 0x2ad   :  { %2532 = vmatpush.msrb.mxu0 %v4126_v42  ;;  %2579 = vmatpush.msrb.mxu1 %v2578_v56  ;;  %v2492_v56 = vsub.f32 %v3948_v22, %v4105_v53  ;;  %v2488_v22 = vsub.f32 %v3938_v23, %v4114_v12 }
 0x2ae   :  { %2398 = vmatpush.msra.mxu2 %v2260_v15  ;;  %2263 = vmatpush.msrb.mxu3 %v2262_v47 }
 0x2af   :  { %2534 = vmatpush.msrb.mxu0 %v4133_v11  ;;  %2585 = vmatpush.msrb.mxu1 %v2584_v46 }
 0x2b0   :  { %2625 = vmatpush.msrb.mxu2 %v4131_v41  ;;  %2265 = vmatmul.f32.vlgmr.msrb.gmra.mxu3 %v3994_v34 }
 0x2b1   :  { %2208 = vmatmul.f32.gmra.mxu2 %v4051_v28  ;;  %2429 = vmatpush.msra.mxu3 %v2187_v58 }
 0x2b2   :  { %2536 = vmatpush.msrb.mxu0 %v4137_v43  ;;  %2628 = vmatpush.msrb.mxu2 %v4140_v35 }
 0x2b3   :  { %2431 = vmatpush.msra.mxu3 %v4128_v27  ;;  %2307 = vmatmul.f32.vlgmr.msra.gmra.mxu0 %v4002_v57 }
 0x2b4   :  { %2631 = vmatpush.msrb.mxu2 %v4147_v40  ;;  %2349 = vmatmul.f32.vlgmr.msra.gmra.mxu1 %v4011_v19 }
 0x2b5   :  { %2433 = vmatpush.msra.mxu3 %v4135_v44 }
 0x2b6   :  { %2634 = vmatpush.msrb.mxu2 %v4151_v37 }
 0x2b7   :  { %2435 = vmatpush.msra.mxu3 %v4143_v54 }
 0x2b8   :  { %2269 = vmatmul.f32.gmra.mxu3 %v4013_v49 }
 0x2b9   :  { %2662 = vmatpush.msrb.mxu3 %v4124_v61  ;;  %2216 = vmatmul.f32.gmra.mxu2 %v4068_v60 }
 0x2bb   :  { %2664 = vmatpush.msrb.mxu3 %v4126_v42  ;;  %v1923_v28 = vpop.f32.mrf.mxu0  ;;  %2312 = vmatmul.f32.gmra.mxu0 %v4023_v52 }
 0x2bc   :  { %2355 = vmatmul.f32.gmra.mxu1 %v4031_v48 }
 0x2bd   :  { %2666 = vmatpush.msrb.mxu3 %v4133_v11 }
 0x2bf   :  { %2668 = vmatpush.msrb.mxu3 %v4137_v43 }
 0x2c0   :  { %2273 = vmatmul.f32.gmra.mxu3 %v4033_v63 }
 0x2c1   :  { %2224 = vmatmul.f32.gmra.mxu2 %v4081_v21 }
 0x2c3   :  { %v1931_v57 = vpop.f32.mrf.mxu0  ;;  %v1988_v19 = vpop.f32.mrf.mxu1  ;;  %2317 = vmatmul.f32.gmra.mxu0 %v4046_v45 }
 0x2c4   :  { %2361 = vmatmul.f32.gmra.mxu1 %v4054_v26  ;;  %v2030_v48 = vpop.f32.mrf.mxu2  ;;  %v2072_v45 = vpop.f32.mrf.mxu3  ;;  %v1932_v17 = vadd.f32 %v1931_v57, %v4102_v39 }
 0x2c8   :  { %2277 = vmatmul.f32.gmra.mxu3 %v4056_v24 }
 0x2c9   :  { %2400 = vmatmul.f32.vlgmr.msra.gmra.mxu2 %v3994_v34 }
 0x2cb   :  { %v1939_v52 = vpop.f32.mrf.mxu0  ;;  %v1992_v60 = vpop.f32.mrf.mxu1  ;;  %2322 = vmatmul.f32.gmra.mxu0 %v4063_v59 }
 0x2cc   :  { %2367 = vmatmul.f32.gmra.mxu1 %v4071_v4  ;;  %v2035_v44 = vpop.f32.mrf.mxu2  ;;  %v2078_v58 = vpop.f32.mrf.mxu3  ;;  %v1940_v59 = vadd.f32 %v1939_v52, %v4097_v51  ;;  %v1924_v4 = vadd.f32 %v1923_v28, %v4107_v32  ;;  %v1993_v15 = vadd.f32 %v1992_v60, %v1932_v17  ;;  %v2490_v28 = vsub.f32 %v3932_v16, %v4112_v36  ;;  %v2509_v60 = vld [vmem:[%s4367_s6] sm:$0x1]  ;;  %s3102_s6 = smov [#allocation3]  }
 0x2cd   :  { %s3011_s13 = sshll.u32 %s3102_s6, 4  ;;  %s3012_s13 = int_to_ptr.vmem [resolvable:$true] %s3011_s13 }
 0x2ce   :  { %v1989_v5 = vadd.f32 %v1988_v19, %v1924_v4  ;;  %v2036_v55 = vadd.f32 %v2035_v44, %v1993_v15  ;;  %v2498_v16 = vmul.f32 0.5, %v2490_v28 }
 0x2d0   :  { %2437 = vmatmul.f32.vlgmr.msra.gmra.mxu3 %v3994_v34  ;;  %v2031_v29 = vadd.f32 %v2030_v48, %v1989_v5  ;;  %v2079_v47 = vadd.f32 %v2078_v58, %v2036_v55  ;;  %v2500_v48 = vmul.f32 0.5, %v2492_v56  ;;  %v2496_v58 = vmul.f32 0.5, %v2488_v22 }
 0x2d1   :  { %2404 = vmatmul.f32.gmra.mxu2 %v4013_v49 }
 0x2d2   :  { %v2508_v36 = vmul.f32 %v2500_v48, %v2492_v56  ;;  %v2504_v5 = vmul.f32 %v2496_v58, %v2488_v22 }
 0x2d3   :  { %v1947_v21 = vpop.f32.mrf.mxu0  ;;  %v1996_v27 = vpop.f32.mrf.mxu1 }
 0x2d4   :  { %v2040_v34 = vpop.f32.mrf.mxu2  ;;  %v1997_v14 = vadd.f32 %v1996_v27, %v1940_v59  ;;  %v2084_v25 = vpop.f32.mrf.mxu3  ;;  %v4249_v15 = vand.u32 4294901760, %v2504_v5 }
 0x2d6   :  { %v2041_v7 = vadd.f32 %v2040_v34, %v1997_v14  ;;  %v4267_v56 = vsub.f32 %v2504_v5, %v4249_v15 }
 0x2d8   :  { %2441 = vmatmul.f32.gmra.mxu3 %v4013_v49  ;;  %v1948_v49 = vadd.f32 %v1947_v21, %v4093_v2  ;;  %v2085_v62 = vadd.f32 %v2084_v25, %v2041_v7  ;;  %v2813_v48 = vand.u32 4294901760, %v4267_v56 }
 0x2d9   :  { %2408 = vmatmul.f32.gmra.mxu2 %v4033_v63 }
 0x2db   :  { %v2000_v26 = vpop.f32.mrf.mxu1  ;;  %v2123_v54 = vpop.f32.mrf.mxu0 }
 0x2dc   :  { %v2001_v6 = vadd.f32 %v2000_v26, %v1948_v49  ;;  %v2045_v38 = vpop.f32.mrf.mxu2  ;;  %v2090_v46 = vpop.f32.mrf.mxu3  ;;  %v2486_v26 = vsub.f32 %v3943_v0, %v4118_v50 }
 0x2de   :  { %v2046_v10 = vadd.f32 %v2045_v38, %v2001_v6  ;;  %v2494_v23 = vmul.f32 0.5, %v2486_v26 }
 0x2e0   :  { %2445 = vmatmul.f32.gmra.mxu3 %v4033_v63  ;;  %v2073_v63 = vadd.f32 %v2072_v45, %v2031_v29  ;;  %v2091_v52 = vadd.f32 %v2090_v46, %v2046_v10  ;;  %v2519_v45 = vsel %vm2517_vm1, %v2509_v60, 0  ;;  %v2502_v49 = vmul.f32 %v2494_v23, %v2486_v26 }
 0x2e1   :  { %2412 = vmatmul.f32.gmra.mxu2 %v4056_v24  ;;  %v2814_v26 = vsub.f32 %v4267_v56, %v2813_v48 }
 0x2e2   :  { %v2124_v31 = vadd.f32 %v2123_v54, %v2073_v63  ;;  %v4229_v54 = vand.u32 4294901760, %v2519_v45  ;;  %v4261_v55 = vand.u32 4294901760, %v2502_v49 }
 0x2e3   :  { %v2127_v1 = vpop.f32.mrf.mxu0  ;;  %v2160_v30 = vpop.f32.mrf.mxu1 }
 0x2e4   :  { %v2161_v21 = vadd.f32 %v2160_v30, %v2124_v31  ;;  %v4231_v30 = vand.u32 4294901760, %v2508_v36  ;;  %v4236_v14 = vsub.f32 %v2519_v45, %v4229_v54 }
 0x2e6   :  { %v4241_v17 = vsub.f32 %v2508_v36, %v4231_v30  ;;  %v4247_v29 = vand.u32 4294901760, %v4236_v14 }
 0x2e8   :  { %2449 = vmatmul.f32.gmra.mxu3 %v4056_v24  ;;  %v2128_v24 = vadd.f32 %v2127_v1, %v2079_v47  ;;  %v2506_v1 = vmul.f32 %v2498_v16, %v2490_v28  ;;  %v2801_v38 = vand.u32 4294901760, %v4241_v17 }
 0x2ea   :  { %v4238_v25 = vand.u32 4294901760, %v2506_v1 }
 0x2eb   :  { %v2164_v18 = vpop.f32.mrf.mxu1  ;;  %v2131_v20 = vpop.f32.mrf.mxu0 }
 0x2ec   :  { %v2132_v9 = vadd.f32 %v2131_v20, %v2085_v62  ;;  %v2165_v53 = vadd.f32 %v2164_v18, %v2128_v24  ;;  %v4256_v62 = vsub.f32 %v2506_v1, %v4238_v25  ;;  %v2815_v1 = vand.u32 4294901760, %v2814_v26 }
 0x2ee   :  { %v2807_v28 = vand.u32 4294901760, %v4256_v62 }
 0x2f3   :  { %v2168_v57 = vpop.f32.mrf.mxu1  ;;  %v2135_v27 = vpop.f32.mrf.mxu0 }
 0x2f4   :  { %v2169_v19 = vadd.f32 %v2168_v57, %v2132_v9  ;;  %v2136_v44 = vadd.f32 %v2135_v27, %v2091_v52  ;;  %v2548_v9 = vsub.f32 %v4236_v14, %v4247_v29  ;;  %v2802_v57 = vsub.f32 %v4241_v17, %v2801_v38 }
 0x2f6   :  { %3059 = vtanh.f32 %v2169_v19  ;;  %v4280_v19 = vsub.f32 %v2502_v49, %v4261_v55  ;;  %v4283_v52 = vand.u32 4294901760, %v2548_v9  ;;  %v2803_v45 = vand.u32 4294901760, %v2802_v57 }
 0x2f7   :  { %3061 = vtanh.f32 %v2161_v21 }
 0x2f8   :  { %3063 = vtanh.f32 %v2165_v53  ;;  %v2808_v53 = vsub.f32 %v4256_v62, %v2807_v28  ;;  %v2819_v16 = vand.u32 4294901760, %v4280_v19 }
 0x2fb   :  { %v2172_v59 = vpop.f32.mrf.mxu1 }
 0x2fc   :  { %v3060_v4 = vpop.eup %3059  ;;  %v2173_v34 = vadd.f32 %v2172_v59, %v2136_v44 }
 0x2fd   :  { %v4233_v12 = vand.u32 4294901760, %v3060_v4  ;;  %v3062_v0 = vpop.eup %3061 }
 0x2fe   :  { %3065 = vtanh.f32 %v2173_v34  ;;  %v3064_v50 = vpop.eup %3063  ;;  %v4253_v20 = vand.u32 4294901760, %v3062_v0  ;;  %v2820_v34 = vsub.f32 %v4280_v19, %v2819_v16 }
 0x2ff   :  { %v4244_v7 = vsub.f32 %v3060_v4, %v4233_v12  ;;  %v4251_v18 = vand.u32 4294901760, %v3064_v50  ;;  %v2809_v4 = vand.u32 4294901760, %v2808_v53 }
 0x300   :  { %v2605_v47 = vsub.f32 %v3062_v0, %v4253_v20  ;;  %v2821_v35 = vand.u32 4294901760, %v2820_v34 }
 0x301   :  { %v2594_v10 = vand.u32 4294901760, %v4244_v7  ;;  %v2599_v46 = vsub.f32 %v3064_v50, %v4251_v18 }
 0x302   :  { %v2606_v22 = vand.u32 4294901760, %v2605_v47 }
 0x303   :  { %v2595_v60 = vsub.f32 %v4244_v7, %v2594_v10  ;;  %v2600_v27 = vand.u32 4294901760, %v2599_v46 }
 0x304   :  { %v3066_v6 = vpop.eup %3065  ;;  %v2607_v59 = vsub.f32 %v2605_v47, %v2606_v22 }
 0x305   :  { %v4258_v63 = vand.u32 4294901760, %v3066_v6  ;;  %v2596_v36 = vand.u32 4294901760, %v2595_v60  ;;  %v2601_v58 = vsub.f32 %v2599_v46, %v2600_v27 }
 0x307   :  { %2538 = vmatpush.msrb.mxu0 %v4258_v63  ;;  %2670 = vmatpush.msrb.mxu3 %v4258_v63  ;;  %v2587_v31 = vsub.f32 %v3066_v6, %v4258_v63  ;;  %v2602_v41 = vand.u32 4294901760, %v2601_v58 }
 0x309   :  { %2540 = vmatpush.msrb.mxu0 %v4233_v12  ;;  %2637 = vmatpush.msrb.mxu2 %v2587_v31  ;;  %v2588_v24 = vand.u32 4294901760, %v2587_v31 }
 0x30a   :  { %2672 = vmatpush.msrb.mxu3 %v4233_v12 }
 0x30b   :  { %2542 = vmatpush.msrb.mxu0 %v4251_v18  ;;  %2640 = vmatpush.msrb.mxu2 %v4244_v7  ;;  %v2589_v21 = vsub.f32 %v2587_v31, %v2588_v24 }
 0x30c   :  { %2674 = vmatpush.msrb.mxu3 %v4251_v18 }
 0x30d   :  { %2544 = vmatpush.msrb.mxu0 %v4253_v20  ;;  %2643 = vmatpush.msrb.mxu2 %v2599_v46  ;;  %v2590_v44 = vand.u32 4294901760, %v2589_v21 }
 0x30e   :  { %2676 = vmatpush.msrb.mxu3 %v4253_v20  ;;  %2550 = vmatmul.f32.vlgmr.msrb.gmra.mxu0 %v4283_v52 }
 0x30f   :  { %2695 = vmatpush.msra.mxu0 %v2564_v3  ;;  %2591 = vmatpush.msrb.mxu1 %v2590_v44  ;;  %v2608_v3 = vand.u32 4294901760, %v2607_v59 }
 0x310   :  { %2804 = vmatpush.msra.mxu3 %v2803_v45  ;;  %2646 = vmatpush.msrb.mxu2 %v2605_v47 }
 0x311   :  { %2699 = vmatpush.msra.mxu0 %v2570_v33  ;;  %2597 = vmatpush.msrb.mxu1 %v2596_v36 }
 0x312   :  { %2767 = vmatpush.msra.mxu2 %v4231_v30  ;;  %2810 = vmatpush.msra.mxu3 %v2809_v4 }
 0x313   :  { %2649 = vmatmul.f32.vlgmr.msrb.gmra.mxu2 %v4236_v14  ;;  %2703 = vmatpush.msra.mxu0 %v2576_v13 }
 0x314   :  { %2769 = vmatpush.msra.mxu2 %v4238_v25  ;;  %2816 = vmatpush.msra.mxu3 %v2815_v1 }
 0x315   :  { %2603 = vmatpush.msrb.mxu1 %v2602_v41  ;;  %2680 = vmatmul.f32.vlgmr.msrb.gmra.mxu3 %v4247_v29 }
 0x316   :  { %2707 = vmatpush.msra.mxu0 %v2582_v8  ;;  %2771 = vmatpush.msra.mxu2 %v4249_v15 }
 0x317   :  { %2822 = vmatpush.msra.mxu3 %v2821_v35  ;;  %2609 = vmatpush.msrb.mxu1 %v2608_v3 }
 0x318   :  { %2611 = vmatmul.f32.vlgmr.msrb.gmra.mxu1 %v4229_v54  ;;  %2711 = vmatpush.msra.mxu0 %v2588_v24 }
 0x319   :  { %2738 = vmatpush.msra.mxu1 %v4124_v61  ;;  %2773 = vmatpush.msra.mxu2 %v4261_v55 }
 0x31a   :  { %2715 = vmatpush.msra.mxu0 %v2594_v10 }
 0x31b   :  { %2740 = vmatpush.msra.mxu1 %v4126_v42 }
 0x31c   :  { %2719 = vmatpush.msra.mxu0 %v2600_v27 }
 0x31d   :  { %2742 = vmatpush.msra.mxu1 %v4133_v11 }
 0x31e   :  { %2723 = vmatpush.msra.mxu0 %v2606_v22 }
 0x31f   :  { %2744 = vmatpush.msra.mxu1 %v4137_v43  ;;  %2725 = vmatmul.f32.vlgmr.msra.gmra.mxu0 %v4229_v54 }
 0x320   :  { %2862 = vmatpush.msrb.mxu0 %v4241_v17 }
 0x321   :  { %2746 = vmatpush.msra.mxu1 %v4258_v63 }
 0x322   :  { %2865 = vmatpush.msrb.mxu0 %v4256_v62  ;;  %v2514_v62 = vpop.permute.xlu0 %2513 }
 0x323   :  { %2748 = vmatpush.msra.mxu1 %v4233_v12 }
 0x324   :  { %2868 = vmatpush.msrb.mxu0 %v4267_v56  ;;  %v2516_v56 = vperm.slane %v2514_v62, 0 }
 0x325   :  { %2750 = vmatpush.msra.mxu1 %v4251_v18 }
 0x326   :  { %2871 = vmatpush.msrb.mxu0 %v4280_v19 }
 0x327   :  { %2752 = vmatpush.msra.mxu1 %v4253_v20 }
 0x328   :  { %2754 = vmatmul.f32.vlgmr.msra.gmra.mxu1 %v4229_v54 }
 0x329   :  { %2899 = vmatpush.msrb.mxu1 %v4231_v30 }
 0x32a   :  { %v2201_v61 = vpop.f32.mrf.mxu2 }
 0x32b   :  { %2901 = vmatpush.msrb.mxu1 %v4238_v25  ;;  %v2202_v18 = vadd.f32 %v2201_v61, %v4107_v32 }
 0x32d   :  { %2903 = vmatpush.msrb.mxu1 %v4249_v15 }
 0x32f   :  { %2905 = vmatpush.msrb.mxu1 %v4261_v55 }
 0x330   :  { %v2308_v37 = vpop.f32.mrf.mxu0 }
 0x331   :  { %v2350_v8 = vpop.f32.mrf.mxu1 }
 0x333   :  { %v2266_v42 = vpop.f32.mrf.mxu3 }
 0x334   :  { %v2209_v11 = vpop.f32.mrf.mxu2  ;;  %v2267_v10 = vadd.f32 %v2266_v42, %v2202_v18 }
 0x335   :  { %v2210_v20 = vadd.f32 %v2209_v11, %v4102_v39 }
 0x336   :  { %v2309_v60 = vadd.f32 %v2308_v37, %v2267_v10 }
 0x338   :  { %v2313_v5 = vpop.f32.mrf.mxu0  ;;  %v2351_v45 = vadd.f32 %v2350_v8, %v2309_v60 }
 0x339   :  { %v2356_v0 = vpop.f32.mrf.mxu1 }
 0x33b   :  { %v2270_v40 = vpop.f32.mrf.mxu3 }
 0x33c   :  { %v2217_v43 = vpop.f32.mrf.mxu2  ;;  %v2271_v63 = vadd.f32 %v2270_v40, %v2210_v20 }
 0x33d   :  { %v2218_v7 = vadd.f32 %v2217_v43, %v4097_v51 }
 0x33e   :  { %v2314_v47 = vadd.f32 %v2313_v5, %v2271_v63 }
 0x340   :  { %v2318_v6 = vpop.f32.mrf.mxu0  ;;  %v2357_v27 = vadd.f32 %v2356_v0, %v2314_v47 }
 0x341   :  { %v2362_v31 = vpop.f32.mrf.mxu1 }
 0x343   :  { %v2274_v13 = vpop.f32.mrf.mxu3 }
 0x344   :  { %v2225_v33 = vpop.f32.mrf.mxu2  ;;  %v2275_v9 = vadd.f32 %v2274_v13, %v2218_v7 }
 0x345   :  { %v2226_v21 = vadd.f32 %v2225_v33, %v4093_v2 }
 0x346   :  { %v2319_v57 = vadd.f32 %v2318_v6, %v2275_v9 }
 0x348   :  { %v2363_v53 = vadd.f32 %v2362_v31, %v2319_v57  ;;  %v2323_v51 = vpop.f32.mrf.mxu0 }
 0x349   :  { %v2368_v4 = vpop.f32.mrf.mxu1 }
 0x34b   :  { %v2278_v23 = vpop.f32.mrf.mxu3 }
 0x34c   :  { %v2401_v12 = vpop.f32.mrf.mxu2  ;;  %v2279_v22 = vadd.f32 %v2278_v23, %v2226_v21 }
 0x34d   :  { %v2402_v36 = vadd.f32 %v2401_v12, %v2351_v45 }
 0x34e   :  { %v2324_v58 = vadd.f32 %v2323_v51, %v2279_v22  ;;  %v3001_v22 = vlaneseq }
 0x350   :  { %v2369_v41 = vadd.f32 %v2368_v4, %v2324_v58  ;;  %vm3003_vm4 = vcmp.lt.s32.totalorder %v3001_v22, 256 }
 0x353   :  { %v2438_v49 = vpop.f32.mrf.mxu3 }
 0x354   :  { %v2405_v50 = vpop.f32.mrf.mxu2  ;;  %v2439_v34 = vadd.f32 %v2438_v49, %v2402_v36 }
 0x355   :  { %v2406_v32 = vadd.f32 %v2405_v50, %v2357_v27 }
 0x35b   :  { %v2442_v46 = vpop.f32.mrf.mxu3 }
 0x35c   :  { %v2409_v24 = vpop.f32.mrf.mxu2  ;;  %v2443_v26 = vadd.f32 %v2442_v46, %v2406_v32 }
 0x35d   :  { %v2410_v44 = vadd.f32 %v2409_v24, %v2363_v53 }
 0x363   :  { %v2446_v39 = vpop.f32.mrf.mxu3 }
 0x364   :  { %v2447_v59 = vadd.f32 %v2446_v39, %v2410_v44  ;;  %v2413_v1 = vpop.f32.mrf.mxu2 }
 0x365   :  { %v2414_v2 = vadd.f32 %v2413_v1, %v2369_v41 }
 0x366   :  { %3067 = vtanh.f32 %v2447_v59 }
 0x367   :  { %3069 = vtanh.f32 %v2443_v26 }
 0x368   :  { %3071 = vtanh.f32 %v2439_v34 }
 0x36b   :  { %v2450_v3 = vpop.f32.mrf.mxu3 }
 0x36c   :  { %v3068_v35 = vpop.eup %3067  ;;  %v2451_v61 = vadd.f32 %v2450_v3, %v2414_v2 }
 0x36d   :  { %v3070_v42 = vpop.eup %3069  ;;  %v2776_v11 = vand.u32 4294901760, %v3068_v35 }
 0x36e   :  { %3073 = vtanh.f32 %v2451_v61  ;;  %v3072_v43 = vpop.eup %3071  ;;  %v2778_v40 = vand.u32 4294901760, %v3070_v42 }
 0x36f   :  { %v2830_v37 = vsub.f32 %v3068_v35, %v2776_v11  ;;  %v2780_v33 = vand.u32 4294901760, %v3072_v43 }
 0x370   :  { %v2836_v23 = vsub.f32 %v3070_v42, %v2778_v40 }
 0x371   :  { %v2842_v5 = vsub.f32 %v3072_v43, %v2780_v33  ;;  %v2831_v0 = vand.u32 4294901760, %v2830_v37 }
 0x372   :  { %v2837_v49 = vand.u32 4294901760, %v2836_v23 }
 0x373   :  { %v2832_v18 = vsub.f32 %v2830_v37, %v2831_v0  ;;  %v2843_v20 = vand.u32 4294901760, %v2842_v5 }
 0x374   :  { %v3074_v13 = vpop.eup %3073  ;;  %v2838_v63 = vsub.f32 %v2836_v23, %v2837_v49 }
 0x375   :  { %v2774_v8 = vand.u32 4294901760, %v3074_v13  ;;  %v2833_v9 = vand.u32 4294901760, %v2832_v18  ;;  %v2844_v10 = vsub.f32 %v2842_v5, %v2843_v20 }
 0x376   :  { %v2839_v31 = vand.u32 4294901760, %v2838_v63 }
 0x377   :  { %2775 = vmatpush.msra.mxu2 %v2774_v8  ;;  %2907 = vmatpush.msrb.mxu1 %v2774_v8  ;;  %v2824_v12 = vsub.f32 %v3074_v13, %v2774_v8 }
 0x379   :  { %2777 = vmatpush.msra.mxu2 %v2776_v11  ;;  %2874 = vmatpush.msrb.mxu0 %v2824_v12  ;;  %v2825_v50 = vand.u32 4294901760, %v2824_v12 }
 0x37a   :  { %2909 = vmatpush.msrb.mxu1 %v2776_v11 }
 0x37b   :  { %2779 = vmatpush.msra.mxu2 %v2778_v40  ;;  %2877 = vmatpush.msrb.mxu0 %v2830_v37  ;;  %v2826_v7 = vsub.f32 %v2824_v12, %v2825_v50 }
 0x37c   :  { %2911 = vmatpush.msrb.mxu1 %v2778_v40 }
 0x37d   :  { %2781 = vmatpush.msra.mxu2 %v2780_v33  ;;  %2880 = vmatpush.msrb.mxu0 %v2836_v23  ;;  %v2827_v6 = vand.u32 4294901760, %v2826_v7 }
 0x37e   :  { %2913 = vmatpush.msrb.mxu1 %v2780_v33  ;;  %2787 = vmatmul.f32.vlgmr.msra.gmra.mxu2 %v4283_v52  ;;  %v2845_v52 = vand.u32 4294901760, %v2844_v10 }
 0x37f   :  { %2932 = vmatpush.msrb.mxu2 %v2801_v38  ;;  %2828 = vmatpush.msra.mxu3 %v2827_v6 }
 0x380   :  { %2883 = vmatpush.msrb.mxu0 %v2842_v5  ;;  %2917 = vmatmul.f32.vlgmr.msrb.gmra.mxu1 %v4247_v29 }
 0x381   :  { %2936 = vmatpush.msrb.mxu2 %v2807_v28  ;;  %2834 = vmatpush.msra.mxu3 %v2833_v9 }
 0x382   :  { %2886 = vmatmul.f32.vlgmr.msrb.gmra.mxu0 %v4236_v14 }
 0x383   :  { %2940 = vmatpush.msrb.mxu2 %v2813_v48  ;;  %2840 = vmatpush.msra.mxu3 %v2839_v31 }
 0x385   :  { %2944 = vmatpush.msrb.mxu2 %v2819_v16  ;;  %2846 = vmatpush.msra.mxu3 %v2845_v52 }
 0x386   :  { %2848 = vmatmul.f32.vlgmr.msra.gmra.mxu3 %v4229_v54 }
 0x387   :  { %2948 = vmatpush.msrb.mxu2 %v2825_v50  ;;  %2975 = vmatpush.msrb.mxu3 %v4231_v30 }
 0x389   :  { %2952 = vmatpush.msrb.mxu2 %v2831_v0  ;;  %2977 = vmatpush.msrb.mxu3 %v4238_v25 }
 0x38b   :  { %2956 = vmatpush.msrb.mxu2 %v2837_v49  ;;  %2979 = vmatpush.msrb.mxu3 %v4249_v15  ;;  %v2551_v14 = vpop.f32.mrf.mxu0 }
 0x38d   :  { %2960 = vmatpush.msrb.mxu2 %v2843_v20  ;;  %2981 = vmatpush.msrb.mxu3 %v4261_v55  ;;  %v2552_v55 = vadd.f32 %v2551_v14, %v2516_v56 }
 0x38e   :  { %2962 = vmatmul.f32.vlgmr.msrb.gmra.mxu2 %v4229_v54 }
 0x38f   :  { %2983 = vmatpush.msrb.mxu3 %v2774_v8 }
 0x391   :  { %2985 = vmatpush.msrb.mxu3 %v2776_v11 }
 0x393   :  { %2987 = vmatpush.msrb.mxu3 %v2778_v40 }
 0x395   :  { %2989 = vmatpush.msrb.mxu3 %v2780_v33  ;;  %v2612_v30 = vpop.f32.mrf.mxu1 }
 0x396   :  { %2991 = vmatmul.f32.vlgmr.msrb.gmra.mxu3 %v4229_v54  ;;  %v2650_v17 = vpop.f32.mrf.mxu2  ;;  %v2613_v46 = vadd.f32 %v2612_v30, %v2552_v55 }
 0x398   :  { %v2681_v29 = vpop.f32.mrf.mxu3  ;;  %v2651_v24 = vadd.f32 %v2650_v17, %v2613_v46 }
 0x39a   :  { %v2682_v21 = vadd.f32 %v2681_v29, %v2651_v24 }
 0x39c   :  { %v2726_v25 = vpop.f32.mrf.mxu0 }
 0x39d   :  { %v2727_v51 = vadd.f32 %v2726_v25, %v2682_v21 }
 0x3a5   :  { %v2755_v15 = vpop.f32.mrf.mxu1 }
 0x3a6   :  { %v2756_v32 = vadd.f32 %v2755_v15, %v2727_v51 }
 0x3fd   :  { %v2918_v57 = vpop.f32.mrf.mxu1 }
 0x3ff   :  { %v2887_v16 = vpop.f32.mrf.mxu0 }
 0x401   :  { %v2788_v38 = vpop.f32.mrf.mxu2 }
 0x402   :  { %v2789_v19 = vadd.f32 %v2788_v38, %v2516_v56 }
 0x409   :  { %v2849_v28 = vpop.f32.mrf.mxu3 }
 0x40a   :  { %v2850_v48 = vadd.f32 %v2849_v28, %v2789_v19 }
 0x40c   :  { %v2888_v47 = vadd.f32 %v2887_v16, %v2850_v48 }
 0x40e   :  { %v2919_v60 = vadd.f32 %v2918_v57, %v2888_v47 }
 0x411   :  { %v2963_v54 = vpop.f32.mrf.mxu2 }
 0x412   :  { %v2964_v27 = vadd.f32 %v2963_v54, %v2919_v60 }
 0x419   :  { %v2992_v53 = vpop.f32.mrf.mxu3 }
 0x41a   :  { %v2993_v45 = vadd.f32 %v2992_v53, %v2964_v27 }
 0x41c   :  { %v2997_v44 = vrot.slane %v2993_v45, 7 }
 0x41e   :  { %v2999_v39 = vsel %vm2998_vm3, %v2756_v32, %v2997_v44 }
 0x41f   :  { %3005 = vst.msk [vmem:[#allocation3] sm:$0x3] %vm3003_vm4, %v2999_v39 }
 0x420   :  { %3016 = dma.vmem_to_hbm [thread:$0]  %s3012_s13, 32, %s3014_s16, [#allocation4]  }
 0x421   :  { %3099 = dma.done.wait [#allocation4], 32  }
 0x422   :  { %3100 = vsyncadd [#allocation4], 4294967264 }
 0x423   :  { %3021 = vsyncpa [#allocation4], 1 }

</bundles_post_ra>
